<compile_context>
chip_gen: v7x
topology: tpu7x:2x2x1
jax: 0.10.0
libtpu: 0.0.40
codegen_flags: <defaults>
</compile_context>

<pallas_src>
import math
import functools

import jax
import jax.numpy as jnp
from jax.experimental import pallas as pl
from jax.experimental.pallas import tpu as pltpu

# ---------------- model hyper-parameters (small, bert-tiny-like) -------------
VOCAB = 100
SEQ = 8
HIDDEN = 32
NUM_HEADS = 2
HEAD_DIM = HIDDEN // NUM_HEADS
INTERMEDIATE = 64
NUM_LAYERS = 2
N_CLASSES = 3          # module asserts n_classes > 1
CPAD = 128             # classifier padded to a full lane width (lane-dense store)
LN_EPS = 1e-12


def _layernorm(x, gamma, beta):
    mu = jnp.mean(x, axis=-1, keepdims=True)
    var = jnp.mean((x - mu) ** 2, axis=-1, keepdims=True)
    return (x - mu) * jax.lax.rsqrt(var + LN_EPS) * gamma + beta


# ------------------------------ fused kernel ---------------------------------
def fused_forward_kernel(x_ref, addend_ref, onehot_ref, sel_ref,
                         embg_ref, embb_ref,
                         wq_ref, bq_ref, wk_ref, bk_ref, wv_ref, bv_ref,
                         wo_ref, bo_ref, ln1g_ref, ln1b_ref,
                         wi_ref, bi_ref, wo2_ref, bo2_ref,
                         ln2g_ref, ln2b_ref,
                         wp_ref, bp_ref, wc_ref, bc_ref,
                         logits_ref, nll_ref):
    Ms, H = x_ref.shape                       # Ms = Bs * S (shard's rows)
    Bs = addend_ref.shape[0]
    S = addend_ref.shape[2]
    NH = wq_ref.shape[1]
    HD = wq_ref.shape[3]
    G = NH * Bs
    scale = 1.0 / math.sqrt(HD)

    # ---- embedding LayerNorm over the flattened [Bs*S, H] slab --------------
    x = _layernorm(x_ref[...], embg_ref[...], embb_ref[...])

    # additive attention mask, broadcast ONCE per call to the grouped shape
    # [NH*Bs, S, S] (JAX does not CSE broadcast_in_dim; keep it out of loops).
    addend_g = jnp.broadcast_to(addend_ref[...][None],
                                (NH, Bs, S, S)).reshape(G, S, S)

    # ---- transformer encoder layers (static unroll; weights stacked on L) ---
    for l in range(NUM_LAYERS):
        # per-head projections: the Q/K/V/head split lives on static weights,
        # so no sub-128-lane slicing of activations is ever emitted.
        q_hs, k_hs, v_hs = [], [], []
        for h in range(NH):                                 # static, 2 heads
            q_hs.append(jnp.dot(x, wq_ref[l, h],
                                preferred_element_type=jnp.float32) + bq_ref[l, h])
            k_hs.append(jnp.dot(x, wk_ref[l, h],
                                preferred_element_type=jnp.float32) + bk_ref[l, h])
            v_hs.append(jnp.dot(x, wv_ref[l, h],
                                preferred_element_type=jnp.float32) + bv_ref[l, h])
        # stack heads along the leading (sublane-major) axis -> [NH*Bs, S, HD]
        q = jnp.concatenate(q_hs, axis=0).reshape(G, S, HD)
        k = jnp.concatenate(k_hs, axis=0).reshape(G, S, HD)
        v = jnp.concatenate(v_hs, axis=0).reshape(G, S, HD)

        # one batched einsum over all heads*batches (single matmul chain)
        s = jnp.einsum('gqd,gkd->gqk', q, k,
                       preferred_element_type=jnp.float32) * scale
        s = s + addend_g
        s = s - jnp.max(s, axis=-1, keepdims=True)
        p = jnp.exp(s)
        p = p / jnp.sum(p, axis=-1, keepdims=True)          # exact softmax
        ctx = jnp.einsum('gqk,gkd->gqd', p, v,
                         preferred_element_type=jnp.float32)
        ctx = ctx.reshape(NH, Ms, HD)

        # head-concat folded into the output projection: accumulate per-head
        # matmuls into one f32 value (no lane-dim concatenation).
        attn_out = bo_ref[l]
        for h in range(NH):
            attn_out = attn_out + jnp.dot(ctx[h], wo_ref[l, h],
                                          preferred_element_type=jnp.float32)
        h1 = _layernorm(x + attn_out, ln1g_ref[l], ln1b_ref[l])

        # TODO(synk): HF BERT uses exact (erf) GELU; tanh approximation used here.
        ffn = jax.nn.gelu(
            jnp.dot(h1, wi_ref[l], preferred_element_type=jnp.float32) + bi_ref[l],
            approximate=True)
        ffn = (jnp.dot(ffn, wo2_ref[l], preferred_element_type=jnp.float32)
               + bo2_ref[l])
        x = _layernorm(h1 + ffn, ln2g_ref[l], ln2b_ref[l])

    # ---- pooler (tanh on CLS) + classifier + per-example NLL ----------------
    # CLS rows picked with a selection matmul (stays on MXU, no sublane gather)
    cls = jnp.dot(sel_ref[...], x, preferred_element_type=jnp.float32)   # [Bs,H]
    pooled = jnp.tanh(
        jnp.dot(cls, wp_ref[...], preferred_element_type=jnp.float32)
        + bp_ref[...])
    # classifier padded to CPAD lanes (pad bias = -1e9 -> exp underflows to 0)
    logits = (jnp.dot(pooled, wc_ref[...], preferred_element_type=jnp.float32)
              + bc_ref[...])                                             # [Bs,CPAD]
    logits_ref[...] = logits                                             # lane-dense

    shifted = logits - jnp.max(logits, axis=-1, keepdims=True)
    logz = jnp.log(jnp.sum(jnp.exp(shifted), axis=-1, keepdims=True))
    logp = shifted - logz
    nll_ref[...] = -jnp.sum(onehot_ref[...] * logp, axis=-1, keepdims=True)


# ------------------------------ parameters -----------------------------------
def init_params(key):
    def nrm(k, shape, scale=0.02):
        return (scale * jax.random.normal(k, shape)).astype(jnp.float32)

    keys = iter(jax.random.split(key, 16))
    L, H, I, NH, HD = NUM_LAYERS, HIDDEN, INTERMEDIATE, NUM_HEADS, HEAD_DIM
    return {
        "word_emb": nrm(next(keys), (VOCAB, H)),
        "pos_emb": nrm(next(keys), (SEQ, H)),
        "type_emb": nrm(next(keys), (2, H)),
        "emb_ln_g": jnp.ones((1, H), jnp.float32),
        "emb_ln_b": jnp.zeros((1, H), jnp.float32),
        # per-layer, per-head weight slabs: the head split is carried by the
        # static weights so the kernel never lane-slices activations.
        "wq": nrm(next(keys), (L, NH, H, HD)),
        "bq": jnp.zeros((L, NH, 1, HD), jnp.float32),
        "wk": nrm(next(keys), (L, NH, H, HD)),
        "bk": jnp.zeros((L, NH, 1, HD), jnp.float32),
        "wv": nrm(next(keys), (L, NH, H, HD)),
        "bv": jnp.zeros((L, NH, 1, HD), jnp.float32),
        "wo": nrm(next(keys), (L, NH, HD, H)),   # head-concat folded into proj
        "bo": jnp.zeros((L, 1, H), jnp.float32),
        "ln1_g": jnp.ones((L, 1, H), jnp.float32),
        "ln1_b": jnp.zeros((L, 1, H), jnp.float32),
        "wi": nrm(next(keys), (L, H, I)),
        "bi": jnp.zeros((L, 1, I), jnp.float32),
        "wo2": nrm(next(keys), (L, I, H)),
        "bo2": jnp.zeros((L, 1, H), jnp.float32),
        "ln2_g": jnp.ones((L, 1, H), jnp.float32),
        "ln2_b": jnp.zeros((L, 1, H), jnp.float32),
        "wp": nrm(next(keys), (H, H)),
        "bp": jnp.zeros((1, H), jnp.float32),
        "wc": nrm(next(keys), (H, N_CLASSES)),
        "bc": jnp.zeros((1, N_CLASSES), jnp.float32),
    }


# ------------------------------ wrapper ---------------------------------------
@functools.partial(jax.jit, static_argnames=("num_shards",))
def transformer_classifier_forward(params, input_ids, attention_mask, labels,
                                   *, num_shards=2):
    B, S = input_ids.shape
    assert B % num_shards == 0, "batch must divide evenly across shards"
    Bs = B // num_shards
    Ms = Bs * S
    M = B * S
    H = HIDDEN

    # embeddings: gather + add is glue; everything downstream is one Pallas call.
    # token_type_ids default to all-zeros in HF BERT, so type_emb[0] is exact.
    emb = (params["word_emb"][input_ids]
           + params["pos_emb"][None, :S, :]
           + params["type_emb"][0][None, None, :]).astype(jnp.float32)
    x2 = emb.reshape(M, H)                                   # batch folded into M
    addend = ((1.0 - attention_mask.astype(jnp.float32)) * (-1e9)).reshape(B, 1, S)
    onehot = jax.nn.one_hot(labels, CPAD, dtype=jnp.float32)  # padded, zeros past C
    # local CLS-row selection matrix for one shard (same block for every shard)
    sel = jax.nn.one_hot(jnp.arange(Bs) * S, Ms, dtype=jnp.float32)  # [Bs, Ms]

    # classifier padded to 128 lanes: zero weights / -1e9 bias in pad columns
    wc_pad = jnp.zeros((H, CPAD), jnp.float32).at[:, :N_CLASSES].set(params["wc"])
    bc_pad = jnp.full((1, CPAD), -1e9, jnp.float32).at[:, :N_CLASSES].set(params["bc"])

    def rep(a):  # full-array block, identical for every grid step
        nd = a.ndim
        return pl.BlockSpec(a.shape, lambda i, _nd=nd: (0,) * _nd)

    weights = (params["emb_ln_g"], params["emb_ln_b"],
               params["wq"], params["bq"], params["wk"], params["bk"],
               params["wv"], params["bv"], params["wo"], params["bo"],
               params["ln1_g"], params["ln1_b"],
               params["wi"], params["bi"], params["wo2"], params["bo2"],
               params["ln2_g"], params["ln2_b"],
               params["wp"], params["bp"], wc_pad, bc_pad)

    in_specs = ([pl.BlockSpec((Ms, H), lambda i: (i, 0)),        # x2 (rows)
                 pl.BlockSpec((Bs, 1, S), lambda i: (i, 0, 0)),  # mask addend
                 pl.BlockSpec((Bs, CPAD), lambda i: (i, 0)),     # one-hot labels
                 rep(sel)]                                       # CLS selector
                + [rep(w) for w in weights])

    grid_spec = pltpu.PrefetchScalarGridSpec(
        num_scalar_prefetch=0,
        grid=(num_shards,),                  # batch shards; parallel across TCs
        in_specs=in_specs,
        out_specs=(pl.BlockSpec((Bs, CPAD), lambda i: (i, 0)),
                   pl.BlockSpec((Bs, 1), lambda i: (i, 0))),
    )

    logits_pad, nll = pl.pallas_call(
        fused_forward_kernel,
        out_shape=(jax.ShapeDtypeStruct((B, CPAD), jnp.float32),
                   jax.ShapeDtypeStruct((B, 1), jnp.float32)),
        grid_spec=grid_spec,
        compiler_params=pltpu.CompilerParams(
            dimension_semantics=("parallel",)),
    )(x2, addend, onehot, sel, *weights)

    logits = logits_pad[:, :N_CLASSES]
    loss = jnp.mean(nll)                     # CrossEntropyLoss mean reduction
    return logits, loss


if __name__ == "__main__":
    key = jax.random.PRNGKey(0)
    k_param, k_ids, k_lbl = jax.random.split(key, 3)

    # B=16 so M = B*S = 128 rows: fills MXU sublanes and amortizes launch cost
    # (per perf review); 2 shards map one half-batch per TensorCore on v7x.
    B = 16
    params = init_params(k_param)
    input_ids = jax.random.randint(k_ids, (B, SEQ), 0, VOCAB, dtype=jnp.int32)
    attention_mask = jnp.concatenate(
        [jnp.ones((B, SEQ - 2), jnp.int32), jnp.zeros((B, 2), jnp.int32)], axis=1)
    labels = jax.random.randint(k_lbl, (B,), 0, N_CLASSES, dtype=jnp.int32)

    logits, loss = transformer_classifier_forward(
        params, input_ids, attention_mask, labels, num_shards=2)
    jax.block_until_ready((logits, loss))

    assert logits.shape == (B, N_CLASSES)
    assert bool(jnp.isfinite(loss))
    print("KERNEL_OK")
</pallas_src>

<mosaic_0001>
module attributes {stable_mosaic.version = 11 : i64} {
  func.func @fused_forward_kernel(%arg0: i32, %arg1: memref<64x32xf32, #tpu.memory_space<vmem>>, %arg2: memref<8x1x8xf32, #tpu.memory_space<vmem>>, %arg3: memref<8x128xf32, #tpu.memory_space<vmem>>, %arg4: memref<8x64xf32, #tpu.memory_space<vmem>>, %arg5: memref<1x32xf32, #tpu.memory_space<vmem>>, %arg6: memref<1x32xf32, #tpu.memory_space<vmem>>, %arg7: memref<2x2x32x16xf32, #tpu.memory_space<vmem>>, %arg8: memref<2x2x1x16xf32, #tpu.memory_space<vmem>>, %arg9: memref<2x2x32x16xf32, #tpu.memory_space<vmem>>, %arg10: memref<2x2x1x16xf32, #tpu.memory_space<vmem>>, %arg11: memref<2x2x32x16xf32, #tpu.memory_space<vmem>>, %arg12: memref<2x2x1x16xf32, #tpu.memory_space<vmem>>, %arg13: memref<2x2x16x32xf32, #tpu.memory_space<vmem>>, %arg14: memref<2x1x32xf32, #tpu.memory_space<vmem>>, %arg15: memref<2x1x32xf32, #tpu.memory_space<vmem>>, %arg16: memref<2x1x32xf32, #tpu.memory_space<vmem>>, %arg17: memref<2x32x64xf32, #tpu.memory_space<vmem>>, %arg18: memref<2x1x64xf32, #tpu.memory_space<vmem>>, %arg19: memref<2x64x32xf32, #tpu.memory_space<vmem>>, %arg20: memref<2x1x32xf32, #tpu.memory_space<vmem>>, %arg21: memref<2x1x32xf32, #tpu.memory_space<vmem>>, %arg22: memref<2x1x32xf32, #tpu.memory_space<vmem>>, %arg23: memref<32x32xf32, #tpu.memory_space<vmem>>, %arg24: memref<1x32xf32, #tpu.memory_space<vmem>>, %arg25: memref<32x128xf32, #tpu.memory_space<vmem>>, %arg26: memref<1x128xf32, #tpu.memory_space<vmem>>, %arg27: memref<8x128xf32, #tpu.memory_space<vmem>>, %arg28: memref<8x1xf32, #tpu.memory_space<vmem>>) attributes {dimension_semantics = [#tpu.dimension_semantics<parallel>], iteration_bounds = array<i64: 2>, scalar_prefetch = 0 : i64, scratch_operands = 0 : i64, tpu.core_type = #tpu.core_type<tc>, window_params = [{transform_indices = @transform_0, window_bounds = array<i64: 64, 32>}, {transform_indices = @transform_1, window_bounds = array<i64: 8, 1, 8>}, {transform_indices = @transform_2, window_bounds = array<i64: 8, 128>}, {pipeline_mode = #tpu.pipeline_mode<synchronous>, transform_indices = @transform_3, window_bounds = array<i64: 8, 64>}, {pipeline_mode = #tpu.pipeline_mode<synchronous>, transform_indices = @transform_4, window_bounds = array<i64: 1, 32>}, {pipeline_mode = #tpu.pipeline_mode<synchronous>, transform_indices = @transform_5, window_bounds = array<i64: 1, 32>}, {pipeline_mode = #tpu.pipeline_mode<synchronous>, transform_indices = @transform_6, window_bounds = array<i64: 2, 2, 32, 16>}, {pipeline_mode = #tpu.pipeline_mode<synchronous>, transform_indices = @transform_7, window_bounds = array<i64: 2, 2, 1, 16>}, {pipeline_mode = #tpu.pipeline_mode<synchronous>, transform_indices = @transform_8, window_bounds = array<i64: 2, 2, 32, 16>}, {pipeline_mode = #tpu.pipeline_mode<synchronous>, transform_indices = @transform_9, window_bounds = array<i64: 2, 2, 1, 16>}, {pipeline_mode = #tpu.pipeline_mode<synchronous>, transform_indices = @transform_10, window_bounds = array<i64: 2, 2, 32, 16>}, {pipeline_mode = #tpu.pipeline_mode<synchronous>, transform_indices = @transform_11, window_bounds = array<i64: 2, 2, 1, 16>}, {pipeline_mode = #tpu.pipeline_mode<synchronous>, transform_indices = @transform_12, window_bounds = array<i64: 2, 2, 16, 32>}, {pipeline_mode = #tpu.pipeline_mode<synchronous>, transform_indices = @transform_13, window_bounds = array<i64: 2, 1, 32>}, {pipeline_mode = #tpu.pipeline_mode<synchronous>, transform_indices = @transform_14, window_bounds = array<i64: 2, 1, 32>}, {pipeline_mode = #tpu.pipeline_mode<synchronous>, transform_indices = @transform_15, window_bounds = array<i64: 2, 1, 32>}, {pipeline_mode = #tpu.pipeline_mode<synchronous>, transform_indices = @transform_16, window_bounds = array<i64: 2, 32, 64>}, {pipeline_mode = #tpu.pipeline_mode<synchronous>, transform_indices = @transform_17, window_bounds = array<i64: 2, 1, 64>}, {pipeline_mode = #tpu.pipeline_mode<synchronous>, transform_indices = @transform_18, window_bounds = array<i64: 2, 64, 32>}, {pipeline_mode = #tpu.pipeline_mode<synchronous>, transform_indices = @transform_19, window_bounds = array<i64: 2, 1, 32>}, {pipeline_mode = #tpu.pipeline_mode<synchronous>, transform_indices = @transform_20, window_bounds = array<i64: 2, 1, 32>}, {pipeline_mode = #tpu.pipeline_mode<synchronous>, transform_indices = @transform_21, window_bounds = array<i64: 2, 1, 32>}, {pipeline_mode = #tpu.pipeline_mode<synchronous>, transform_indices = @transform_22, window_bounds = array<i64: 32, 32>}, {pipeline_mode = #tpu.pipeline_mode<synchronous>, transform_indices = @transform_23, window_bounds = array<i64: 1, 32>}, {pipeline_mode = #tpu.pipeline_mode<synchronous>, transform_indices = @transform_24, window_bounds = array<i64: 32, 128>}, {pipeline_mode = #tpu.pipeline_mode<synchronous>, transform_indices = @transform_25, window_bounds = array<i64: 1, 128>}, {transform_indices = @transform_26, window_bounds = array<i64: 8, 128>}, {transform_indices = @transform_27, window_bounds = array<i64: 8, 1>}]} {
    %c0 = arith.constant 0 : index
    %c0_0 = arith.constant 0 : index
    %0 = vector.load %arg1[%c0, %c0_0] : memref<64x32xf32, #tpu.memory_space<vmem>>, vector<64x32xf32>
    %c0_1 = arith.constant 0 : index
    %c0_2 = arith.constant 0 : index
    %1 = vector.load %arg5[%c0_1, %c0_2] : memref<1x32xf32, #tpu.memory_space<vmem>>, vector<1x32xf32>
    %c0_3 = arith.constant 0 : index
    %c0_4 = arith.constant 0 : index
    %2 = vector.load %arg6[%c0_3, %c0_4] : memref<1x32xf32, #tpu.memory_space<vmem>>, vector<1x32xf32>
    %cst = arith.constant dense<0.000000e+00> : vector<64xf32>
    %3 = vector.multi_reduction <add>, %0, %cst [1] : vector<64x32xf32> to vector<64xf32>
    %4 = vector.shape_cast %3 : vector<64xf32> to vector<64x1xf32>
    %cst_5 = arith.constant 3.200000e+01 : f32
    %5 = vector.broadcast %cst_5 : f32 to vector<64x1xf32>
    %6 = arith.divf %4, %5 : vector<64x1xf32>
    %7 = vector.broadcast %6 : vector<64x1xf32> to vector<64x32xf32>
    %8 = arith.subf %0, %7 : vector<64x32xf32>
    %9 = arith.mulf %8, %8 : vector<64x32xf32>
    %cst_6 = arith.constant dense<0.000000e+00> : vector<64xf32>
    %10 = vector.multi_reduction <add>, %9, %cst_6 [1] : vector<64x32xf32> to vector<64xf32>
    %11 = vector.shape_cast %10 : vector<64xf32> to vector<64x1xf32>
    %cst_7 = arith.constant 3.200000e+01 : f32
    %12 = vector.broadcast %cst_7 : f32 to vector<64x1xf32>
    %13 = arith.divf %11, %12 : vector<64x1xf32>
    %14 = vector.broadcast %6 : vector<64x1xf32> to vector<64x32xf32>
    %15 = arith.subf %0, %14 : vector<64x32xf32>
    %cst_8 = arith.constant 9.99999996E-13 : f32
    %16 = vector.broadcast %cst_8 : f32 to vector<64x1xf32>
    %17 = arith.addf %13, %16 : vector<64x1xf32>
    %18 = math.rsqrt %17 : vector<64x1xf32>
    %19 = vector.broadcast %18 : vector<64x1xf32> to vector<64x32xf32>
    %20 = arith.mulf %15, %19 : vector<64x32xf32>
    %21 = vector.broadcast %1 : vector<1x32xf32> to vector<64x32xf32>
    %22 = arith.mulf %20, %21 : vector<64x32xf32>
    %23 = vector.broadcast %2 : vector<1x32xf32> to vector<64x32xf32>
    %24 = arith.addf %22, %23 : vector<64x32xf32>
    %c0_9 = arith.constant 0 : index
    %c0_10 = arith.constant 0 : index
    %c0_11 = arith.constant 0 : index
    %25 = vector.load %arg2[%c0_9, %c0_10, %c0_11] : memref<8x1x8xf32, #tpu.memory_space<vmem>>, vector<8x1x8xf32>
    %26 = vector.shape_cast %25 : vector<8x1x8xf32> to vector<1x8x1x8xf32>
    %27 = vector.shape_cast %26 : vector<1x8x1x8xf32> to vector<1x8x1x8xf32>
    %28 = vector.broadcast %27 : vector<1x8x1x8xf32> to vector<2x8x8x8xf32>
    %29 = vector.shape_cast %28 : vector<2x8x8x8xf32> to vector<16x8x8xf32>
    %c0_12 = arith.constant 0 : index
    %c0_13 = arith.constant 0 : index
    %c0_14 = arith.constant 0 : index
    %c0_15 = arith.constant 0 : index
    %30 = vector.load %arg7[%c0_12, %c0_13, %c0_14, %c0_15] : memref<2x2x32x16xf32, #tpu.memory_space<vmem>>, vector<1x1x32x16xf32>
    %31 = vector.shape_cast %30 : vector<1x1x32x16xf32> to vector<32x16xf32>
    %cst_16 = arith.constant dense<0.000000e+00> : vector<64x16xf32>
    %32 = tpu.matmul %24, %31, %cst_16 {dimension_numbers = #tpu.dot_dimension_numbers<[1], [0], [0], [1], [0, 0, 1, 1], [], []>} : vector<64x32xf32>, vector<32x16xf32>, vector<64x16xf32> -> vector<64x16xf32>
    %c0_17 = arith.constant 0 : index
    %c0_18 = arith.constant 0 : index
    %c0_19 = arith.constant 0 : index
    %c0_20 = arith.constant 0 : index
    %33 = vector.load %arg8[%c0_17, %c0_18, %c0_19, %c0_20] : memref<2x2x1x16xf32, #tpu.memory_space<vmem>>, vector<1x1x1x16xf32>
    %34 = vector.shape_cast %33 : vector<1x1x1x16xf32> to vector<1x16xf32>
    %35 = vector.broadcast %34 : vector<1x16xf32> to vector<64x16xf32>
    %36 = arith.addf %32, %35 : vector<64x16xf32>
    %c0_21 = arith.constant 0 : index
    %c0_22 = arith.constant 0 : index
    %c0_23 = arith.constant 0 : index
    %c0_24 = arith.constant 0 : index
    %37 = vector.load %arg9[%c0_21, %c0_22, %c0_23, %c0_24] : memref<2x2x32x16xf32, #tpu.memory_space<vmem>>, vector<1x1x32x16xf32>
    %38 = vector.shape_cast %37 : vector<1x1x32x16xf32> to vector<32x16xf32>
    %cst_25 = arith.constant dense<0.000000e+00> : vector<64x16xf32>
    %39 = tpu.matmul %24, %38, %cst_25 {dimension_numbers = #tpu.dot_dimension_numbers<[1], [0], [0], [1], [0, 0, 1, 1], [], []>} : vector<64x32xf32>, vector<32x16xf32>, vector<64x16xf32> -> vector<64x16xf32>
    %c0_26 = arith.constant 0 : index
    %c0_27 = arith.constant 0 : index
    %c0_28 = arith.constant 0 : index
    %c0_29 = arith.constant 0 : index
    %40 = vector.load %arg10[%c0_26, %c0_27, %c0_28, %c0_29] : memref<2x2x1x16xf32, #tpu.memory_space<vmem>>, vector<1x1x1x16xf32>
    %41 = vector.shape_cast %40 : vector<1x1x1x16xf32> to vector<1x16xf32>
    %42 = vector.broadcast %41 : vector<1x16xf32> to vector<64x16xf32>
    %43 = arith.addf %39, %42 : vector<64x16xf32>
    %c0_30 = arith.constant 0 : index
    %c0_31 = arith.constant 0 : index
    %c0_32 = arith.constant 0 : index
    %c0_33 = arith.constant 0 : index
    %44 = vector.load %arg11[%c0_30, %c0_31, %c0_32, %c0_33] : memref<2x2x32x16xf32, #tpu.memory_space<vmem>>, vector<1x1x32x16xf32>
    %45 = vector.shape_cast %44 : vector<1x1x32x16xf32> to vector<32x16xf32>
    %cst_34 = arith.constant dense<0.000000e+00> : vector<64x16xf32>
    %46 = tpu.matmul %24, %45, %cst_34 {dimension_numbers = #tpu.dot_dimension_numbers<[1], [0], [0], [1], [0, 0, 1, 1], [], []>} : vector<64x32xf32>, vector<32x16xf32>, vector<64x16xf32> -> vector<64x16xf32>
    %c0_35 = arith.constant 0 : index
    %c0_36 = arith.constant 0 : index
    %c0_37 = arith.constant 0 : index
    %c0_38 = arith.constant 0 : index
    %47 = vector.load %arg12[%c0_35, %c0_36, %c0_37, %c0_38] : memref<2x2x1x16xf32, #tpu.memory_space<vmem>>, vector<1x1x1x16xf32>
    %48 = vector.shape_cast %47 : vector<1x1x1x16xf32> to vector<1x16xf32>
    %49 = vector.broadcast %48 : vector<1x16xf32> to vector<64x16xf32>
    %50 = arith.addf %46, %49 : vector<64x16xf32>
    %c0_39 = arith.constant 0 : index
    %c1 = arith.constant 1 : index
    %c0_40 = arith.constant 0 : index
    %c0_41 = arith.constant 0 : index
    %51 = vector.load %arg7[%c0_39, %c1, %c0_40, %c0_41] : memref<2x2x32x16xf32, #tpu.memory_space<vmem>>, vector<1x1x32x16xf32>
    %52 = vector.shape_cast %51 : vector<1x1x32x16xf32> to vector<32x16xf32>
    %cst_42 = arith.constant dense<0.000000e+00> : vector<64x16xf32>
    %53 = tpu.matmul %24, %52, %cst_42 {dimension_numbers = #tpu.dot_dimension_numbers<[1], [0], [0], [1], [0, 0, 1, 1], [], []>} : vector<64x32xf32>, vector<32x16xf32>, vector<64x16xf32> -> vector<64x16xf32>
    %c0_43 = arith.constant 0 : index
    %c1_44 = arith.constant 1 : index
    %c0_45 = arith.constant 0 : index
    %c0_46 = arith.constant 0 : index
    %54 = vector.load %arg8[%c0_43, %c1_44, %c0_45, %c0_46] : memref<2x2x1x16xf32, #tpu.memory_space<vmem>>, vector<1x1x1x16xf32>
    %55 = vector.shape_cast %54 : vector<1x1x1x16xf32> to vector<1x16xf32>
    %56 = vector.broadcast %55 : vector<1x16xf32> to vector<64x16xf32>
    %57 = arith.addf %53, %56 : vector<64x16xf32>
    %c0_47 = arith.constant 0 : index
    %c1_48 = arith.constant 1 : index
    %c0_49 = arith.constant 0 : index
    %c0_50 = arith.constant 0 : index
    %58 = vector.load %arg9[%c0_47, %c1_48, %c0_49, %c0_50] : memref<2x2x32x16xf32, #tpu.memory_space<vmem>>, vector<1x1x32x16xf32>
    %59 = vector.shape_cast %58 : vector<1x1x32x16xf32> to vector<32x16xf32>
    %cst_51 = arith.constant dense<0.000000e+00> : vector<64x16xf32>
    %60 = tpu.matmul %24, %59, %cst_51 {dimension_numbers = #tpu.dot_dimension_numbers<[1], [0], [0], [1], [0, 0, 1, 1], [], []>} : vector<64x32xf32>, vector<32x16xf32>, vector<64x16xf32> -> vector<64x16xf32>
    %c0_52 = arith.constant 0 : index
    %c1_53 = arith.constant 1 : index
    %c0_54 = arith.constant 0 : index
    %c0_55 = arith.constant 0 : index
    %61 = vector.load %arg10[%c0_52, %c1_53, %c0_54, %c0_55] : memref<2x2x1x16xf32, #tpu.memory_space<vmem>>, vector<1x1x1x16xf32>
    %62 = vector.shape_cast %61 : vector<1x1x1x16xf32> to vector<1x16xf32>
    %63 = vector.broadcast %62 : vector<1x16xf32> to vector<64x16xf32>
    %64 = arith.addf %60, %63 : vector<64x16xf32>
    %c0_56 = arith.constant 0 : index
    %c1_57 = arith.constant 1 : index
    %c0_58 = arith.constant 0 : index
    %c0_59 = arith.constant 0 : index
    %65 = vector.load %arg11[%c0_56, %c1_57, %c0_58, %c0_59] : memref<2x2x32x16xf32, #tpu.memory_space<vmem>>, vector<1x1x32x16xf32>
    %66 = vector.shape_cast %65 : vector<1x1x32x16xf32> to vector<32x16xf32>
    %cst_60 = arith.constant dense<0.000000e+00> : vector<64x16xf32>
    %67 = tpu.matmul %24, %66, %cst_60 {dimension_numbers = #tpu.dot_dimension_numbers<[1], [0], [0], [1], [0, 0, 1, 1], [], []>} : vector<64x32xf32>, vector<32x16xf32>, vector<64x16xf32> -> vector<64x16xf32>
    %c0_61 = arith.constant 0 : index
    %c1_62 = arith.constant 1 : index
    %c0_63 = arith.constant 0 : index
    %c0_64 = arith.constant 0 : index
    %68 = vector.load %arg12[%c0_61, %c1_62, %c0_63, %c0_64] : memref<2x2x1x16xf32, #tpu.memory_space<vmem>>, vector<1x1x1x16xf32>
    %69 = vector.shape_cast %68 : vector<1x1x1x16xf32> to vector<1x16xf32>
    %70 = vector.broadcast %69 : vector<1x16xf32> to vector<64x16xf32>
    %71 = arith.addf %67, %70 : vector<64x16xf32>
    %72 = tpu.concatenate %36, %57 in 0 : vector<64x16xf32>, vector<64x16xf32> -> vector<128x16xf32>
    %73 = vector.shape_cast %72 : vector<128x16xf32> to vector<16x8x16xf32>
    %74 = tpu.concatenate %43, %64 in 0 : vector<64x16xf32>, vector<64x16xf32> -> vector<128x16xf32>
    %75 = vector.shape_cast %74 : vector<128x16xf32> to vector<16x8x16xf32>
    %76 = tpu.concatenate %50, %71 in 0 : vector<64x16xf32>, vector<64x16xf32> -> vector<128x16xf32>
    %77 = vector.shape_cast %76 : vector<128x16xf32> to vector<16x8x16xf32>
    "tpu.trace_start"() <{level = 10 : i32, message = "gqd,gkd->gqk"}> : () -> ()
    %cst_65 = arith.constant dense<0.000000e+00> : vector<16x8x8xf32>
    %78 = tpu.matmul %73, %75, %cst_65 {dimension_numbers = #tpu.dot_dimension_numbers<[2], [2], [1], [1], [0, 0, 0, 1, 1, 1], [0], [0]>} : vector<16x8x16xf32>, vector<16x8x16xf32>, vector<16x8x8xf32> -> vector<16x8x8xf32>
    "tpu.trace_stop"() : () -> ()
    %cst_66 = arith.constant 2.500000e-01 : f32
    %79 = vector.broadcast %cst_66 : f32 to vector<16x8x8xf32>
    %80 = arith.mulf %78, %79 : vector<16x8x8xf32>
    %81 = arith.addf %80, %29 : vector<16x8x8xf32>
    %cst_67 = arith.constant dense<0xFF800000> : vector<16x8xf32>
    %82 = vector.multi_reduction <maximumf>, %81, %cst_67 [2] : vector<16x8x8xf32> to vector<16x8xf32>
    %83 = vector.shape_cast %82 : vector<16x8xf32> to vector<16x8x1xf32>
    %84 = vector.broadcast %83 : vector<16x8x1xf32> to vector<16x8x8xf32>
    %85 = arith.subf %81, %84 : vector<16x8x8xf32>
    %86 = math.exp %85 : vector<16x8x8xf32>
    %cst_68 = arith.constant dense<0.000000e+00> : vector<16x8xf32>
    %87 = vector.multi_reduction <add>, %86, %cst_68 [2] : vector<16x8x8xf32> to vector<16x8xf32>
    %88 = vector.shape_cast %87 : vector<16x8xf32> to vector<16x8x1xf32>
    %89 = vector.broadcast %88 : vector<16x8x1xf32> to vector<16x8x8xf32>
    %90 = arith.divf %86, %89 : vector<16x8x8xf32>
    "tpu.trace_start"() <{level = 10 : i32, message = "gqk,gkd->gqd"}> : () -> ()
    %cst_69 = arith.constant dense<0.000000e+00> : vector<16x8x16xf32>
    %91 = tpu.matmul %90, %77, %cst_69 {dimension_numbers = #tpu.dot_dimension_numbers<[2], [1], [1], [2], [0, 0, 0, 1, 1, 2], [0], [0]>} : vector<16x8x8xf32>, vector<16x8x16xf32>, vector<16x8x16xf32> -> vector<16x8x16xf32>
    "tpu.trace_stop"() : () -> ()
    %92 = vector.shape_cast %91 : vector<16x8x16xf32> to vector<2x64x16xf32>
    %c0_70 = arith.constant 0 : index
    %c0_71 = arith.constant 0 : index
    %c0_72 = arith.constant 0 : index
    %93 = vector.load %arg14[%c0_70, %c0_71, %c0_72] : memref<2x1x32xf32, #tpu.memory_space<vmem>>, vector<1x1x32xf32>
    %94 = vector.shape_cast %93 : vector<1x1x32xf32> to vector<1x32xf32>
    %95 = vector.extract_strided_slice %92 {offsets = [0, 0, 0], sizes = [1, 64, 16], strides = [1, 1, 1]} : vector<2x64x16xf32> to vector<1x64x16xf32>
    %96 = vector.shape_cast %95 : vector<1x64x16xf32> to vector<64x16xf32>
    %c0_73 = arith.constant 0 : index
    %c0_74 = arith.constant 0 : index
    %c0_75 = arith.constant 0 : index
    %c0_76 = arith.constant 0 : index
    %97 = vector.load %arg13[%c0_73, %c0_74, %c0_75, %c0_76] : memref<2x2x16x32xf32, #tpu.memory_space<vmem>>, vector<1x1x16x32xf32>
    %98 = vector.shape_cast %97 : vector<1x1x16x32xf32> to vector<16x32xf32>
    %cst_77 = arith.constant dense<0.000000e+00> : vector<64x32xf32>
    %99 = tpu.matmul %96, %98, %cst_77 {dimension_numbers = #tpu.dot_dimension_numbers<[1], [0], [0], [1], [0, 0, 1, 1], [], []>} : vector<64x16xf32>, vector<16x32xf32>, vector<64x32xf32> -> vector<64x32xf32>
    %100 = vector.broadcast %94 : vector<1x32xf32> to vector<64x32xf32>
    %101 = arith.addf %100, %99 : vector<64x32xf32>
    %102 = vector.extract_strided_slice %92 {offsets = [1, 0, 0], sizes = [1, 64, 16], strides = [1, 1, 1]} : vector<2x64x16xf32> to vector<1x64x16xf32>
    %103 = vector.shape_cast %102 : vector<1x64x16xf32> to vector<64x16xf32>
    %c0_78 = arith.constant 0 : index
    %c1_79 = arith.constant 1 : index
    %c0_80 = arith.constant 0 : index
    %c0_81 = arith.constant 0 : index
    %104 = vector.load %arg13[%c0_78, %c1_79, %c0_80, %c0_81] : memref<2x2x16x32xf32, #tpu.memory_space<vmem>>, vector<1x1x16x32xf32>
    %105 = vector.shape_cast %104 : vector<1x1x16x32xf32> to vector<16x32xf32>
    %cst_82 = arith.constant dense<0.000000e+00> : vector<64x32xf32>
    %106 = tpu.matmul %103, %105, %cst_82 {dimension_numbers = #tpu.dot_dimension_numbers<[1], [0], [0], [1], [0, 0, 1, 1], [], []>} : vector<64x16xf32>, vector<16x32xf32>, vector<64x32xf32> -> vector<64x32xf32>
    %107 = arith.addf %101, %106 : vector<64x32xf32>
    %108 = arith.addf %24, %107 : vector<64x32xf32>
    %c0_83 = arith.constant 0 : index
    %c0_84 = arith.constant 0 : index
    %c0_85 = arith.constant 0 : index
    %109 = vector.load %arg15[%c0_83, %c0_84, %c0_85] : memref<2x1x32xf32, #tpu.memory_space<vmem>>, vector<1x1x32xf32>
    %110 = vector.shape_cast %109 : vector<1x1x32xf32> to vector<1x32xf32>
    %c0_86 = arith.constant 0 : index
    %c0_87 = arith.constant 0 : index
    %c0_88 = arith.constant 0 : index
    %111 = vector.load %arg16[%c0_86, %c0_87, %c0_88] : memref<2x1x32xf32, #tpu.memory_space<vmem>>, vector<1x1x32xf32>
    %112 = vector.shape_cast %111 : vector<1x1x32xf32> to vector<1x32xf32>
    %cst_89 = arith.constant dense<0.000000e+00> : vector<64xf32>
    %113 = vector.multi_reduction <add>, %108, %cst_89 [1] : vector<64x32xf32> to vector<64xf32>
    %114 = vector.shape_cast %113 : vector<64xf32> to vector<64x1xf32>
    %cst_90 = arith.constant 3.200000e+01 : f32
    %115 = vector.broadcast %cst_90 : f32 to vector<64x1xf32>
    %116 = arith.divf %114, %115 : vector<64x1xf32>
    %117 = vector.broadcast %116 : vector<64x1xf32> to vector<64x32xf32>
    %118 = arith.subf %108, %117 : vector<64x32xf32>
    %119 = arith.mulf %118, %118 : vector<64x32xf32>
    %cst_91 = arith.constant dense<0.000000e+00> : vector<64xf32>
    %120 = vector.multi_reduction <add>, %119, %cst_91 [1] : vector<64x32xf32> to vector<64xf32>
    %121 = vector.shape_cast %120 : vector<64xf32> to vector<64x1xf32>
    %cst_92 = arith.constant 3.200000e+01 : f32
    %122 = vector.broadcast %cst_92 : f32 to vector<64x1xf32>
    %123 = arith.divf %121, %122 : vector<64x1xf32>
    %124 = vector.broadcast %116 : vector<64x1xf32> to vector<64x32xf32>
    %125 = arith.subf %108, %124 : vector<64x32xf32>
    %cst_93 = arith.constant 9.99999996E-13 : f32
    %126 = vector.broadcast %cst_93 : f32 to vector<64x1xf32>
    %127 = arith.addf %123, %126 : vector<64x1xf32>
    %128 = math.rsqrt %127 : vector<64x1xf32>
    %129 = vector.broadcast %128 : vector<64x1xf32> to vector<64x32xf32>
    %130 = arith.mulf %125, %129 : vector<64x32xf32>
    %131 = vector.broadcast %110 : vector<1x32xf32> to vector<64x32xf32>
    %132 = arith.mulf %130, %131 : vector<64x32xf32>
    %133 = vector.broadcast %112 : vector<1x32xf32> to vector<64x32xf32>
    %134 = arith.addf %132, %133 : vector<64x32xf32>
    %c0_94 = arith.constant 0 : index
    %c0_95 = arith.constant 0 : index
    %c0_96 = arith.constant 0 : index
    %135 = vector.load %arg17[%c0_94, %c0_95, %c0_96] : memref<2x32x64xf32, #tpu.memory_space<vmem>>, vector<1x32x64xf32>
    %136 = vector.shape_cast %135 : vector<1x32x64xf32> to vector<32x64xf32>
    %cst_97 = arith.constant dense<0.000000e+00> : vector<64x64xf32>
    %137 = tpu.matmul %134, %136, %cst_97 {dimension_numbers = #tpu.dot_dimension_numbers<[1], [0], [0], [1], [0, 0, 1, 1], [], []>} : vector<64x32xf32>, vector<32x64xf32>, vector<64x64xf32> -> vector<64x64xf32>
    %c0_98 = arith.constant 0 : index
    %c0_99 = arith.constant 0 : index
    %c0_100 = arith.constant 0 : index
    %138 = vector.load %arg18[%c0_98, %c0_99, %c0_100] : memref<2x1x64xf32, #tpu.memory_space<vmem>>, vector<1x1x64xf32>
    %139 = vector.shape_cast %138 : vector<1x1x64xf32> to vector<1x64xf32>
    %140 = vector.broadcast %139 : vector<1x64xf32> to vector<64x64xf32>
    %141 = arith.addf %137, %140 : vector<64x64xf32>
    %142 = arith.mulf %141, %141 : vector<64x64xf32>
    %143 = arith.mulf %141, %142 : vector<64x64xf32>
    %cst_101 = arith.constant 4.471500e-02 : f32
    %144 = vector.broadcast %cst_101 : f32 to vector<64x64xf32>
    %145 = arith.mulf %144, %143 : vector<64x64xf32>
    %146 = arith.addf %141, %145 : vector<64x64xf32>
    %cst_102 = arith.constant 0.797884583 : f32
    %147 = vector.broadcast %cst_102 : f32 to vector<64x64xf32>
    %148 = arith.mulf %147, %146 : vector<64x64xf32>
    %149 = math.tanh %148 : vector<64x64xf32>
    %cst_103 = arith.constant 1.000000e+00 : f32
    %150 = vector.broadcast %cst_103 : f32 to vector<64x64xf32>
    %151 = arith.addf %150, %149 : vector<64x64xf32>
    %cst_104 = arith.constant 5.000000e-01 : f32
    %152 = vector.broadcast %cst_104 : f32 to vector<64x64xf32>
    %153 = arith.mulf %152, %151 : vector<64x64xf32>
    %154 = arith.mulf %141, %153 : vector<64x64xf32>
    %c0_105 = arith.constant 0 : index
    %c0_106 = arith.constant 0 : index
    %c0_107 = arith.constant 0 : index
    %155 = vector.load %arg19[%c0_105, %c0_106, %c0_107] : memref<2x64x32xf32, #tpu.memory_space<vmem>>, vector<1x64x32xf32>
    %156 = vector.shape_cast %155 : vector<1x64x32xf32> to vector<64x32xf32>
    %cst_108 = arith.constant dense<0.000000e+00> : vector<64x32xf32>
    %157 = tpu.matmul %154, %156, %cst_108 {dimension_numbers = #tpu.dot_dimension_numbers<[1], [0], [0], [1], [0, 0, 1, 1], [], []>} : vector<64x64xf32>, vector<64x32xf32>, vector<64x32xf32> -> vector<64x32xf32>
    %c0_109 = arith.constant 0 : index
    %c0_110 = arith.constant 0 : index
    %c0_111 = arith.constant 0 : index
    %158 = vector.load %arg20[%c0_109, %c0_110, %c0_111] : memref<2x1x32xf32, #tpu.memory_space<vmem>>, vector<1x1x32xf32>
    %159 = vector.shape_cast %158 : vector<1x1x32xf32> to vector<1x32xf32>
    %160 = vector.broadcast %159 : vector<1x32xf32> to vector<64x32xf32>
    %161 = arith.addf %157, %160 : vector<64x32xf32>
    %162 = arith.addf %134, %161 : vector<64x32xf32>
    %c0_112 = arith.constant 0 : index
    %c0_113 = arith.constant 0 : index
    %c0_114 = arith.constant 0 : index
    %163 = vector.load %arg21[%c0_112, %c0_113, %c0_114] : memref<2x1x32xf32, #tpu.memory_space<vmem>>, vector<1x1x32xf32>
    %164 = vector.shape_cast %163 : vector<1x1x32xf32> to vector<1x32xf32>
    %c0_115 = arith.constant 0 : index
    %c0_116 = arith.constant 0 : index
    %c0_117 = arith.constant 0 : index
    %165 = vector.load %arg22[%c0_115, %c0_116, %c0_117] : memref<2x1x32xf32, #tpu.memory_space<vmem>>, vector<1x1x32xf32>
    %166 = vector.shape_cast %165 : vector<1x1x32xf32> to vector<1x32xf32>
    %cst_118 = arith.constant dense<0.000000e+00> : vector<64xf32>
    %167 = vector.multi_reduction <add>, %162, %cst_118 [1] : vector<64x32xf32> to vector<64xf32>
    %168 = vector.shape_cast %167 : vector<64xf32> to vector<64x1xf32>
    %cst_119 = arith.constant 3.200000e+01 : f32
    %169 = vector.broadcast %cst_119 : f32 to vector<64x1xf32>
    %170 = arith.divf %168, %169 : vector<64x1xf32>
    %171 = vector.broadcast %170 : vector<64x1xf32> to vector<64x32xf32>
    %172 = arith.subf %162, %171 : vector<64x32xf32>
    %173 = arith.mulf %172, %172 : vector<64x32xf32>
    %cst_120 = arith.constant dense<0.000000e+00> : vector<64xf32>
    %174 = vector.multi_reduction <add>, %173, %cst_120 [1] : vector<64x32xf32> to vector<64xf32>
    %175 = vector.shape_cast %174 : vector<64xf32> to vector<64x1xf32>
    %cst_121 = arith.constant 3.200000e+01 : f32
    %176 = vector.broadcast %cst_121 : f32 to vector<64x1xf32>
    %177 = arith.divf %175, %176 : vector<64x1xf32>
    %178 = vector.broadcast %170 : vector<64x1xf32> to vector<64x32xf32>
    %179 = arith.subf %162, %178 : vector<64x32xf32>
    %cst_122 = arith.constant 9.99999996E-13 : f32
    %180 = vector.broadcast %cst_122 : f32 to vector<64x1xf32>
    %181 = arith.addf %177, %180 : vector<64x1xf32>
    %182 = math.rsqrt %181 : vector<64x1xf32>
    %183 = vector.broadcast %182 : vector<64x1xf32> to vector<64x32xf32>
    %184 = arith.mulf %179, %183 : vector<64x32xf32>
    %185 = vector.broadcast %164 : vector<1x32xf32> to vector<64x32xf32>
    %186 = arith.mulf %184, %185 : vector<64x32xf32>
    %187 = vector.broadcast %166 : vector<1x32xf32> to vector<64x32xf32>
    %188 = arith.addf %186, %187 : vector<64x32xf32>
    %c1_123 = arith.constant 1 : index
    %c0_124 = arith.constant 0 : index
    %c0_125 = arith.constant 0 : index
    %c0_126 = arith.constant 0 : index
    %189 = vector.load %arg7[%c1_123, %c0_124, %c0_125, %c0_126] : memref<2x2x32x16xf32, #tpu.memory_space<vmem>>, vector<1x1x32x16xf32>
    %190 = vector.shape_cast %189 : vector<1x1x32x16xf32> to vector<32x16xf32>
    %cst_127 = arith.constant dense<0.000000e+00> : vector<64x16xf32>
    %191 = tpu.matmul %188, %190, %cst_127 {dimension_numbers = #tpu.dot_dimension_numbers<[1], [0], [0], [1], [0, 0, 1, 1], [], []>} : vector<64x32xf32>, vector<32x16xf32>, vector<64x16xf32> -> vector<64x16xf32>
    %c1_128 = arith.constant 1 : index
    %c0_129 = arith.constant 0 : index
    %c0_130 = arith.constant 0 : index
    %c0_131 = arith.constant 0 : index
    %192 = vector.load %arg8[%c1_128, %c0_129, %c0_130, %c0_131] : memref<2x2x1x16xf32, #tpu.memory_space<vmem>>, vector<1x1x1x16xf32>
    %193 = vector.shape_cast %192 : vector<1x1x1x16xf32> to vector<1x16xf32>
    %194 = vector.broadcast %193 : vector<1x16xf32> to vector<64x16xf32>
    %195 = arith.addf %191, %194 : vector<64x16xf32>
    %c1_132 = arith.constant 1 : index
    %c0_133 = arith.constant 0 : index
    %c0_134 = arith.constant 0 : index
    %c0_135 = arith.constant 0 : index
    %196 = vector.load %arg9[%c1_132, %c0_133, %c0_134, %c0_135] : memref<2x2x32x16xf32, #tpu.memory_space<vmem>>, vector<1x1x32x16xf32>
    %197 = vector.shape_cast %196 : vector<1x1x32x16xf32> to vector<32x16xf32>
    %cst_136 = arith.constant dense<0.000000e+00> : vector<64x16xf32>
    %198 = tpu.matmul %188, %197, %cst_136 {dimension_numbers = #tpu.dot_dimension_numbers<[1], [0], [0], [1], [0, 0, 1, 1], [], []>} : vector<64x32xf32>, vector<32x16xf32>, vector<64x16xf32> -> vector<64x16xf32>
    %c1_137 = arith.constant 1 : index
    %c0_138 = arith.constant 0 : index
    %c0_139 = arith.constant 0 : index
    %c0_140 = arith.constant 0 : index
    %199 = vector.load %arg10[%c1_137, %c0_138, %c0_139, %c0_140] : memref<2x2x1x16xf32, #tpu.memory_space<vmem>>, vector<1x1x1x16xf32>
    %200 = vector.shape_cast %199 : vector<1x1x1x16xf32> to vector<1x16xf32>
    %201 = vector.broadcast %200 : vector<1x16xf32> to vector<64x16xf32>
    %202 = arith.addf %198, %201 : vector<64x16xf32>
    %c1_141 = arith.constant 1 : index
    %c0_142 = arith.constant 0 : index
    %c0_143 = arith.constant 0 : index
    %c0_144 = arith.constant 0 : index
    %203 = vector.load %arg11[%c1_141, %c0_142, %c0_143, %c0_144] : memref<2x2x32x16xf32, #tpu.memory_space<vmem>>, vector<1x1x32x16xf32>
    %204 = vector.shape_cast %203 : vector<1x1x32x16xf32> to vector<32x16xf32>
    %cst_145 = arith.constant dense<0.000000e+00> : vector<64x16xf32>
    %205 = tpu.matmul %188, %204, %cst_145 {dimension_numbers = #tpu.dot_dimension_numbers<[1], [0], [0], [1], [0, 0, 1, 1], [], []>} : vector<64x32xf32>, vector<32x16xf32>, vector<64x16xf32> -> vector<64x16xf32>
    %c1_146 = arith.constant 1 : index
    %c0_147 = arith.constant 0 : index
    %c0_148 = arith.constant 0 : index
    %c0_149 = arith.constant 0 : index
    %206 = vector.load %arg12[%c1_146, %c0_147, %c0_148, %c0_149] : memref<2x2x1x16xf32, #tpu.memory_space<vmem>>, vector<1x1x1x16xf32>
    %207 = vector.shape_cast %206 : vector<1x1x1x16xf32> to vector<1x16xf32>
    %208 = vector.broadcast %207 : vector<1x16xf32> to vector<64x16xf32>
    %209 = arith.addf %205, %208 : vector<64x16xf32>
    %c1_150 = arith.constant 1 : index
    %c1_151 = arith.constant 1 : index
    %c0_152 = arith.constant 0 : index
    %c0_153 = arith.constant 0 : index
    %210 = vector.load %arg7[%c1_150, %c1_151, %c0_152, %c0_153] : memref<2x2x32x16xf32, #tpu.memory_space<vmem>>, vector<1x1x32x16xf32>
    %211 = vector.shape_cast %210 : vector<1x1x32x16xf32> to vector<32x16xf32>
    %cst_154 = arith.constant dense<0.000000e+00> : vector<64x16xf32>
    %212 = tpu.matmul %188, %211, %cst_154 {dimension_numbers = #tpu.dot_dimension_numbers<[1], [0], [0], [1], [0, 0, 1, 1], [], []>} : vector<64x32xf32>, vector<32x16xf32>, vector<64x16xf32> -> vector<64x16xf32>
    %c1_155 = arith.constant 1 : index
    %c1_156 = arith.constant 1 : index
    %c0_157 = arith.constant 0 : index
    %c0_158 = arith.constant 0 : index
    %213 = vector.load %arg8[%c1_155, %c1_156, %c0_157, %c0_158] : memref<2x2x1x16xf32, #tpu.memory_space<vmem>>, vector<1x1x1x16xf32>
    %214 = vector.shape_cast %213 : vector<1x1x1x16xf32> to vector<1x16xf32>
    %215 = vector.broadcast %214 : vector<1x16xf32> to vector<64x16xf32>
    %216 = arith.addf %212, %215 : vector<64x16xf32>
    %c1_159 = arith.constant 1 : index
    %c1_160 = arith.constant 1 : index
    %c0_161 = arith.constant 0 : index
    %c0_162 = arith.constant 0 : index
    %217 = vector.load %arg9[%c1_159, %c1_160, %c0_161, %c0_162] : memref<2x2x32x16xf32, #tpu.memory_space<vmem>>, vector<1x1x32x16xf32>
    %218 = vector.shape_cast %217 : vector<1x1x32x16xf32> to vector<32x16xf32>
    %cst_163 = arith.constant dense<0.000000e+00> : vector<64x16xf32>
    %219 = tpu.matmul %188, %218, %cst_163 {dimension_numbers = #tpu.dot_dimension_numbers<[1], [0], [0], [1], [0, 0, 1, 1], [], []>} : vector<64x32xf32>, vector<32x16xf32>, vector<64x16xf32> -> vector<64x16xf32>
    %c1_164 = arith.constant 1 : index
    %c1_165 = arith.constant 1 : index
    %c0_166 = arith.constant 0 : index
    %c0_167 = arith.constant 0 : index
    %220 = vector.load %arg10[%c1_164, %c1_165, %c0_166, %c0_167] : memref<2x2x1x16xf32, #tpu.memory_space<vmem>>, vector<1x1x1x16xf32>
    %221 = vector.shape_cast %220 : vector<1x1x1x16xf32> to vector<1x16xf32>
    %222 = vector.broadcast %221 : vector<1x16xf32> to vector<64x16xf32>
    %223 = arith.addf %219, %222 : vector<64x16xf32>
    %c1_168 = arith.constant 1 : index
    %c1_169 = arith.constant 1 : index
    %c0_170 = arith.constant 0 : index
    %c0_171 = arith.constant 0 : index
    %224 = vector.load %arg11[%c1_168, %c1_169, %c0_170, %c0_171] : memref<2x2x32x16xf32, #tpu.memory_space<vmem>>, vector<1x1x32x16xf32>
    %225 = vector.shape_cast %224 : vector<1x1x32x16xf32> to vector<32x16xf32>
    %cst_172 = arith.constant dense<0.000000e+00> : vector<64x16xf32>
    %226 = tpu.matmul %188, %225, %cst_172 {dimension_numbers = #tpu.dot_dimension_numbers<[1], [0], [0], [1], [0, 0, 1, 1], [], []>} : vector<64x32xf32>, vector<32x16xf32>, vector<64x16xf32> -> vector<64x16xf32>
    %c1_173 = arith.constant 1 : index
    %c1_174 = arith.constant 1 : index
    %c0_175 = arith.constant 0 : index
    %c0_176 = arith.constant 0 : index
    %227 = vector.load %arg12[%c1_173, %c1_174, %c0_175, %c0_176] : memref<2x2x1x16xf32, #tpu.memory_space<vmem>>, vector<1x1x1x16xf32>
    %228 = vector.shape_cast %227 : vector<1x1x1x16xf32> to vector<1x16xf32>
    %229 = vector.broadcast %228 : vector<1x16xf32> to vector<64x16xf32>
    %230 = arith.addf %226, %229 : vector<64x16xf32>
    %231 = tpu.concatenate %195, %216 in 0 : vector<64x16xf32>, vector<64x16xf32> -> vector<128x16xf32>
    %232 = vector.shape_cast %231 : vector<128x16xf32> to vector<16x8x16xf32>
    %233 = tpu.concatenate %202, %223 in 0 : vector<64x16xf32>, vector<64x16xf32> -> vector<128x16xf32>
    %234 = vector.shape_cast %233 : vector<128x16xf32> to vector<16x8x16xf32>
    %235 = tpu.concatenate %209, %230 in 0 : vector<64x16xf32>, vector<64x16xf32> -> vector<128x16xf32>
    %236 = vector.shape_cast %235 : vector<128x16xf32> to vector<16x8x16xf32>
    "tpu.trace_start"() <{level = 10 : i32, message = "gqd,gkd->gqk"}> : () -> ()
    %cst_177 = arith.constant dense<0.000000e+00> : vector<16x8x8xf32>
    %237 = tpu.matmul %232, %234, %cst_177 {dimension_numbers = #tpu.dot_dimension_numbers<[2], [2], [1], [1], [0, 0, 0, 1, 1, 1], [0], [0]>} : vector<16x8x16xf32>, vector<16x8x16xf32>, vector<16x8x8xf32> -> vector<16x8x8xf32>
    "tpu.trace_stop"() : () -> ()
    %cst_178 = arith.constant 2.500000e-01 : f32
    %238 = vector.broadcast %cst_178 : f32 to vector<16x8x8xf32>
    %239 = arith.mulf %237, %238 : vector<16x8x8xf32>
    %240 = arith.addf %239, %29 : vector<16x8x8xf32>
    %cst_179 = arith.constant dense<0xFF800000> : vector<16x8xf32>
    %241 = vector.multi_reduction <maximumf>, %240, %cst_179 [2] : vector<16x8x8xf32> to vector<16x8xf32>
    %242 = vector.shape_cast %241 : vector<16x8xf32> to vector<16x8x1xf32>
    %243 = vector.broadcast %242 : vector<16x8x1xf32> to vector<16x8x8xf32>
    %244 = arith.subf %240, %243 : vector<16x8x8xf32>
    %245 = math.exp %244 : vector<16x8x8xf32>
    %cst_180 = arith.constant dense<0.000000e+00> : vector<16x8xf32>
    %246 = vector.multi_reduction <add>, %245, %cst_180 [2] : vector<16x8x8xf32> to vector<16x8xf32>
    %247 = vector.shape_cast %246 : vector<16x8xf32> to vector<16x8x1xf32>
    %248 = vector.broadcast %247 : vector<16x8x1xf32> to vector<16x8x8xf32>
    %249 = arith.divf %245, %248 : vector<16x8x8xf32>
    "tpu.trace_start"() <{level = 10 : i32, message = "gqk,gkd->gqd"}> : () -> ()
    %cst_181 = arith.constant dense<0.000000e+00> : vector<16x8x16xf32>
    %250 = tpu.matmul %249, %236, %cst_181 {dimension_numbers = #tpu.dot_dimension_numbers<[2], [1], [1], [2], [0, 0, 0, 1, 1, 2], [0], [0]>} : vector<16x8x8xf32>, vector<16x8x16xf32>, vector<16x8x16xf32> -> vector<16x8x16xf32>
    "tpu.trace_stop"() : () -> ()
    %251 = vector.shape_cast %250 : vector<16x8x16xf32> to vector<2x64x16xf32>
    %c1_182 = arith.constant 1 : index
    %c0_183 = arith.constant 0 : index
    %c0_184 = arith.constant 0 : index
    %252 = vector.load %arg14[%c1_182, %c0_183, %c0_184] : memref<2x1x32xf32, #tpu.memory_space<vmem>>, vector<1x1x32xf32>
    %253 = vector.shape_cast %252 : vector<1x1x32xf32> to vector<1x32xf32>
    %254 = vector.extract_strided_slice %251 {offsets = [0, 0, 0], sizes = [1, 64, 16], strides = [1, 1, 1]} : vector<2x64x16xf32> to vector<1x64x16xf32>
    %255 = vector.shape_cast %254 : vector<1x64x16xf32> to vector<64x16xf32>
    %c1_185 = arith.constant 1 : index
    %c0_186 = arith.constant 0 : index
    %c0_187 = arith.constant 0 : index
    %c0_188 = arith.constant 0 : index
    %256 = vector.load %arg13[%c1_185, %c0_186, %c0_187, %c0_188] : memref<2x2x16x32xf32, #tpu.memory_space<vmem>>, vector<1x1x16x32xf32>
    %257 = vector.shape_cast %256 : vector<1x1x16x32xf32> to vector<16x32xf32>
    %cst_189 = arith.constant dense<0.000000e+00> : vector<64x32xf32>
    %258 = tpu.matmul %255, %257, %cst_189 {dimension_numbers = #tpu.dot_dimension_numbers<[1], [0], [0], [1], [0, 0, 1, 1], [], []>} : vector<64x16xf32>, vector<16x32xf32>, vector<64x32xf32> -> vector<64x32xf32>
    %259 = vector.broadcast %253 : vector<1x32xf32> to vector<64x32xf32>
    %260 = arith.addf %259, %258 : vector<64x32xf32>
    %261 = vector.extract_strided_slice %251 {offsets = [1, 0, 0], sizes = [1, 64, 16], strides = [1, 1, 1]} : vector<2x64x16xf32> to vector<1x64x16xf32>
    %262 = vector.shape_cast %261 : vector<1x64x16xf32> to vector<64x16xf32>
    %c1_190 = arith.constant 1 : index
    %c1_191 = arith.constant 1 : index
    %c0_192 = arith.constant 0 : index
    %c0_193 = arith.constant 0 : index
    %263 = vector.load %arg13[%c1_190, %c1_191, %c0_192, %c0_193] : memref<2x2x16x32xf32, #tpu.memory_space<vmem>>, vector<1x1x16x32xf32>
    %264 = vector.shape_cast %263 : vector<1x1x16x32xf32> to vector<16x32xf32>
    %cst_194 = arith.constant dense<0.000000e+00> : vector<64x32xf32>
    %265 = tpu.matmul %262, %264, %cst_194 {dimension_numbers = #tpu.dot_dimension_numbers<[1], [0], [0], [1], [0, 0, 1, 1], [], []>} : vector<64x16xf32>, vector<16x32xf32>, vector<64x32xf32> -> vector<64x32xf32>
    %266 = arith.addf %260, %265 : vector<64x32xf32>
    %267 = arith.addf %188, %266 : vector<64x32xf32>
    %c1_195 = arith.constant 1 : index
    %c0_196 = arith.constant 0 : index
    %c0_197 = arith.constant 0 : index
    %268 = vector.load %arg15[%c1_195, %c0_196, %c0_197] : memref<2x1x32xf32, #tpu.memory_space<vmem>>, vector<1x1x32xf32>
    %269 = vector.shape_cast %268 : vector<1x1x32xf32> to vector<1x32xf32>
    %c1_198 = arith.constant 1 : index
    %c0_199 = arith.constant 0 : index
    %c0_200 = arith.constant 0 : index
    %270 = vector.load %arg16[%c1_198, %c0_199, %c0_200] : memref<2x1x32xf32, #tpu.memory_space<vmem>>, vector<1x1x32xf32>
    %271 = vector.shape_cast %270 : vector<1x1x32xf32> to vector<1x32xf32>
    %cst_201 = arith.constant dense<0.000000e+00> : vector<64xf32>
    %272 = vector.multi_reduction <add>, %267, %cst_201 [1] : vector<64x32xf32> to vector<64xf32>
    %273 = vector.shape_cast %272 : vector<64xf32> to vector<64x1xf32>
    %cst_202 = arith.constant 3.200000e+01 : f32
    %274 = vector.broadcast %cst_202 : f32 to vector<64x1xf32>
    %275 = arith.divf %273, %274 : vector<64x1xf32>
    %276 = vector.broadcast %275 : vector<64x1xf32> to vector<64x32xf32>
    %277 = arith.subf %267, %276 : vector<64x32xf32>
    %278 = arith.mulf %277, %277 : vector<64x32xf32>
    %cst_203 = arith.constant dense<0.000000e+00> : vector<64xf32>
    %279 = vector.multi_reduction <add>, %278, %cst_203 [1] : vector<64x32xf32> to vector<64xf32>
    %280 = vector.shape_cast %279 : vector<64xf32> to vector<64x1xf32>
    %cst_204 = arith.constant 3.200000e+01 : f32
    %281 = vector.broadcast %cst_204 : f32 to vector<64x1xf32>
    %282 = arith.divf %280, %281 : vector<64x1xf32>
    %283 = vector.broadcast %275 : vector<64x1xf32> to vector<64x32xf32>
    %284 = arith.subf %267, %283 : vector<64x32xf32>
    %cst_205 = arith.constant 9.99999996E-13 : f32
    %285 = vector.broadcast %cst_205 : f32 to vector<64x1xf32>
    %286 = arith.addf %282, %285 : vector<64x1xf32>
    %287 = math.rsqrt %286 : vector<64x1xf32>
    %288 = vector.broadcast %287 : vector<64x1xf32> to vector<64x32xf32>
    %289 = arith.mulf %284, %288 : vector<64x32xf32>
    %290 = vector.broadcast %269 : vector<1x32xf32> to vector<64x32xf32>
    %291 = arith.mulf %289, %290 : vector<64x32xf32>
    %292 = vector.broadcast %271 : vector<1x32xf32> to vector<64x32xf32>
    %293 = arith.addf %291, %292 : vector<64x32xf32>
    %c1_206 = arith.constant 1 : index
    %c0_207 = arith.constant 0 : index
    %c0_208 = arith.constant 0 : index
    %294 = vector.load %arg17[%c1_206, %c0_207, %c0_208] : memref<2x32x64xf32, #tpu.memory_space<vmem>>, vector<1x32x64xf32>
    %295 = vector.shape_cast %294 : vector<1x32x64xf32> to vector<32x64xf32>
    %cst_209 = arith.constant dense<0.000000e+00> : vector<64x64xf32>
    %296 = tpu.matmul %293, %295, %cst_209 {dimension_numbers = #tpu.dot_dimension_numbers<[1], [0], [0], [1], [0, 0, 1, 1], [], []>} : vector<64x32xf32>, vector<32x64xf32>, vector<64x64xf32> -> vector<64x64xf32>
    %c1_210 = arith.constant 1 : index
    %c0_211 = arith.constant 0 : index
    %c0_212 = arith.constant 0 : index
    %297 = vector.load %arg18[%c1_210, %c0_211, %c0_212] : memref<2x1x64xf32, #tpu.memory_space<vmem>>, vector<1x1x64xf32>
    %298 = vector.shape_cast %297 : vector<1x1x64xf32> to vector<1x64xf32>
    %299 = vector.broadcast %298 : vector<1x64xf32> to vector<64x64xf32>
    %300 = arith.addf %296, %299 : vector<64x64xf32>
    %301 = arith.mulf %300, %300 : vector<64x64xf32>
    %302 = arith.mulf %300, %301 : vector<64x64xf32>
    %cst_213 = arith.constant 4.471500e-02 : f32
    %303 = vector.broadcast %cst_213 : f32 to vector<64x64xf32>
    %304 = arith.mulf %303, %302 : vector<64x64xf32>
    %305 = arith.addf %300, %304 : vector<64x64xf32>
    %cst_214 = arith.constant 0.797884583 : f32
    %306 = vector.broadcast %cst_214 : f32 to vector<64x64xf32>
    %307 = arith.mulf %306, %305 : vector<64x64xf32>
    %308 = math.tanh %307 : vector<64x64xf32>
    %cst_215 = arith.constant 1.000000e+00 : f32
    %309 = vector.broadcast %cst_215 : f32 to vector<64x64xf32>
    %310 = arith.addf %309, %308 : vector<64x64xf32>
    %cst_216 = arith.constant 5.000000e-01 : f32
    %311 = vector.broadcast %cst_216 : f32 to vector<64x64xf32>
    %312 = arith.mulf %311, %310 : vector<64x64xf32>
    %313 = arith.mulf %300, %312 : vector<64x64xf32>
    %c1_217 = arith.constant 1 : index
    %c0_218 = arith.constant 0 : index
    %c0_219 = arith.constant 0 : index
    %314 = vector.load %arg19[%c1_217, %c0_218, %c0_219] : memref<2x64x32xf32, #tpu.memory_space<vmem>>, vector<1x64x32xf32>
    %315 = vector.shape_cast %314 : vector<1x64x32xf32> to vector<64x32xf32>
    %cst_220 = arith.constant dense<0.000000e+00> : vector<64x32xf32>
    %316 = tpu.matmul %313, %315, %cst_220 {dimension_numbers = #tpu.dot_dimension_numbers<[1], [0], [0], [1], [0, 0, 1, 1], [], []>} : vector<64x64xf32>, vector<64x32xf32>, vector<64x32xf32> -> vector<64x32xf32>
    %c1_221 = arith.constant 1 : index
    %c0_222 = arith.constant 0 : index
    %c0_223 = arith.constant 0 : index
    %317 = vector.load %arg20[%c1_221, %c0_222, %c0_223] : memref<2x1x32xf32, #tpu.memory_space<vmem>>, vector<1x1x32xf32>
    %318 = vector.shape_cast %317 : vector<1x1x32xf32> to vector<1x32xf32>
    %319 = vector.broadcast %318 : vector<1x32xf32> to vector<64x32xf32>
    %320 = arith.addf %316, %319 : vector<64x32xf32>
    %321 = arith.addf %293, %320 : vector<64x32xf32>
    %c1_224 = arith.constant 1 : index
    %c0_225 = arith.constant 0 : index
    %c0_226 = arith.constant 0 : index
    %322 = vector.load %arg21[%c1_224, %c0_225, %c0_226] : memref<2x1x32xf32, #tpu.memory_space<vmem>>, vector<1x1x32xf32>
    %323 = vector.shape_cast %322 : vector<1x1x32xf32> to vector<1x32xf32>
    %c1_227 = arith.constant 1 : index
    %c0_228 = arith.constant 0 : index
    %c0_229 = arith.constant 0 : index
    %324 = vector.load %arg22[%c1_227, %c0_228, %c0_229] : memref<2x1x32xf32, #tpu.memory_space<vmem>>, vector<1x1x32xf32>
    %325 = vector.shape_cast %324 : vector<1x1x32xf32> to vector<1x32xf32>
    %cst_230 = arith.constant dense<0.000000e+00> : vector<64xf32>
    %326 = vector.multi_reduction <add>, %321, %cst_230 [1] : vector<64x32xf32> to vector<64xf32>
    %327 = vector.shape_cast %326 : vector<64xf32> to vector<64x1xf32>
    %cst_231 = arith.constant 3.200000e+01 : f32
    %328 = vector.broadcast %cst_231 : f32 to vector<64x1xf32>
    %329 = arith.divf %327, %328 : vector<64x1xf32>
    %330 = vector.broadcast %329 : vector<64x1xf32> to vector<64x32xf32>
    %331 = arith.subf %321, %330 : vector<64x32xf32>
    %332 = arith.mulf %331, %331 : vector<64x32xf32>
    %cst_232 = arith.constant dense<0.000000e+00> : vector<64xf32>
    %333 = vector.multi_reduction <add>, %332, %cst_232 [1] : vector<64x32xf32> to vector<64xf32>
    %334 = vector.shape_cast %333 : vector<64xf32> to vector<64x1xf32>
    %cst_233 = arith.constant 3.200000e+01 : f32
    %335 = vector.broadcast %cst_233 : f32 to vector<64x1xf32>
    %336 = arith.divf %334, %335 : vector<64x1xf32>
    %337 = vector.broadcast %329 : vector<64x1xf32> to vector<64x32xf32>
    %338 = arith.subf %321, %337 : vector<64x32xf32>
    %cst_234 = arith.constant 9.99999996E-13 : f32
    %339 = vector.broadcast %cst_234 : f32 to vector<64x1xf32>
    %340 = arith.addf %336, %339 : vector<64x1xf32>
    %341 = math.rsqrt %340 : vector<64x1xf32>
    %342 = vector.broadcast %341 : vector<64x1xf32> to vector<64x32xf32>
    %343 = arith.mulf %338, %342 : vector<64x32xf32>
    %344 = vector.broadcast %323 : vector<1x32xf32> to vector<64x32xf32>
    %345 = arith.mulf %343, %344 : vector<64x32xf32>
    %346 = vector.broadcast %325 : vector<1x32xf32> to vector<64x32xf32>
    %347 = arith.addf %345, %346 : vector<64x32xf32>
    %c0_235 = arith.constant 0 : index
    %c0_236 = arith.constant 0 : index
    %348 = vector.load %arg4[%c0_235, %c0_236] : memref<8x64xf32, #tpu.memory_space<vmem>>, vector<8x64xf32>
    %cst_237 = arith.constant dense<0.000000e+00> : vector<8x32xf32>
    %349 = tpu.matmul %348, %347, %cst_237 {dimension_numbers = #tpu.dot_dimension_numbers<[1], [0], [0], [1], [0, 0, 1, 1], [], []>} : vector<8x64xf32>, vector<64x32xf32>, vector<8x32xf32> -> vector<8x32xf32>
    %c0_238 = arith.constant 0 : index
    %c0_239 = arith.constant 0 : index
    %350 = vector.load %arg23[%c0_238, %c0_239] : memref<32x32xf32, #tpu.memory_space<vmem>>, vector<32x32xf32>
    %cst_240 = arith.constant dense<0.000000e+00> : vector<8x32xf32>
    %351 = tpu.matmul %349, %350, %cst_240 {dimension_numbers = #tpu.dot_dimension_numbers<[1], [0], [0], [1], [0, 0, 1, 1], [], []>} : vector<8x32xf32>, vector<32x32xf32>, vector<8x32xf32> -> vector<8x32xf32>
    %c0_241 = arith.constant 0 : index
    %c0_242 = arith.constant 0 : index
    %352 = vector.load %arg24[%c0_241, %c0_242] : memref<1x32xf32, #tpu.memory_space<vmem>>, vector<1x32xf32>
    %353 = vector.broadcast %352 : vector<1x32xf32> to vector<8x32xf32>
    %354 = arith.addf %351, %353 : vector<8x32xf32>
    %355 = math.tanh %354 : vector<8x32xf32>
    %c0_243 = arith.constant 0 : index
    %c0_244 = arith.constant 0 : index
    %356 = vector.load %arg25[%c0_243, %c0_244] : memref<32x128xf32, #tpu.memory_space<vmem>>, vector<32x128xf32>
    %cst_245 = arith.constant dense<0.000000e+00> : vector<8x128xf32>
    %357 = tpu.matmul %355, %356, %cst_245 {dimension_numbers = #tpu.dot_dimension_numbers<[1], [0], [0], [1], [0, 0, 1, 1], [], []>} : vector<8x32xf32>, vector<32x128xf32>, vector<8x128xf32> -> vector<8x128xf32>
    %c0_246 = arith.constant 0 : index
    %c0_247 = arith.constant 0 : index
    %358 = vector.load %arg26[%c0_246, %c0_247] : memref<1x128xf32, #tpu.memory_space<vmem>>, vector<1x128xf32>
    %359 = vector.broadcast %358 : vector<1x128xf32> to vector<8x128xf32>
    %360 = arith.addf %357, %359 : vector<8x128xf32>
    %c0_248 = arith.constant 0 : index
    %c0_249 = arith.constant 0 : index
    %361 = vector.load %arg27[%c0_248, %c0_249] : memref<8x128xf32, #tpu.memory_space<vmem>>, vector<8x128xf32>
    tpu.vector_store %arg27[%c0_248, %c0_249], %360 {strides = array<i32>} : memref<8x128xf32, #tpu.memory_space<vmem>>, vector<8x128xf32>,
    %cst_250 = arith.constant dense<0xFF800000> : vector<8xf32>
    %362 = vector.multi_reduction <maximumf>, %360, %cst_250 [1] : vector<8x128xf32> to vector<8xf32>
    %363 = vector.shape_cast %362 : vector<8xf32> to vector<8x1xf32>
    %364 = vector.broadcast %363 : vector<8x1xf32> to vector<8x128xf32>
    %365 = arith.subf %360, %364 : vector<8x128xf32>
    %366 = math.exp %365 : vector<8x128xf32>
    %cst_251 = arith.constant dense<0.000000e+00> : vector<8xf32>
    %367 = vector.multi_reduction <add>, %366, %cst_251 [1] : vector<8x128xf32> to vector<8xf32>
    %368 = vector.shape_cast %367 : vector<8xf32> to vector<8x1xf32>
    %369 = math.log %368 : vector<8x1xf32>
    %370 = vector.broadcast %369 : vector<8x1xf32> to vector<8x128xf32>
    %371 = arith.subf %365, %370 : vector<8x128xf32>
    %c0_252 = arith.constant 0 : index
    %c0_253 = arith.constant 0 : index
    %372 = vector.load %arg3[%c0_252, %c0_253] : memref<8x128xf32, #tpu.memory_space<vmem>>, vector<8x128xf32>
    %373 = arith.mulf %372, %371 : vector<8x128xf32>
    %cst_254 = arith.constant dense<0.000000e+00> : vector<8xf32>
    %374 = vector.multi_reduction <add>, %373, %cst_254 [1] : vector<8x128xf32> to vector<8xf32>
    %375 = vector.shape_cast %374 : vector<8xf32> to vector<8x1xf32>
    %cst_255 = arith.constant 0.000000e+00 : f32
    %376 = vector.broadcast %cst_255 : f32 to vector<8x1xf32>
    %377 = arith.subf %376, %375 : vector<8x1xf32>
    %c0_256 = arith.constant 0 : index
    %c0_257 = arith.constant 0 : index
    %378 = vector.load %arg28[%c0_256, %c0_257] : memref<8x1xf32, #tpu.memory_space<vmem>>, vector<8x1xf32>
    tpu.vector_store %arg28[%c0_256, %c0_257], %377 {strides = array<i32>} : memref<8x1xf32, #tpu.memory_space<vmem>>, vector<8x1xf32>,
    return
  }
  func.func @transform_0(%arg0: i32) -> (i32, i32) {
    %c0_i32 = arith.constant 0 : i32
    %c0_i32_0 = arith.constant 0 : i32
    return %arg0, %c0_i32 : i32, i32
  }
  func.func @transform_1(%arg0: i32) -> (i32, i32, i32) {
    %c0_i32 = arith.constant 0 : i32
    %c0_i32_0 = arith.constant 0 : i32
    %c0_i32_1 = arith.constant 0 : i32
    return %arg0, %c0_i32, %c0_i32_0 : i32, i32, i32
  }
  func.func @transform_2(%arg0: i32) -> (i32, i32) {
    %c0_i32 = arith.constant 0 : i32
    %c0_i32_0 = arith.constant 0 : i32
    return %arg0, %c0_i32 : i32, i32
  }
  func.func @transform_3(%arg0: i32) -> (i32, i32) {
    %c0_i32 = arith.constant 0 : i32
    %c0_i32_0 = arith.constant 0 : i32
    %c0_i32_1 = arith.constant 0 : i32
    return %c0_i32, %c0_i32_0 : i32, i32
  }
  func.func @transform_4(%arg0: i32) -> (i32, i32) {
    %c0_i32 = arith.constant 0 : i32
    %c0_i32_0 = arith.constant 0 : i32
    %c0_i32_1 = arith.constant 0 : i32
    return %c0_i32, %c0_i32_0 : i32, i32
  }
  func.func @transform_5(%arg0: i32) -> (i32, i32) {
    %c0_i32 = arith.constant 0 : i32
    %c0_i32_0 = arith.constant 0 : i32
    %c0_i32_1 = arith.constant 0 : i32
    return %c0_i32, %c0_i32_0 : i32, i32
  }
  func.func @transform_6(%arg0: i32) -> (i32, i32, i32, i32) {
    %c0_i32 = arith.constant 0 : i32
    %c0_i32_0 = arith.constant 0 : i32
    %c0_i32_1 = arith.constant 0 : i32
    %c0_i32_2 = arith.constant 0 : i32
    %c0_i32_3 = arith.constant 0 : i32
    return %c0_i32, %c0_i32_0, %c0_i32_1, %c0_i32_2 : i32, i32, i32, i32
  }
  func.func @transform_7(%arg0: i32) -> (i32, i32, i32, i32) {
    %c0_i32 = arith.constant 0 : i32
    %c0_i32_0 = arith.constant 0 : i32
    %c0_i32_1 = arith.constant 0 : i32
    %c0_i32_2 = arith.constant 0 : i32
    %c0_i32_3 = arith.constant 0 : i32
    return %c0_i32, %c0_i32_0, %c0_i32_1, %c0_i32_2 : i32, i32, i32, i32
  }
  func.func @transform_8(%arg0: i32) -> (i32, i32, i32, i32) {
    %c0_i32 = arith.constant 0 : i32
    %c0_i32_0 = arith.constant 0 : i32
    %c0_i32_1 = arith.constant 0 : i32
    %c0_i32_2 = arith.constant 0 : i32
    %c0_i32_3 = arith.constant 0 : i32
    return %c0_i32, %c0_i32_0, %c0_i32_1, %c0_i32_2 : i32, i32, i32, i32
  }
  func.func @transform_9(%arg0: i32) -> (i32, i32, i32, i32) {
    %c0_i32 = arith.constant 0 : i32
    %c0_i32_0 = arith.constant 0 : i32
    %c0_i32_1 = arith.constant 0 : i32
    %c0_i32_2 = arith.constant 0 : i32
    %c0_i32_3 = arith.constant 0 : i32
    return %c0_i32, %c0_i32_0, %c0_i32_1, %c0_i32_2 : i32, i32, i32, i32
  }
  func.func @transform_10(%arg0: i32) -> (i32, i32, i32, i32) {
    %c0_i32 = arith.constant 0 : i32
    %c0_i32_0 = arith.constant 0 : i32
    %c0_i32_1 = arith.constant 0 : i32
    %c0_i32_2 = arith.constant 0 : i32
    %c0_i32_3 = arith.constant 0 : i32
    return %c0_i32, %c0_i32_0, %c0_i32_1, %c0_i32_2 : i32, i32, i32, i32
  }
  func.func @transform_11(%arg0: i32) -> (i32, i32, i32, i32) {
    %c0_i32 = arith.constant 0 : i32
    %c0_i32_0 = arith.constant 0 : i32
    %c0_i32_1 = arith.constant 0 : i32
    %c0_i32_2 = arith.constant 0 : i32
    %c0_i32_3 = arith.constant 0 : i32
    return %c0_i32, %c0_i32_0, %c0_i32_1, %c0_i32_2 : i32, i32, i32, i32
  }
  func.func @transform_12(%arg0: i32) -> (i32, i32, i32, i32) {
    %c0_i32 = arith.constant 0 : i32
    %c0_i32_0 = arith.constant 0 : i32
    %c0_i32_1 = arith.constant 0 : i32
    %c0_i32_2 = arith.constant 0 : i32
    %c0_i32_3 = arith.constant 0 : i32
    return %c0_i32, %c0_i32_0, %c0_i32_1, %c0_i32_2 : i32, i32, i32, i32
  }
  func.func @transform_13(%arg0: i32) -> (i32, i32, i32) {
    %c0_i32 = arith.constant 0 : i32
    %c0_i32_0 = arith.constant 0 : i32
    %c0_i32_1 = arith.constant 0 : i32
    %c0_i32_2 = arith.constant 0 : i32
    return %c0_i32, %c0_i32_0, %c0_i32_1 : i32, i32, i32
  }
  func.func @transform_14(%arg0: i32) -> (i32, i32, i32) {
    %c0_i32 = arith.constant 0 : i32
    %c0_i32_0 = arith.constant 0 : i32
    %c0_i32_1 = arith.constant 0 : i32
    %c0_i32_2 = arith.constant 0 : i32
    return %c0_i32, %c0_i32_0, %c0_i32_1 : i32, i32, i32
  }
  func.func @transform_15(%arg0: i32) -> (i32, i32, i32) {
    %c0_i32 = arith.constant 0 : i32
    %c0_i32_0 = arith.constant 0 : i32
    %c0_i32_1 = arith.constant 0 : i32
    %c0_i32_2 = arith.constant 0 : i32
    return %c0_i32, %c0_i32_0, %c0_i32_1 : i32, i32, i32
  }
  func.func @transform_16(%arg0: i32) -> (i32, i32, i32) {
    %c0_i32 = arith.constant 0 : i32
    %c0_i32_0 = arith.constant 0 : i32
    %c0_i32_1 = arith.constant 0 : i32
    %c0_i32_2 = arith.constant 0 : i32
    return %c0_i32, %c0_i32_0, %c0_i32_1 : i32, i32, i32
  }
  func.func @transform_17(%arg0: i32) -> (i32, i32, i32) {
    %c0_i32 = arith.constant 0 : i32
    %c0_i32_0 = arith.constant 0 : i32
    %c0_i32_1 = arith.constant 0 : i32
    %c0_i32_2 = arith.constant 0 : i32
    return %c0_i32, %c0_i32_0, %c0_i32_1 : i32, i32, i32
  }
  func.func @transform_18(%arg0: i32) -> (i32, i32, i32) {
    %c0_i32 = arith.constant 0 : i32
    %c0_i32_0 = arith.constant 0 : i32
    %c0_i32_1 = arith.constant 0 : i32
    %c0_i32_2 = arith.constant 0 : i32
    return %c0_i32, %c0_i32_0, %c0_i32_1 : i32, i32, i32
  }
  func.func @transform_19(%arg0: i32) -> (i32, i32, i32) {
    %c0_i32 = arith.constant 0 : i32
    %c0_i32_0 = arith.constant 0 : i32
    %c0_i32_1 = arith.constant 0 : i32
    %c0_i32_2 = arith.constant 0 : i32
    return %c0_i32, %c0_i32_0, %c0_i32_1 : i32, i32, i32
  }
  func.func @transform_20(%arg0: i32) -> (i32, i32, i32) {
    %c0_i32 = arith.constant 0 : i32
    %c0_i32_0 = arith.constant 0 : i32
    %c0_i32_1 = arith.constant 0 : i32
    %c0_i32_2 = arith.constant 0 : i32
    return %c0_i32, %c0_i32_0, %c0_i32_1 : i32, i32, i32
  }
  func.func @transform_21(%arg0: i32) -> (i32, i32, i32) {
    %c0_i32 = arith.constant 0 : i32
    %c0_i32_0 = arith.constant 0 : i32
    %c0_i32_1 = arith.constant 0 : i32
    %c0_i32_2 = arith.constant 0 : i32
    return %c0_i32, %c0_i32_0, %c0_i32_1 : i32, i32, i32
  }
  func.func @transform_22(%arg0: i32) -> (i32, i32) {
    %c0_i32 = arith.constant 0 : i32
    %c0_i32_0 = arith.constant 0 : i32
    %c0_i32_1 = arith.constant 0 : i32
    return %c0_i32, %c0_i32_0 : i32, i32
  }
  func.func @transform_23(%arg0: i32) -> (i32, i32) {
    %c0_i32 = arith.constant 0 : i32
    %c0_i32_0 = arith.constant 0 : i32
    %c0_i32_1 = arith.constant 0 : i32
    return %c0_i32, %c0_i32_0 : i32, i32
  }
  func.func @transform_24(%arg0: i32) -> (i32, i32) {
    %c0_i32 = arith.constant 0 : i32
    %c0_i32_0 = arith.constant 0 : i32
    %c0_i32_1 = arith.constant 0 : i32
    return %c0_i32, %c0_i32_0 : i32, i32
  }
  func.func @transform_25(%arg0: i32) -> (i32, i32) {
    %c0_i32 = arith.constant 0 : i32
    %c0_i32_0 = arith.constant 0 : i32
    %c0_i32_1 = arith.constant 0 : i32
    return %c0_i32, %c0_i32_0 : i32, i32
  }
  func.func @transform_26(%arg0: i32) -> (i32, i32) {
    %c0_i32 = arith.constant 0 : i32
    %c0_i32_0 = arith.constant 0 : i32
    return %arg0, %c0_i32 : i32, i32
  }
  func.func @transform_27(%arg0: i32) -> (i32, i32) {
    %c0_i32 = arith.constant 0 : i32
    %c0_i32_0 = arith.constant 0 : i32
    return %arg0, %c0_i32 : i32, i32
  }
}

</mosaic_0001>

<bundles_post_ra>
// kernel: transformer_classifier_forward.1
= control target key start
LH: loop header
LB: loop body
LE: loop exit
PB: predicated region body
PF: predicated region fallthrough
CT: control target
= control target key end

     0   :  { %s14070_s0 = inlined_call_operand.vmem [shape: f32[128,32], index: 0, kind: input, shape index: {}]   ;;  %s14071_s1 = inlined_call_operand.vmem [shape: f32[16,1,8], index: 1, kind: input, shape index: {}]   ;;  %s14072_s2 = inlined_call_operand.vmem [shape: f32[16,128], index: 2, kind: input, shape index: {}]   ;;  %s14073_s3 = inlined_call_operand.vmem [shape: f32[8,64], index: 3, kind: input, shape index: {}]   ;;  %s14074_s4 = inlined_call_operand.vmem [shape: f32[1,32], index: 4, kind: input, shape index: {}]   ;;  %s14075_s5 = inlined_call_operand.vmem [shape: f32[1,32], index: 5, kind: input, shape index: {}]   ;;  %s14076_s6 = inlined_call_operand.vmem [shape: f32[2,2,32,16], index: 6, kind: input, shape index: {}]   ;;  %s14077_s7 = inlined_call_operand.vmem [shape: f32[2,2,1,16], index: 7, kind: input, shape index: {}]   ;;  %s14078_s8 = inlined_call_operand.vmem [shape: f32[2,2,32,16], index: 8, kind: input, shape index: {}]   ;;  %s14079_s9 = inlined_call_operand.vmem [shape: f32[2,2,1,16], index: 9, kind: input, shape index: {}]   ;;  %s14080_s10 = inlined_call_operand.vmem [shape: f32[2,2,32,16], index: 10, kind: input, shape index: {}]   ;;  %s14081_s11 = inlined_call_operand.vmem [shape: f32[2,2,1,16], index: 11, kind: input, shape index: {}]   ;;  %s14082_s12 = inlined_call_operand.vmem [shape: f32[2,2,16,32], index: 12, kind: input, shape index: {}]   ;;  %s14083_s13 = inlined_call_operand.vmem [shape: f32[2,1,32], index: 13, kind: input, shape index: {}]   ;;  %s14084_s14 = inlined_call_operand.vmem [shape: f32[2,1,32], index: 14, kind: input, shape index: {}]   ;;  %s14085_s15 = inlined_call_operand.vmem [shape: f32[2,1,32], index: 15, kind: input, shape index: {}]   ;;  %s14086_s16 = inlined_call_operand.vmem [shape: f32[2,32,64], index: 16, kind: input, shape index: {}]   ;;  %s14087_s17 = inlined_call_operand.vmem [shape: f32[2,1,64], index: 17, kind: input, shape index: {}]   ;;  %s14088_s18 = inlined_call_operand.vmem [shape: f32[2,64,32], index: 18, kind: input, shape index: {}]   ;;  %s14089_s19 = inlined_call_operand.vmem [shape: f32[2,1,32], index: 19, kind: input, shape index: {}]   ;;  %s14090_s20 = inlined_call_operand.vmem [shape: f32[2,1,32], index: 20, kind: input, shape index: {}]   ;;  %s14091_s21 = inlined_call_operand.vmem [shape: f32[2,1,32], index: 21, kind: input, shape index: {}]   ;;  %s14092_s22 = inlined_call_operand.vmem [shape: f32[32,32], index: 22, kind: input, shape index: {}]   ;;  %s14093_s23 = inlined_call_operand.vmem [shape: f32[1,32], index: 23, kind: input, shape index: {}]   ;;  %s14094_s24 = inlined_call_operand.vmem [shape: f32[32,128], index: 24, kind: input, shape index: {}]   ;;  %s14095_s25 = inlined_call_operand.vmem [shape: f32[1,128], index: 25, kind: input, shape index: {}]   ;;  %s14096_s26 = inlined_call_operand.vmem [shape: f32[16,128], index: 26, kind: output, shape index: {0}]   ;;  %s14097_s27 = inlined_call_operand.vmem [shape: f32[16,1], index: 27, kind: output, shape index: {1}]  }
   0x1   :  { %14105 = sst [smem:[#allocation3_spill]] %s14070_s0 }
   0x2   :  { %14106 = sst [smem:[#allocation4_spill]] %s14071_s1 }
   0x3   :  { %14107 = sst [smem:[#allocation5_spill]] %s14072_s2 }
   0x4   :  { %14108 = sst [smem:[#allocation6_spill]] %s14073_s3 }
   0x5   :  { %14109 = sst [smem:[#allocation7_spill]] %s14074_s4 }
   0x6   :  { %14110 = sst [smem:[#allocation8_spill]] %s14075_s5 }
   0x7   :  { %14111 = sst [smem:[#allocation9_spill]] %s14076_s6 }
   0x8   :  { %14112 = sst [smem:[#allocation10_spill]] %s14077_s7  ;;  %s12099_s7 = smov 0  }
   0x9   :  { %14113 = sst [smem:[#allocation11_spill]] %s14078_s8 }
   0xa   :  { %14114 = sst [smem:[#allocation12_spill]] %s14079_s9 }
   0xb   :  { %14115 = sst [smem:[#allocation13_spill]] %s14080_s10 }
   0xc   :  { %14116 = sst [smem:[#allocation14_spill]] %s14081_s11 }
   0xd   :  { %14117 = sst [smem:[#allocation15_spill]] %s14095_s25 }
   0xe   :  { %14118 = sst [smem:[#allocation16_spill]] %s14096_s26 }
   0xf   :  { %14119 = sst [smem:[#allocation17_spill]] %s14097_s27 }
  0x10 LB: > { %14120 = sst [smem:[#allocation2_spill]] %s11954_s7  ;;  %s12105_s4 = sadd.s32 4294967295, %s11954_s7   ;;  %s11954_s7 = sphi %s12099_s7, %s38_s7  }
  0x11   : > { %p9943_p0 = scmp.ge.s32.totalorder %s11954_s7, 1  ;;  %p760_p1 = scmp.lt.s32.totalorder %s11954_s7, 3 }
  0x13   : > { %p761_p2 = pnand %p9943_p0, %p760_p1 }
  0x14   : > { %s9944_s8 = sshll.u32 (!%p761_p2), %s12105_s4, 3  ;;  %vm876_vm0 = vcmask (!%p761_p2), 261120   ;;  %s14121_s28 = sld [smem:[#allocation3_spill]] (!%p761_p2)  ;;  %vm11957_vm1 = vmmov (!%p761_p2), 0   ;;  %vm1792_vm2 = vcmask (!%p761_p2), 130048   ;;  %vm3041_vm3 = vcmask (!%p761_p2), 64512  }
  0x15   : > { %764 = sbr.rel (%p761_p2) target bundleno = 6073 (0x17b9), region = 124  ;;  %p844_p3 = scmp.lt.s32.totalorder (!%p761_p2), %s9944_s8, 15  ;;  %vm5041_vm4 = vcmask (!%p761_p2), 523264   ;;  %vm9832_vm5 = vcmask (!%p761_p2), 7168  }
  0x16   : > { %s14122_s1 = sld [smem:[#allocation9_spill]] (!%p761_p2)  ;;  %s14125_s5 = sld [smem:[#allocation7_spill]] (!%p761_p2) }
  0x17   : > { %s14126_s29 = sld [smem:[#allocation8_spill]] (!%p761_p2)  ;;  %s14128_s2 = sld [smem:[#allocation10_spill]] (!%p761_p2) }
  0x18   : > { %s14131_s11 = sld [smem:[#allocation6_spill]] (!%p761_p2)  ;;  %p854_p4 = scmp.lt.s32.totalorder (!%p761_p2), %s12105_s4, 1 }
  0x19   : > { %s14132_s26 = sld [smem:[#allocation15_spill]] (!%p761_p2)  ;;  %s14133_s27 = sld [smem:[#allocation16_spill]] (!%p761_p2) }
  0x1c   : > { %s14138_s8 = smov (!%p844_p3, %s9944_s8), 15  ;;  %v1066_v56 = vld [vmem:[%s14122_s1] sm:$0xff]  ;;  %v1067_v57 = vld [vmem:[%s14122_s1 + $0x8] sm:$0xff]  ;;  %v1068_v62 = vld [vmem:[%s14122_s1 + $0x10] sm:$0xff]  ;;  %s14140_s4 = smov (!%p854_p4, %s12105_s4), 1 }
  0x1d   : > { %s9945_s30 = sshll.u32 %s14138_s8, 3  ;;  %v11467_v59 = vpack.c.bf16 %v1067_v57, %v1066_v56  ;;  %v1069_v63 = vld [vmem:[%s14122_s1 + $0x18] sm:$0xff] }
  0x1e   : > { %s847_s0 = scalar_lea.vmem %s14121_s28, %s9945_s30  ;;  %s14123_s30 = sld [smem:[#allocation11_spill]] }
  0x1f   : > { %v866_v0 = vld [vmem:[%s847_s0] sm:$0xff]  ;;  %v868_v1 = vld [vmem:[%s847_s0 + $0x10] sm:$0xff]  ;;  %v867_v2 = vld [vmem:[%s847_s0 + $0x8] sm:$0xff]  ;;  %11468 = vmatprep.subr.bf16.mxu0 %v11467_v59  ;;  %s14124_s28 = sld [smem:[#allocation13_spill]] }
  0x20   : > { %v877_v3 = vsel %vm876_vm0, %v866_v0, 0.0  ;;  %v883_v4 = vsel %vm876_vm0, %v868_v1, 0.0  ;;  %v869_v5 = vld [vmem:[%s847_s0 + $0x18] sm:$0xff]  ;;  %v880_v6 = vsel %vm876_vm0, %v867_v2, 0.0  ;;  %v870_v8 = vld [vmem:[%s847_s0 + $0x20] sm:$0xff]  ;;  %v871_v9 = vld [vmem:[%s847_s0 + $0x28] sm:$0xff]  ;;  %11470 = vmatpush3.bf16.msra.mxu0 %v11467_v59 }
  0x21   : > { %878 = vadd.xlane.f32.xlu0 %v877_v3  ;;  %884 = vadd.xlane.f32.xlu1 %v883_v4  ;;  %v886_v7 = vsel %vm876_vm0, %v869_v5, 0.0  ;;  %v889_v10 = vsel %vm876_vm0, %v870_v8, 0.0  ;;  %v892_v11 = vsel %vm876_vm0, %v871_v9, 0.0  ;;  %v872_v12 = vld [vmem:[%s847_s0 + $0x30] sm:$0xff]  ;;  %v873_v13 = vld [vmem:[%s847_s0 + $0x38] sm:$0xff]  ;;  %s14130_s0 = sld [smem:[#allocation4_spill]] }
  0x22   : > { %v895_v14 = vsel %vm876_vm0, %v872_v12, 0.0  ;;  %v898_v15 = vsel %vm876_vm0, %v873_v13, 0.0 }
  0x24   : > { %v1206_v58 = vld [vmem:[%s14123_s30] sm:$0xff]  ;;  %v1207_v60 = vld [vmem:[%s14123_s30 + $0x8] sm:$0xff] }
  0x25   : > { %881 = vadd.xlane.f32.xlu0 %v880_v6  ;;  %887 = vadd.xlane.f32.xlu1 %v886_v7  ;;  %v11475_v61 = vpack.c.bf16 %v1207_v60, %v1206_v58  ;;  %v1322_v4 = vld [vmem:[%s14124_s28] sm:$0xff] }
  0x26   : > { %v9987_v6 = vld [vmem:[%s14122_s1 + $0x20] sm:$0xff] }
  0x27   : > { %11476 = vmatprep.subr.bf16.mxu1 %v11475_v61  ;;  %s12541_s10 = scalar_lea.vmem %s14130_s0, %s14138_s8  ;;  %s14134_s8 = sld [smem:[#allocation5_spill]] }
  0x28   : > { %11478 = vmatpush3.bf16.msra.mxu1 %v11475_v61 }
  0x29   : > { %890 = vadd.xlane.f32.xlu0 %v889_v10  ;;  %893 = vadd.xlane.f32.xlu1 %v892_v11 }
  0x2d   : > { %896 = vadd.xlane.f32.xlu0 %v895_v14  ;;  %899 = vadd.xlane.f32.xlu1 %v898_v15 }
  0xae   : > { %v879_v16 = vpop.xlane.xlu0 %878  ;;  %v885_v17 = vpop.xlane.xlu1 %884 }
  0xaf   : > { %v902_v18 = vmul.f32 0.03125, %v879_v16  ;;  %v904_v19 = vmul.f32 0.03125, %v885_v17 }
  0xb1   : > { %v12124_v20 = vsub.f32 %v866_v0, %v902_v18  ;;  %v12126_v21 = vsub.f32 %v868_v1, %v904_v19  ;;  %v1208_v0 = vld [vmem:[%s14123_s30 + $0x10] sm:$0xff]  ;;  %v11471_v1 = vpack.c.bf16 %v1069_v63, %v1068_v62  ;;  %v10001_v63 = vld [vmem:[%s14123_s30 + $0x20] sm:$0xff] }
  0xb2   : > { %v882_v22 = vpop.xlane.xlu0 %881  ;;  %v888_v23 = vpop.xlane.xlu1 %887 }
  0xb3   : > { %v903_v24 = vmul.f32 0.03125, %v882_v22  ;;  %v905_v25 = vmul.f32 0.03125, %v888_v23  ;;  %v918_v26 = vmul.f32 %v12124_v20, %v12124_v20  ;;  %v920_v27 = vmul.f32 %v12126_v21, %v12126_v21  ;;  %11472 = vmatprep.subr.bf16.mxu0 %v11471_v1 }
  0xb4   : > { %11474 = vmatpush3.bf16.msra.mxu0 %v11471_v1 }
  0xb5   : > { %v12132_v28 = vsub.f32 %v867_v2, %v903_v24  ;;  %v12134_v29 = vsub.f32 %v869_v5, %v905_v25  ;;  %v926_v30 = vsel %vm876_vm0, %v918_v26, 0.0  ;;  %v932_v33 = vsel %vm876_vm0, %v920_v27, 0.0  ;;  %v1209_v2 = vld [vmem:[%s14123_s30 + $0x18] sm:$0xff]  ;;  %v1323_v5 = vld [vmem:[%s14124_s28 + $0x8] sm:$0xff] }
  0xb6   : > { %927 = vadd.xlane.f32.xlu0 %v926_v30  ;;  %v891_v31 = vpop.xlane.xlu0 %890  ;;  %v894_v32 = vpop.xlane.xlu1 %893  ;;  %v11479_v3 = vpack.c.bf16 %v1209_v2, %v1208_v0  ;;  %v12197_v7 = vpack.c.bf16 %v1323_v5, %v1322_v4  ;;  %v10002_v0 = vld [vmem:[%s14123_s30 + $0x28] sm:$0xff] }
  0xb7   : > { %v906_v34 = vmul.f32 0.03125, %v891_v31  ;;  %v907_v35 = vmul.f32 0.03125, %v894_v32  ;;  %v919_v36 = vmul.f32 %v12132_v28, %v12132_v28  ;;  %v921_v37 = vmul.f32 %v12134_v29, %v12134_v29 }
  0xb8   : > { %11480 = vmatprep.subr.bf16.mxu1 %v11479_v3  ;;  %11484 = vmatprep.subr.bf16.mxu0 %v12197_v7 }
  0xb9   : > { %v12142_v38 = vsub.f32 %v870_v8, %v906_v34  ;;  %v12144_v39 = vsub.f32 %v871_v9, %v907_v35  ;;  %v929_v40 = vsel %vm876_vm0, %v919_v36, 0.0  ;;  %v935_v43 = vsel %vm876_vm0, %v921_v37, 0.0  ;;  %11482 = vmatpush3.bf16.msra.mxu1 %v11479_v3  ;;  %v9988_v8 = vld [vmem:[%s14122_s1 + $0x28] sm:$0xff]  ;;  %v12209_v34 = vld [vmem:[%s14125_s5] ss:$0 sm:$0xff]  ;;  %s14129_s5 = sld [smem:[#allocation14_spill]] }
  0xba   : > { %933 = vadd.xlane.f32.xlu0 %v932_v33  ;;  %930 = vadd.xlane.f32.xlu1 %v929_v40  ;;  %v897_v41 = vpop.xlane.xlu0 %896  ;;  %v900_v42 = vpop.xlane.xlu1 %899  ;;  %v12202_v9 = vpack.c.bf16 %v9988_v8, %v9987_v6  ;;  %v11499_v8 = vpack.c.bf16 %v10002_v0, %v10001_v63 }
  0xbb   : > { %v908_v44 = vmul.f32 0.03125, %v897_v41  ;;  %v909_v45 = vmul.f32 0.03125, %v900_v42  ;;  %v922_v46 = vmul.f32 %v12142_v38, %v12142_v38  ;;  %v923_v47 = vmul.f32 %v12144_v39, %v12144_v39  ;;  %v12215_v41 = vld [vmem:[%s14126_s29] ss:$0 sm:$0xff]  ;;  %s14127_s29 = sld [smem:[#allocation12_spill]] }
  0xbc   : > { %11492 = vmatprep.subr.bf16.mxu1 %v12202_v9 }
  0xbd   : > { %v12152_v48 = vsub.f32 %v872_v12, %v908_v44  ;;  %v12154_v49 = vsub.f32 %v873_v13, %v909_v45  ;;  %v938_v50 = vsel %vm876_vm0, %v922_v46, 0.0  ;;  %v941_v51 = vsel %vm876_vm0, %v923_v47, 0.0 }
  0xbe   : > { %936 = vadd.xlane.f32.xlu1 %v935_v43  ;;  %939 = vadd.xlane.f32.xlu0 %v938_v50 }
  0xbf   : > { %v924_v52 = vmul.f32 %v12152_v48, %v12152_v48  ;;  %v925_v53 = vmul.f32 %v12154_v49, %v12154_v49 }
  0xc1   : > { %v944_v54 = vsel %vm876_vm0, %v924_v52, 0.0  ;;  %v947_v55 = vsel %vm876_vm0, %v925_v53, 0.0  ;;  %v1325_v53 = vld [vmem:[%s14124_s28 + $0x18] sm:$0xff] }
  0xc2   : > { %942 = vadd.xlane.f32.xlu1 %v941_v51  ;;  %945 = vadd.xlane.f32.xlu0 %v944_v54  ;;  %v1324_v51 = vld [vmem:[%s14124_s28 + $0x10] sm:$0xff] }
  0xc3   : > { %v11487_v61 = vpack.c.bf16 %v1325_v53, %v1324_v51 }
  0xc6   : > { %948 = vadd.xlane.f32.xlu1 %v947_v55 }
 0x143   : > { %v928_v10 = vpop.xlane.xlu0 %927 }
 0x144   : > { %v950_v11 = vmul.f32 0.03125, %v928_v10 }
 0x146   : > { %v958_v12 = vadd.f32 1e-12, %v950_v11 }
 0x147   : > { %v931_v13 = vpop.xlane.xlu1 %930  ;;  %v934_v14 = vpop.xlane.xlu0 %933 }
 0x148   : > { %11694 = vrsqrt.f32 %v958_v12  ;;  %v951_v15 = vmul.f32 0.03125, %v931_v13  ;;  %v952_v16 = vmul.f32 0.03125, %v934_v14 }
 0x14a   : > { %v959_v17 = vadd.f32 1e-12, %v951_v15  ;;  %v960_v18 = vadd.f32 1e-12, %v952_v16  ;;  %v10003_v16 = vld [vmem:[%s14123_s30 + $0x30] sm:$0xff] }
 0x14b   : > { %v937_v19 = vpop.xlane.xlu1 %936  ;;  %v940_v22 = vpop.xlane.xlu0 %939 }
 0x14c   : > { %11696 = vrsqrt.f32 %v959_v17  ;;  %v953_v23 = vmul.f32 0.03125, %v937_v19  ;;  %v954_v24 = vmul.f32 0.03125, %v940_v22  ;;  %v10004_v17 = vld [vmem:[%s14123_s30 + $0x38] sm:$0xff] }
 0x14d   : > { %11698 = vrsqrt.f32 %v960_v18  ;;  %v10017_v18 = vld [vmem:[%s14124_s28 + $0x30] sm:$0xff]  ;;  %v10018_v19 = vld [vmem:[%s14124_s28 + $0x38] sm:$0xff]  ;;  %v11503_v22 = vpack.c.bf16 %v10004_v17, %v10003_v16 }
 0x14e   : > { %v961_v25 = vadd.f32 1e-12, %v953_v23  ;;  %v962_v26 = vadd.f32 1e-12, %v954_v24  ;;  %v11511_v23 = vpack.c.bf16 %v10018_v19, %v10017_v18  ;;  %v11956_v24 = vmov 0.0  }
 0x14f   : > { %v943_v27 = vpop.xlane.xlu1 %942  ;;  %v946_v30 = vpop.xlane.xlu0 %945 }
 0x150   : > { %11700 = vrsqrt.f32 %v961_v25  ;;  %v955_v31 = vmul.f32 0.03125, %v943_v27  ;;  %v956_v32 = vmul.f32 0.03125, %v946_v30  ;;  %v9969_v25 = vld [vmem:[%s14127_s29] ss:$0 sm:$0xff] }
 0x151   : > { %11702 = vrsqrt.f32 %v962_v26  ;;  %v9960_v30 = vld [vmem:[%s14128_s2] ss:$0 sm:$0xff] }
 0x152   : > { %v11695_v33 = vpop.eup %11694  ;;  %v963_v35 = vadd.f32 1e-12, %v955_v31  ;;  %v964_v36 = vadd.f32 1e-12, %v956_v32 }
 0x153   : > { %v974_v37 = vmul.f32 %v11695_v33, %v12124_v20  ;;  %v949_v40 = vpop.xlane.xlu1 %948 }
 0x154   : > { %11704 = vrsqrt.f32 %v963_v35  ;;  %v957_v42 = vmul.f32 0.03125, %v949_v40 }
 0x155   : > { %v988_v43 = vmul.f32 %v12209_v34, %v974_v37  ;;  %11706 = vrsqrt.f32 %v964_v36 }
 0x156   : > { %v11697_v44 = vpop.eup %11696  ;;  %v965_v45 = vadd.f32 1e-12, %v957_v42 }
 0x157   : > { %v11699_v46 = vpop.eup %11698  ;;  %v12219_v47 = vadd.f32 %v12215_v41, %v988_v43  ;;  %v975_v50 = vmul.f32 %v11697_v44, %v12132_v28  ;;  %v9990_v28 = vld [vmem:[%s14122_s1 + $0x38] sm:$0xff] }
 0x158   : > { %v976_v20 = vmul.f32 %v11699_v46, %v12126_v21  ;;  %11708 = vrsqrt.f32 %v965_v45  ;;  %v9989_v21 = vld [vmem:[%s14122_s1 + $0x30] sm:$0xff] }
 0x159   : > { %v989_v52 = vmul.f32 %v12209_v34, %v975_v50  ;;  %10714 = vmatprep.mubr.msk.f32.mxu0 %vm876_vm0, %v12219_v47  ;;  %10734 = vmatprep.mubr.msk.f32.mxu1 %vm876_vm0, %v12219_v47  ;;  %v11495_v62 = vpack.c.bf16 %v9990_v28, %v9989_v21 }
 0x15a   : > { %v11701_v54 = vpop.eup %11700  ;;  %v990_v55 = vmul.f32 %v12209_v34, %v976_v20 }
 0x15b   : > { %v11703_v56 = vpop.eup %11702  ;;  %v12242_v57 = vadd.f32 %v12215_v41, %v989_v52  ;;  %v977_v58 = vmul.f32 %v11701_v54, %v12134_v29  ;;  %v10015_v29 = vld [vmem:[%s14124_s28 + $0x20] sm:$0xff] }
 0x15c   : > { %v12246_v59 = vadd.f32 %v12215_v41, %v990_v55  ;;  %v978_v60 = vmul.f32 %v11703_v56, %v12142_v38  ;;  %v10016_v38 = vld [vmem:[%s14124_s28 + $0x28] sm:$0xff] }
 0x15d   : > { %v991_v1 = vmul.f32 %v12209_v34, %v977_v58  ;;  %10715 = vmatmul.mubr.msk.f32.vlgmr.msra.gmra.mrb[0].mxu0 %vm876_vm0, %v12242_v57  ;;  %10735 = vmatmul.mubr.msk.f32.vlgmr.msra.gmra.mrb[0].mxu1 %vm876_vm0, %v12242_v57  ;;  %v11507_v12 = vpack.c.bf16 %v10016_v38, %v10015_v29 }
 0x15e   : > { %v11705_v2 = vpop.eup %11704  ;;  %v992_v3 = vmul.f32 %v12209_v34, %v978_v60  ;;  %10717 = vmatprep.mubr.msk.f32.mxu0 %vm876_vm0, %v12246_v59  ;;  %10737 = vmatprep.mubr.msk.f32.mxu1 %vm876_vm0, %v12246_v59 }
 0x15f   : > { %v11707_v4 = vpop.eup %11706  ;;  %v12272_v5 = vadd.f32 %v12215_v41, %v991_v1  ;;  %v979_v6 = vmul.f32 %v11705_v2, %v12144_v39  ;;  %11486 = vmatpush3.bf16.msra.mxu0 %v12197_v7  ;;  %11494 = vmatpush3.bf16.msra.mxu1 %v12202_v9 }
 0x160   : > { %v12278_v10 = vadd.f32 %v12215_v41, %v992_v3  ;;  %v980_v11 = vmul.f32 %v11707_v4, %v12152_v48  ;;  %11488 = vmatprep.subr.bf16.mxu0 %v11487_v61  ;;  %11496 = vmatprep.subr.bf16.mxu1 %v11495_v62  ;;  %v12447_v3 = vld [vmem:[%s14129_s5] ss:$0 sm:$0xff] }
 0x161   : > { %v993_v13 = vmul.f32 %v12209_v34, %v979_v6  ;;  %10718 = vmatmul.mubr.msk.f32.gmra.mrb[2].mxu0 %vm876_vm0, %v12272_v5  ;;  %10738 = vmatmul.mubr.msk.f32.gmra.mrb[2].mxu1 %vm876_vm0, %v12272_v5 }
 0x162   : > { %v11709_v39 = vpop.eup %11708  ;;  %v994_v7 = vmul.f32 %v12209_v34, %v980_v11  ;;  %10720 = vmatprep.mubr.msk.f32.mxu0 %vm876_vm0, %v12278_v10  ;;  %10740 = vmatprep.mubr.msk.f32.mxu1 %vm876_vm0, %v12278_v10 }
 0x163   : > { %v12292_v48 = vadd.f32 %v12215_v41, %v993_v13  ;;  %v981_v9 = vmul.f32 %v11709_v39, %v12154_v49  ;;  %11490 = vmatpush3.bf16.msra.mxu0 %v11487_v61  ;;  %11498 = vmatpush3.bf16.msra.mxu1 %v11495_v62 }
 0x164   : > { %v12296_v14 = vadd.f32 %v12215_v41, %v994_v7  ;;  %11500 = vmatprep.subr.bf16.mxu0 %v11499_v8  ;;  %11508 = vmatprep.subr.bf16.mxu1 %v11507_v12 }
 0x165   : > { %v995_v15 = vmul.f32 %v12209_v34, %v981_v9  ;;  %10721 = vmatmul.mubr.msk.f32.gmra.mrb[4].mxu0 %vm876_vm0, %v12292_v48  ;;  %10741 = vmatmul.mubr.msk.f32.gmra.mrb[4].mxu1 %vm876_vm0, %v12292_v48 }
 0x166   : > { %10723 = vmatprep.mubr.msk.f32.mxu0 %vm876_vm0, %v12296_v14  ;;  %10743 = vmatprep.mubr.msk.f32.mxu1 %vm876_vm0, %v12296_v14 }
 0x167   : > { %v12308_v49 = vadd.f32 %v12215_v41, %v995_v15 }
 0x169   : > { %10724 = vmatmul.mubr.msk.f32.gmra.mrb[6].mxu0 %vm876_vm0, %v12308_v49  ;;  %10744 = vmatmul.mubr.msk.f32.gmra.mrb[6].mxu1 %vm876_vm0, %v12308_v49 }
 0x16a   : > { %10754 = vmatprep.mubr.msk.f32.mxu0 %vm876_vm0, %v12219_v47  ;;  %10774 = vmatprep.mubr.msk.f32.mxu1 %vm876_vm0, %v12219_v47 }
 0x16d   : > { %10755 = vmatmul.mubr.msk.f32.vlgmr.msra.gmra.mrb[8].mxu0 %vm876_vm0, %v12242_v57  ;;  %10775 = vmatmul.mubr.msk.f32.vlgmr.msra.gmra.mrb[8].mxu1 %vm876_vm0, %v12242_v57 }
 0x16e   : > { %10757 = vmatprep.mubr.msk.f32.mxu0 %vm876_vm0, %v12246_v59  ;;  %10777 = vmatprep.mubr.msk.f32.mxu1 %vm876_vm0, %v12246_v59 }
 0x16f   : > { %11502 = vmatpush3.bf16.msra.mxu0 %v11499_v8  ;;  %11510 = vmatpush3.bf16.msra.mxu1 %v11507_v12 }
 0x170   : > { %11504 = vmatprep.subr.bf16.mxu0 %v11503_v22  ;;  %11512 = vmatprep.subr.bf16.mxu1 %v11511_v23 }
 0x171   : > { %10758 = vmatmul.mubr.msk.f32.gmra.mrb[10].mxu0 %vm876_vm0, %v12272_v5  ;;  %10778 = vmatmul.mubr.msk.f32.gmra.mrb[10].mxu1 %vm876_vm0, %v12272_v5 }
 0x172   : > { %10760 = vmatprep.mubr.msk.f32.mxu0 %vm876_vm0, %v12278_v10  ;;  %10780 = vmatprep.mubr.msk.f32.mxu1 %vm876_vm0, %v12278_v10 }
 0x173   : > { %11506 = vmatpush3.bf16.msra.mxu0 %v11503_v22  ;;  %11514 = vmatpush3.bf16.msra.mxu1 %v11511_v23 }
 0x174   : > { %10831 = vmatprep.subr.mxu1 %v11956_v24  ;;  %10826 = vmatprep.subr.mxu0 %v11956_v24 }
 0x175   : > { %10761 = vmatmul.mubr.msk.f32.gmra.mrb[12].mxu0 %vm876_vm0, %v12292_v48  ;;  %10781 = vmatmul.mubr.msk.f32.gmra.mrb[12].mxu1 %vm876_vm0, %v12292_v48 }
 0x176   : > { %10763 = vmatprep.mubr.msk.f32.mxu0 %vm876_vm0, %v12296_v14  ;;  %10783 = vmatprep.mubr.msk.f32.mxu1 %vm876_vm0, %v12296_v14 }
 0x179   : > { %10764 = vmatmul.mubr.msk.f32.gmra.mrb[14].mxu0 %vm876_vm0, %v12308_v49  ;;  %10784 = vmatmul.mubr.msk.f32.gmra.mrb[14].mxu1 %vm876_vm0, %v12308_v49 }
 0x17a   : > { %10794 = vmatprep.mubr.msk.f32.mxu0 %vm876_vm0, %v12219_v47  ;;  %10814 = vmatprep.mubr.msk.f32.mxu1 %vm876_vm0, %v12219_v47 }
 0x17d   : > { %10795 = vmatmul.mubr.msk.f32.vlgmr.msra.gmra.mrb[16].mxu0 %vm876_vm0, %v12242_v57  ;;  %10815 = vmatmul.mubr.msk.f32.vlgmr.msra.gmra.mrb[16].mxu1 %vm876_vm0, %v12242_v57 }
 0x17e   : > { %10797 = vmatprep.mubr.msk.f32.mxu0 %vm876_vm0, %v12246_v59  ;;  %10817 = vmatprep.mubr.msk.f32.mxu1 %vm876_vm0, %v12246_v59 }
 0x181   : > { %10798 = vmatmul.mubr.msk.f32.gmra.mrb[18].mxu0 %vm876_vm0, %v12272_v5  ;;  %10818 = vmatmul.mubr.msk.f32.gmra.mrb[18].mxu1 %vm876_vm0, %v12272_v5 }
 0x182   : > { %10800 = vmatprep.mubr.msk.f32.mxu0 %vm876_vm0, %v12278_v10  ;;  %10820 = vmatprep.mubr.msk.f32.mxu1 %vm876_vm0, %v12278_v10 }
 0x185   : > { %10801 = vmatmul.mubr.msk.f32.gmra.mrb[20].mxu0 %vm876_vm0, %v12292_v48  ;;  %10821 = vmatmul.mubr.msk.f32.gmra.mrb[20].mxu1 %vm876_vm0, %v12292_v48 }
 0x186   : > { %10803 = vmatprep.mubr.msk.f32.mxu0 %vm876_vm0, %v12296_v14  ;;  %10823 = vmatprep.mubr.msk.f32.mxu1 %vm876_vm0, %v12296_v14 }
 0x189   : > { %10804 = vmatmul.mubr.msk.f32.gmra.mrb[22].mxu0 %vm876_vm0, %v12308_v49  ;;  %10824 = vmatmul.mubr.msk.f32.gmra.mrb[22].mxu1 %vm876_vm0, %v12308_v49 }
 0x18a   : > { %10833 = vmatprep.mubr.msk.f32.mxu1 %vm11957_vm1, %v11956_v24  ;;  %10828 = vmatprep.mubr.msk.f32.mxu0 %vm11957_vm1, %v11956_v24 }
 0x230   : > { %v10716_v26 = vpop.f32.mrb[0].mxu0  ;;  %v10736_v27 = vpop.f32.mrb[0].mxu1 }
 0x231   : > { %v1289_v31 = vadd.f32 %v10736_v27, %v9969_v25  ;;  %v1167_v32 = vpop.f32.mrb[1].mxu0  ;;  %v1283_v33 = vpop.f32.mrb[1].mxu1  ;;  %v1173_v35 = vadd.f32 %v10716_v26, %v9960_v30  ;;  %v10006_v27 = vld [vmem:[%s14127_s29 + $0x1] ss:$0 sm:$0xff] }
 0x232   : > { %v1284_v34 = vadd.f32 %v9969_v25, %v1283_v33  ;;  %v1168_v40 = vadd.f32 %v9960_v30, %v1167_v32  ;;  %v9992_v32 = vld [vmem:[%s14128_s2 + $0x1] ss:$0 sm:$0xff] }
 0x233   : > { %10832 = vmatpush3.xpose.msk.msra.mxu1 %vm1792_vm2, %v1289_v31 }
 0x234   : > { %v10719_v36 = vpop.f32.mrb[2].mxu0  ;;  %v10739_v37 = vpop.f32.mrb[2].mxu1  ;;  %10827 = vmatpush3.xpose.msk.msra.mxu0 %vm1792_vm2, %v1284_v34  ;;  %10841 = vmatprep.subr.mxu1 %v11956_v24 }
 0x235   : > { %v1299_v41 = vadd.f32 %v10739_v37, %v9969_v25  ;;  %v1177_v42 = vpop.f32.mrb[3].mxu0  ;;  %v1293_v43 = vpop.f32.mrb[3].mxu1  ;;  %10836 = vmatprep.subr.mxu0 %v11956_v24  ;;  %v1183_v45 = vadd.f32 %v10719_v36, %v9960_v30 }
 0x236   : > { %v1294_v44 = vadd.f32 %v9969_v25, %v1293_v43  ;;  %10834 = vmatmul.mubr.msk.f32.vlgmr.msra.gmra.mrb[24].mxu1 %vm1792_vm2, %v1173_v35  ;;  %v1178_v20 = vadd.f32 %v9960_v30, %v1177_v42 }
 0x237   : > { %10829 = vmatmul.mubr.msk.f32.vlgmr.msra.gmra.mrb[24].mxu0 %vm1792_vm2, %v1168_v40  ;;  %10842 = vmatpush3.xpose.msk.msra.mxu1 %vm1792_vm2, %v1299_v41 }
 0x238   : > { %v10722_v46 = vpop.f32.mrb[4].mxu0  ;;  %v10742_v50 = vpop.f32.mrb[4].mxu1  ;;  %10837 = vmatpush3.xpose.msk.msra.mxu0 %vm1792_vm2, %v1294_v44  ;;  %10843 = vmatprep.mubr.msk.f32.mxu1 %vm11957_vm1, %v11956_v24 }
 0x239   : > { %v1309_v51 = vadd.f32 %v10742_v50, %v9969_v25  ;;  %v1187_v52 = vpop.f32.mrb[5].mxu0  ;;  %v1303_v53 = vpop.f32.mrb[5].mxu1  ;;  %10838 = vmatprep.mubr.msk.f32.mxu0 %vm11957_vm1, %v11956_v24  ;;  %10851 = vmatprep.subr.mxu1 %v11956_v24  ;;  %v1193_v28 = vadd.f32 %v10722_v46, %v9960_v30 }
 0x23a   : > { %v1304_v21 = vadd.f32 %v9969_v25, %v1303_v53  ;;  %10844 = vmatmul.mubr.msk.f32.vlgmr.msra.gmra.mrb[26].mxu1 %vm1792_vm2, %v1183_v45  ;;  %10846 = vmatprep.subr.mxu0 %v11956_v24  ;;  %v1188_v56 = vadd.f32 %v9960_v30, %v1187_v52 }
 0x23b   : > { %10839 = vmatmul.mubr.msk.f32.vlgmr.msra.gmra.mrb[26].mxu0 %vm1792_vm2, %v1178_v20  ;;  %10852 = vmatpush3.xpose.msk.msra.mxu1 %vm1792_vm2, %v1309_v51 }
 0x23c   : > { %v10725_v54 = vpop.f32.mrb[6].mxu0  ;;  %v10745_v55 = vpop.f32.mrb[6].mxu1  ;;  %10847 = vmatpush3.xpose.msk.msra.mxu0 %vm1792_vm2, %v1304_v21  ;;  %10853 = vmatprep.mubr.msk.f32.mxu1 %vm11957_vm1, %v11956_v24 }
 0x23d   : > { %v1319_v58 = vadd.f32 %v10745_v55, %v9969_v25  ;;  %v1197_v60 = vpop.f32.mrb[7].mxu0  ;;  %v1313_v61 = vpop.f32.mrb[7].mxu1  ;;  %10848 = vmatprep.mubr.msk.f32.mxu0 %vm11957_vm1, %v11956_v24  ;;  %10861 = vmatprep.subr.mxu1 %v11956_v24  ;;  %v1203_v63 = vadd.f32 %v10725_v54, %v9960_v30 }
 0x23e   : > { %v1314_v62 = vadd.f32 %v9969_v25, %v1313_v61  ;;  %10854 = vmatmul.mubr.msk.f32.vlgmr.msra.gmra.mrb[28].mxu1 %vm1792_vm2, %v1193_v28  ;;  %10856 = vmatprep.subr.mxu0 %v11956_v24  ;;  %v1198_v29 = vadd.f32 %v9960_v30, %v1197_v60 }
 0x23f   : > { %10849 = vmatmul.mubr.msk.f32.vlgmr.msra.gmra.mrb[28].mxu0 %vm1792_vm2, %v1188_v56  ;;  %10862 = vmatpush3.xpose.msk.msra.mxu1 %vm1792_vm2, %v1319_v58 }
 0x240   : > { %v12429_v0 = vpop.f32.mrb[8].mxu0  ;;  %v10776_v1 = vpop.f32.mrb[8].mxu1  ;;  %10857 = vmatpush3.xpose.msk.msra.mxu0 %vm1792_vm2, %v1314_v62  ;;  %10863 = vmatprep.mubr.msk.f32.mxu1 %vm11957_vm1, %v11956_v24 }
 0x241   : > { %v12434_v38 = vpop.f32.mrb[9].mxu0  ;;  %v1517_v2 = vpop.f32.mrb[9].mxu1  ;;  %10858 = vmatprep.mubr.msk.f32.mxu0 %vm11957_vm1, %v11956_v24  ;;  %10871 = vmatprep.subr.mxu1 %v11956_v24  ;;  %v1523_v37 = vadd.f32 %v10776_v1, %v9992_v32 }
 0x242   : > { %10864 = vmatmul.mubr.msk.f32.vlgmr.msra.gmra.mrb[30].mxu1 %vm1792_vm2, %v1203_v63  ;;  %10866 = vmatprep.subr.mxu0 %v11956_v24  ;;  %v1518_v42 = vadd.f32 %v9992_v32, %v1517_v2  ;;  %v1405_v2 = vadd.f32 %v12429_v0, %v12447_v3 }
 0x243   : > { %10859 = vmatmul.mubr.msk.f32.vlgmr.msra.gmra.mrb[30].mxu0 %vm1792_vm2, %v1198_v29  ;;  %10873 = vmatprep.mubr.msk.f32.mxu1 %vm11957_vm1, %v11956_v24 }
 0x244   : > { %v10759_v4 = vpop.f32.mrb[10].mxu0  ;;  %v10779_v6 = vpop.f32.mrb[10].mxu1  ;;  %10868 = vmatprep.mubr.msk.f32.mxu0 %vm11957_vm1, %v11956_v24 }
 0x245   : > { %v12452_v8 = vadd.f32 %v10759_v4, %v12447_v3  ;;  %v1409_v11 = vpop.f32.mrb[11].mxu0  ;;  %v1527_v12 = vpop.f32.mrb[11].mxu1  ;;  %v1533_v50 = vadd.f32 %v10779_v6, %v9992_v32  ;;  %v1400_v6 = vadd.f32 %v12447_v3, %v12434_v38  ;;  %v9953_v38 = vld [vmem:[%s12541_s10 + $0x1] ss:$0 sm:$0xff] }
 0x246   : > { %v12455_v13 = vadd.f32 %v12447_v3, %v1409_v11  ;;  %v1528_v52 = vadd.f32 %v9992_v32, %v1527_v12 }
 0x248   : > { %v10762_v39 = vpop.f32.mrb[12].mxu0  ;;  %v10782_v7 = vpop.f32.mrb[12].mxu1 }
 0x249   : > { %v12458_v9 = vadd.f32 %v10762_v39, %v12447_v3  ;;  %v1419_v15 = vpop.f32.mrb[13].mxu0  ;;  %v1537_v16 = vpop.f32.mrb[13].mxu1  ;;  %v1543_v55 = vadd.f32 %v10782_v7, %v9992_v32  ;;  %v9952_v39 = vld [vmem:[%s12541_s10] ss:$0 sm:$0xff] }
 0x24a   : > { %v12461_v17 = vadd.f32 %v12447_v3, %v1419_v15  ;;  %v1538_v60 = vadd.f32 %v9992_v32, %v1537_v16 }
 0x24c   : > { %v10765_v18 = vpop.f32.mrb[14].mxu0  ;;  %v10785_v19 = vpop.f32.mrb[14].mxu1 }
 0x24d   : > { %v12464_v22 = vadd.f32 %v10765_v18, %v12447_v3  ;;  %v1429_v23 = vpop.f32.mrb[15].mxu0  ;;  %v1547_v25 = vpop.f32.mrb[15].mxu1  ;;  %v1553_v29 = vadd.f32 %v10785_v19, %v9992_v32 }
 0x24e   : > { %v12467_v26 = vadd.f32 %v12447_v3, %v1429_v23  ;;  %v1548_v4 = vadd.f32 %v9992_v32, %v1547_v25  ;;  %v12550_v23 = vld [vmem:[%s12541_s10 + $0x3] ss:$0 sm:$0xff] }
 0x250   : > { %v10796_v30 = vpop.f32.mrb[16].mxu0  ;;  %v12472_v31 = vpop.f32.mrb[16].mxu1 }
 0x251   : > { %v1641_v33 = vadd.f32 %v10796_v30, %v10006_v27  ;;  %v1635_v34 = vpop.f32.mrb[17].mxu0  ;;  %v12477_v35 = vpop.f32.mrb[17].mxu1 }
 0x252   : > { %v1636_v36 = vadd.f32 %v10006_v27, %v1635_v34 }
 0x253   : > { %10872 = vmatpush3.xpose.msk.msra.mxu1 %vm1792_vm2, %v1641_v33  ;;  %v9954_v33 = vld [vmem:[%s12541_s10 + $0x2] ss:$0 sm:$0xff] }
 0x254   : > { %v10799_v40 = vpop.f32.mrb[18].mxu0  ;;  %v12480_v41 = vpop.f32.mrb[18].mxu1  ;;  %10867 = vmatpush3.xpose.msk.msra.mxu0 %vm1792_vm2, %v1636_v36  ;;  %10881 = vmatprep.subr.mxu1 %v11956_v24 }
 0x255   : > { %v1651_v43 = vadd.f32 %v10799_v40, %v10006_v27  ;;  %v1645_v44 = vpop.f32.mrb[19].mxu0  ;;  %v12484_v45 = vpop.f32.mrb[19].mxu1  ;;  %10876 = vmatprep.subr.mxu0 %v11956_v24 }
 0x256   : > { %v1646_v46 = vadd.f32 %v10006_v27, %v1645_v44  ;;  %10874 = vmatmul.mubr.msk.f32.vlgmr.msra.gmra.mrb[32].mxu1 %vm1792_vm2, %v1523_v37  ;;  %v9957_v44 = vld [vmem:[%s12541_s10 + $0x5] ss:$0 sm:$0xff] }
 0x257   : > { %10869 = vmatmul.mubr.msk.f32.vlgmr.msra.gmra.mrb[32].mxu0 %vm1792_vm2, %v1518_v42  ;;  %10882 = vmatpush3.xpose.msk.msra.mxu1 %vm1792_vm2, %v1651_v43 }
 0x258   : > { %v10802_v20 = vpop.f32.mrb[20].mxu0  ;;  %v12490_v51 = vpop.f32.mrb[20].mxu1  ;;  %10877 = vmatpush3.xpose.msk.msra.mxu0 %vm1792_vm2, %v1646_v46  ;;  %10883 = vmatprep.mubr.msk.f32.mxu1 %vm11957_vm1, %v11956_v24 }
 0x259   : > { %v1661_v53 = vadd.f32 %v10802_v20, %v10006_v27  ;;  %v1655_v21 = vpop.f32.mrb[21].mxu0  ;;  %v12495_v28 = vpop.f32.mrb[21].mxu1  ;;  %10878 = vmatprep.mubr.msk.f32.mxu0 %vm11957_vm1, %v11956_v24  ;;  %10891 = vmatprep.subr.mxu1 %v11956_v24 }
 0x25a   : > { %v1656_v54 = vadd.f32 %v10006_v27, %v1655_v21  ;;  %10884 = vmatmul.mubr.msk.f32.vlgmr.msra.gmra.mrb[34].mxu1 %vm1792_vm2, %v1533_v50  ;;  %10886 = vmatprep.subr.mxu0 %v11956_v24 }
 0x25b   : > { %10879 = vmatmul.mubr.msk.f32.vlgmr.msra.gmra.mrb[34].mxu0 %vm1792_vm2, %v1528_v52  ;;  %10892 = vmatpush3.xpose.msk.msra.mxu1 %vm1792_vm2, %v1661_v53  ;;  %v9956_v53 = vld [vmem:[%s12541_s10 + $0x4] ss:$0 sm:$0xff] }
 0x25c   : > { %v10805_v56 = vpop.f32.mrb[22].mxu0  ;;  %v12504_v58 = vpop.f32.mrb[22].mxu1  ;;  %10887 = vmatpush3.xpose.msk.msra.mxu0 %vm1792_vm2, %v1656_v54  ;;  %10893 = vmatprep.mubr.msk.f32.mxu1 %vm11957_vm1, %v11956_v24 }
 0x25d   : > { %v1671_v61 = vadd.f32 %v10805_v56, %v10006_v27  ;;  %v1665_v62 = vpop.f32.mrb[23].mxu0  ;;  %v12509_v63 = vpop.f32.mrb[23].mxu1  ;;  %10888 = vmatprep.mubr.msk.f32.mxu0 %vm11957_vm1, %v11956_v24  ;;  %10901 = vmatprep.subr.mxu1 %v11956_v24 }
 0x25e   : > { %v1666_v1 = vadd.f32 %v10006_v27, %v1665_v62  ;;  %10894 = vmatmul.mubr.msk.f32.vlgmr.msra.gmra.mrb[36].mxu1 %vm1792_vm2, %v1543_v55  ;;  %10896 = vmatprep.subr.mxu0 %v11956_v24  ;;  %v9959_v62 = vld [vmem:[%s12541_s10 + $0x7] ss:$0 sm:$0xff] }
 0x25f   : > { %10889 = vmatmul.mubr.msk.f32.vlgmr.msra.gmra.mrb[36].mxu0 %vm1792_vm2, %v1538_v60  ;;  %10902 = vmatpush3.xpose.msk.msra.mxu1 %vm1792_vm2, %v1671_v61 }
 0x260   : > { %10897 = vmatpush3.xpose.msk.msra.mxu0 %vm1792_vm2, %v1666_v1  ;;  %10903 = vmatprep.mubr.msk.f32.mxu1 %vm11957_vm1, %v11956_v24 }
 0x261   : > { %10898 = vmatprep.mubr.msk.f32.mxu0 %vm11957_vm1, %v11956_v24  ;;  %10911 = vmatprep.subr.mxu1 %v11956_v24 }
 0x262   : > { %10904 = vmatmul.mubr.msk.f32.vlgmr.msra.gmra.mrb[38].mxu1 %vm1792_vm2, %v1553_v29  ;;  %10906 = vmatprep.subr.mxu0 %v11956_v24 }
 0x263   : > { %10899 = vmatmul.mubr.msk.f32.vlgmr.msra.gmra.mrb[38].mxu0 %vm1792_vm2, %v1548_v4  ;;  %10912 = vmatpush3.msra.mxu1 %v1405_v2 }
 0x264   : > { %10907 = vmatpush3.msra.mxu0 %v1400_v6  ;;  %10913 = vmatprep.mubr.msk.f32.mxu1 %vm11957_vm1, %v11956_v24  ;;  %v9958_v6 = vld [vmem:[%s12541_s10 + $0x6] ss:$0 sm:$0xff] }
 0x265   : > { %10921 = vmatprep.subr.mxu1 %v11956_v24  ;;  %10908 = vmatprep.mubr.msk.f32.mxu0 %vm11957_vm1, %v11956_v24 }
 0x266   : > { %10916 = vmatprep.subr.mxu0 %v11956_v24 }
 0x309   : > { %v1941_v0 = vpop.f32.mrb[24].mxu1 }
 0x30a   : > { %v3010_v3 = vmul.f32 0.25, %v1941_v0  ;;  %v1865_v11 = vpop.f32.mrb[24].mxu0  ;;  %v10835_v12 = vpop.f32.mrb[25].mxu1 }
 0x30b   : > { %v3009_v7 = vmul.f32 0.25, %v1865_v11  ;;  %v10830_v15 = vpop.f32.mrb[25].mxu0 }
 0x30c   : > { %v12545_v16 = vadd.f32 %v9953_v38, %v3010_v3 }
 0x30d   : > { %v2093_v18 = vpop.f32.mrb[26].mxu1  ;;  %v12547_v19 = vadd.f32 %v9952_v39, %v3009_v7 }
 0x30e   : > { %v3012_v25 = vmul.f32 0.25, %v2093_v18  ;;  %v2017_v27 = vpop.f32.mrb[26].mxu0  ;;  %v10845_v30 = vpop.f32.mrb[27].mxu1  ;;  %v3045_v32 = vsel %vm3041_vm3, %v12545_v16, -inf }
 0x30f   : > { %v3011_v34 = vmul.f32 0.25, %v2017_v27  ;;  %3046 = vmax.xlane.f32.xlu1 %v3045_v32  ;;  %v10840_v36 = vpop.f32.mrb[27].mxu0  ;;  %v3042_v37 = vsel %vm3041_vm3, %v12547_v19, -inf }
 0x310   : > { %3043 = vmax.xlane.f32.xlu0 %v3042_v37  ;;  %v12558_v40 = vadd.f32 %v12550_v23, %v3012_v25 }
 0x311   : > { %v2245_v42 = vpop.f32.mrb[28].mxu1  ;;  %v12560_v43 = vadd.f32 %v9954_v33, %v3011_v34 }
 0x312   : > { %v3014_v46 = vmul.f32 0.25, %v2245_v42  ;;  %v2169_v50 = vpop.f32.mrb[28].mxu0  ;;  %v10855_v20 = vpop.f32.mrb[29].mxu1  ;;  %v3051_v52 = vsel %vm3041_vm3, %v12558_v40, -inf }
 0x313   : > { %v3013_v21 = vmul.f32 0.25, %v2169_v50  ;;  %3052 = vmax.xlane.f32.xlu1 %v3051_v52  ;;  %v10850_v54 = vpop.f32.mrb[29].mxu0  ;;  %v3048_v55 = vsel %vm3041_vm3, %v12560_v43, -inf }
 0x314   : > { %3049 = vmax.xlane.f32.xlu0 %v3048_v55  ;;  %v12568_v56 = vadd.f32 %v9957_v44, %v3014_v46 }
 0x315   : > { %v2397_v60 = vpop.f32.mrb[30].mxu1  ;;  %v12570_v61 = vadd.f32 %v9956_v53, %v3013_v21 }
 0x316   : > { %v3016_v1 = vmul.f32 0.25, %v2397_v60  ;;  %v2321_v29 = vpop.f32.mrb[30].mxu0  ;;  %v10865_v2 = vpop.f32.mrb[31].mxu1  ;;  %v3057_v4 = vsel %vm3041_vm3, %v12568_v56, -inf }
 0x317   : > { %v3015_v0 = vmul.f32 0.25, %v2321_v29  ;;  %3058 = vmax.xlane.f32.xlu1 %v3057_v4  ;;  %v10860_v3 = vpop.f32.mrb[31].mxu0  ;;  %v3054_v11 = vsel %vm3041_vm3, %v12570_v61, -inf }
 0x318   : > { %3055 = vmax.xlane.f32.xlu0 %v3054_v11  ;;  %v12578_v12 = vadd.f32 %v9959_v62, %v3016_v1 }
 0x319   : > { %v12580_v7 = vadd.f32 %v9958_v6, %v3015_v0 }
 0x31a   : > { %v3063_v15 = vsel %vm3041_vm3, %v12578_v12, -inf }
 0x31b   : > { %3064 = vmax.xlane.f32.xlu1 %v3063_v15  ;;  %v3060_v18 = vsel %vm3041_vm3, %v12580_v7, -inf }
 0x31c   : > { %3061 = vmax.xlane.f32.xlu0 %v3060_v18 }
 0x329   : > { %v2549_v25 = vpop.f32.mrb[32].mxu1 }
 0x32a   : > { %v3018_v27 = vmul.f32 0.25, %v2549_v25  ;;  %v2473_v30 = vpop.f32.mrb[32].mxu0  ;;  %v10875_v32 = vpop.f32.mrb[33].mxu1 }
 0x32b   : > { %v3017_v34 = vmul.f32 0.25, %v2473_v30  ;;  %v10870_v36 = vpop.f32.mrb[33].mxu0 }
 0x32c   : > { %v12586_v37 = vadd.f32 %v9953_v38, %v3018_v27 }
 0x32d   : > { %v2701_v42 = vpop.f32.mrb[34].mxu1  ;;  %v12588_v46 = vadd.f32 %v9952_v39, %v3017_v34 }
 0x32e   : > { %v3020_v50 = vmul.f32 0.25, %v2701_v42  ;;  %v2625_v20 = vpop.f32.mrb[34].mxu0  ;;  %v10885_v52 = vpop.f32.mrb[35].mxu1  ;;  %v3069_v21 = vsel %vm3041_vm3, %v12586_v37, -inf }
 0x32f   : > { %v3019_v54 = vmul.f32 0.25, %v2625_v20  ;;  %3070 = vmax.xlane.f32.xlu1 %v3069_v21  ;;  %v10880_v55 = vpop.f32.mrb[35].mxu0  ;;  %v3066_v60 = vsel %vm3041_vm3, %v12588_v46, -inf }
 0x330   : > { %3067 = vmax.xlane.f32.xlu0 %v3066_v60  ;;  %v12595_v1 = vadd.f32 %v12550_v23, %v3020_v50 }
 0x331   : > { %v2853_v38 = vpop.f32.mrb[36].mxu1  ;;  %v12597_v29 = vadd.f32 %v9954_v33, %v3019_v54 }
 0x332   : > { %v3022_v39 = vmul.f32 0.25, %v2853_v38  ;;  %v2777_v2 = vpop.f32.mrb[36].mxu0  ;;  %v10895_v4 = vpop.f32.mrb[37].mxu1  ;;  %v3075_v0 = vsel %vm3041_vm3, %v12595_v1, -inf }
 0x333   : > { %v3021_v3 = vmul.f32 0.25, %v2777_v2  ;;  %3076 = vmax.xlane.f32.xlu1 %v3075_v0  ;;  %v10890_v11 = vpop.f32.mrb[37].mxu0  ;;  %v3072_v15 = vsel %vm3041_vm3, %v12597_v29, -inf }
 0x334   : > { %3073 = vmax.xlane.f32.xlu0 %v3072_v15  ;;  %v12603_v18 = vadd.f32 %v9957_v44, %v3022_v39 }
 0x335   : > { %v3005_v23 = vpop.f32.mrb[38].mxu1  ;;  %v12605_v25 = vadd.f32 %v9956_v53, %v3021_v3 }
 0x336   : > { %v3024_v33 = vmul.f32 0.25, %v3005_v23  ;;  %v2929_v27 = vpop.f32.mrb[38].mxu0  ;;  %v10905_v30 = vpop.f32.mrb[39].mxu1  ;;  %v3081_v32 = vsel %vm3041_vm3, %v12603_v18, -inf }
 0x337   : > { %v3023_v34 = vmul.f32 0.25, %v2929_v27  ;;  %3082 = vmax.xlane.f32.xlu1 %v3081_v32  ;;  %v10900_v36 = vpop.f32.mrb[39].mxu0  ;;  %v3078_v42 = vsel %vm3041_vm3, %v12605_v25, -inf }
 0x338   : > { %3079 = vmax.xlane.f32.xlu0 %v3078_v42  ;;  %v12611_v50 = vadd.f32 %v9959_v62, %v3024_v33 }
 0x339   : > { %v12613_v44 = vadd.f32 %v9958_v6, %v3023_v34 }
 0x33a   : > { %v3087_v53 = vsel %vm3041_vm3, %v12611_v50, -inf }
 0x33b   : > { %3088 = vmax.xlane.f32.xlu1 %v3087_v53  ;;  %v3084_v20 = vsel %vm3041_vm3, %v12613_v44, -inf }
 0x33c   : > { %3085 = vmax.xlane.f32.xlu0 %v3084_v20 }
 0x39c   : > { %v3047_v52 = vpop.xlane.xlu1 %3046 }
 0x39d   : > { %v3091_v21 = vsub.f32 %v12545_v16, %v3047_v52  ;;  %v3044_v54 = vpop.xlane.xlu0 %3043 }
 0x39e   : > { %v3090_v55 = vsub.f32 %v12547_v19, %v3044_v54 }
 0x39f   : > { %v3108_v60 = vmul.f32 1.442695, %v3091_v21 }
 0x3a0   : > { %v3106_v38 = vmul.f32 1.442695, %v3090_v55  ;;  %v3053_v62 = vpop.xlane.xlu1 %3052 }
 0x3a1   : > { %11710 = vpow2.f32 %v3108_v60  ;;  %v3093_v6 = vsub.f32 %v12558_v40, %v3053_v62  ;;  %v3050_v39 = vpop.xlane.xlu0 %3049 }
 0x3a2   : > { %11712 = vpow2.f32 %v3106_v38  ;;  %v3092_v2 = vsub.f32 %v12560_v43, %v3050_v39 }
 0x3a3   : > { %v3112_v4 = vmul.f32 1.442695, %v3093_v6 }
 0x3a4   : > { %v3110_v0 = vmul.f32 1.442695, %v3092_v2  ;;  %v3059_v3 = vpop.xlane.xlu1 %3058 }
 0x3a5   : > { %11714 = vpow2.f32 %v3112_v4  ;;  %v3095_v11 = vsub.f32 %v12568_v56, %v3059_v3  ;;  %v3056_v16 = vpop.xlane.xlu0 %3055 }
 0x3a6   : > { %11716 = vpow2.f32 %v3110_v0  ;;  %v3094_v19 = vsub.f32 %v12570_v61, %v3056_v16 }
 0x3a7   : > { %v3116_v15 = vmul.f32 1.442695, %v3095_v11 }
 0x3a8   : > { %v3114_v23 = vmul.f32 1.442695, %v3094_v19  ;;  %v3065_v33 = vpop.xlane.xlu1 %3064 }
 0x3a9   : > { %11718 = vpow2.f32 %v3116_v15  ;;  %v3097_v40 = vsub.f32 %v12578_v12, %v3065_v33  ;;  %v3062_v27 = vpop.xlane.xlu0 %3061 }
 0x3aa   : > { %11720 = vpow2.f32 %v3114_v23  ;;  %v3096_v43 = vsub.f32 %v12580_v7, %v3062_v27 }
 0x3ab   : > { %v12627_v30 = vpop.eup %11710  ;;  %v3120_v32 = vmul.f32 1.442695, %v3097_v40 }
 0x3ac   : > { %v12629_v34 = vpop.eup %11712  ;;  %v3118_v56 = vmul.f32 1.442695, %v3096_v43  ;;  %v3141_v36 = vsel %vm3041_vm3, %v12627_v30, 0.0 }
 0x3ad   : > { %11722 = vpow2.f32 %v3120_v32  ;;  %3142 = vadd.xlane.f32.xlu1 %v3141_v36  ;;  %v3138_v61 = vsel %vm3041_vm3, %v12629_v34, 0.0 }
 0x3ae   : > { %11724 = vpow2.f32 %v3118_v56  ;;  %3139 = vadd.xlane.f32.xlu0 %v3138_v61 }
 0x3af   : > { %v12635_v12 = vpop.eup %11714 }
 0x3b0   : > { %v12637_v42 = vpop.eup %11716  ;;  %v3147_v7 = vsel %vm3041_vm3, %v12635_v12, 0.0 }
 0x3b1   : > { %3148 = vadd.xlane.f32.xlu1 %v3147_v7  ;;  %v3144_v53 = vsel %vm3041_vm3, %v12637_v42, 0.0 }
 0x3b2   : > { %3145 = vadd.xlane.f32.xlu0 %v3144_v53 }
 0x3b3   : > { %v12643_v20 = vpop.eup %11718 }
 0x3b4   : > { %v12645_v52 = vpop.eup %11720  ;;  %v3153_v21 = vsel %vm3041_vm3, %v12643_v20, 0.0 }
 0x3b5   : > { %3154 = vadd.xlane.f32.xlu1 %v3153_v21  ;;  %v3150_v54 = vsel %vm3041_vm3, %v12645_v52, 0.0 }
 0x3b6   : > { %3151 = vadd.xlane.f32.xlu0 %v3150_v54 }
 0x3b7   : > { %v12651_v55 = vpop.eup %11722 }
 0x3b8   : > { %v12653_v60 = vpop.eup %11724  ;;  %v3159_v38 = vsel %vm3041_vm3, %v12651_v55, 0.0 }
 0x3b9   : > { %3160 = vadd.xlane.f32.xlu1 %v3159_v38  ;;  %v3156_v62 = vsel %vm3041_vm3, %v12653_v60, 0.0 }
 0x3ba   : > { %3157 = vadd.xlane.f32.xlu0 %v3156_v62 }
 0x3bc   : > { %v3071_v6 = vpop.xlane.xlu1 %3070 }
 0x3bd   : > { %v3099_v39 = vsub.f32 %v12586_v37, %v3071_v6  ;;  %v3068_v2 = vpop.xlane.xlu0 %3067 }
 0x3be   : > { %v3098_v4 = vsub.f32 %v12588_v46, %v3068_v2 }
 0x3bf   : > { %v3124_v0 = vmul.f32 1.442695, %v3099_v39 }
 0x3c0   : > { %v3122_v3 = vmul.f32 1.442695, %v3098_v4  ;;  %v3077_v11 = vpop.xlane.xlu1 %3076 }
 0x3c1   : > { %11726 = vpow2.f32 %v3124_v0  ;;  %v3101_v16 = vsub.f32 %v12595_v1, %v3077_v11  ;;  %v3074_v19 = vpop.xlane.xlu0 %3073 }
 0x3c2   : > { %11728 = vpow2.f32 %v3122_v3  ;;  %v3100_v15 = vsub.f32 %v12597_v29, %v3074_v19 }
 0x3c3   : > { %v3128_v23 = vmul.f32 1.442695, %v3101_v16 }
 0x3c4   : > { %v3126_v33 = vmul.f32 1.442695, %v3100_v15  ;;  %v3083_v40 = vpop.xlane.xlu1 %3082 }
 0x3c5   : > { %11730 = vpow2.f32 %v3128_v23  ;;  %v3103_v27 = vsub.f32 %v12603_v18, %v3083_v40  ;;  %v3080_v37 = vpop.xlane.xlu0 %3079 }
 0x3c6   : > { %11732 = vpow2.f32 %v3126_v33  ;;  %v3102_v46 = vsub.f32 %v12605_v25, %v3080_v37 }
 0x3c7   : > { %v3132_v43 = vmul.f32 1.442695, %v3103_v27 }
 0x3c8   : > { %v3130_v32 = vmul.f32 1.442695, %v3102_v46  ;;  %v3089_v56 = vpop.xlane.xlu1 %3088 }
 0x3c9   : > { %11734 = vpow2.f32 %v3132_v43  ;;  %v3105_v1 = vsub.f32 %v12611_v50, %v3089_v56  ;;  %v3086_v36 = vpop.xlane.xlu0 %3085 }
 0x3ca   : > { %11736 = vpow2.f32 %v3130_v32  ;;  %v3104_v29 = vsub.f32 %v12613_v44, %v3086_v36 }
 0x3cb   : > { %v12667_v61 = vpop.eup %11726  ;;  %v3136_v7 = vmul.f32 1.442695, %v3105_v1 }
 0x3cc   : > { %v12669_v53 = vpop.eup %11728  ;;  %v3134_v18 = vmul.f32 1.442695, %v3104_v29  ;;  %v3165_v21 = vsel %vm3041_vm3, %v12667_v61, 0.0 }
 0x3cd   : > { %11738 = vpow2.f32 %v3136_v7  ;;  %3166 = vadd.xlane.f32.xlu1 %v3165_v21  ;;  %v3162_v25 = vsel %vm3041_vm3, %v12669_v53, 0.0 }
 0x3ce   : > { %11740 = vpow2.f32 %v3134_v18  ;;  %3163 = vadd.xlane.f32.xlu0 %v3162_v25 }
 0x3cf   : > { %v12675_v50 = vpop.eup %11730 }
 0x3d0   : > { %v12677_v54 = vpop.eup %11732  ;;  %v3171_v44 = vsel %vm3041_vm3, %v12675_v50, 0.0 }
 0x3d1   : > { %3172 = vadd.xlane.f32.xlu1 %v3171_v44  ;;  %v3168_v38 = vsel %vm3041_vm3, %v12677_v54, 0.0 }
 0x3d2   : > { %3169 = vadd.xlane.f32.xlu0 %v3168_v38 }
 0x3d3   : > { %v12683_v62 = vpop.eup %11734 }
 0x3d4   : > { %v12685_v6 = vpop.eup %11736  ;;  %v3177_v39 = vsel %vm3041_vm3, %v12683_v62, 0.0 }
 0x3d5   : > { %3178 = vadd.xlane.f32.xlu1 %v3177_v39  ;;  %v3174_v2 = vsel %vm3041_vm3, %v12685_v6, 0.0 }
 0x3d6   : > { %3175 = vadd.xlane.f32.xlu0 %v3174_v2 }
 0x3d7   : > { %v12691_v4 = vpop.eup %11738 }
 0x3d8   : > { %v12693_v0 = vpop.eup %11740  ;;  %v3183_v3 = vsel %vm3041_vm3, %v12691_v4, 0.0 }
 0x3d9   : > { %3184 = vadd.xlane.f32.xlu1 %v3183_v3  ;;  %v3180_v11 = vsel %vm3041_vm3, %v12693_v0, 0.0 }
 0x3da   : > { %3181 = vadd.xlane.f32.xlu0 %v3180_v11 }
 0x43a   : > { %v3143_v16 = vpop.xlane.xlu1 %3142 }
 0x43b   : > { %11742 = vrcp.f32 %v3143_v16  ;;  %v3140_v19 = vpop.xlane.xlu0 %3139 }
 0x43c   : > { %11744 = vrcp.f32 %v3140_v19 }
 0x43e   : > { %v3149_v15 = vpop.xlane.xlu1 %3148 }
 0x43f   : > { %11746 = vrcp.f32 %v3149_v15  ;;  %v3146_v23 = vpop.xlane.xlu0 %3145 }
 0x440   : > { %11748 = vrcp.f32 %v3146_v23 }
 0x442   : > { %v3155_v33 = vpop.xlane.xlu1 %3154 }
 0x443   : > { %11750 = vrcp.f32 %v3155_v33  ;;  %v3152_v40 = vpop.xlane.xlu0 %3151 }
 0x444   : > { %11752 = vrcp.f32 %v3152_v40 }
 0x445   : > { %v11743_v27 = vpop.eup %11742 }
 0x446   : > { %v11745_v37 = vpop.eup %11744  ;;  %v3161_v46 = vpop.xlane.xlu1 %3160  ;;  %v3189_v43 = vmul.f32 %v11743_v27, %v12627_v30 }
 0x447   : > { %11754 = vrcp.f32 %v3161_v46  ;;  %v3158_v32 = vpop.xlane.xlu0 %3157  ;;  %v3187_v56 = vmul.f32 %v11745_v37, %v12629_v34  ;;  %v10087_v46 = vld [vmem:[%s14082_s12 + $0x18] sm:$0xff] }
 0x448   : > { %11756 = vrcp.f32 %v3158_v32  ;;  %10914 = vmatmul.mubr.msk.f32.vlgmr.msra.gmra.mrb[40].mxu1 %vm3041_vm3, %v3189_v43 }
 0x449   : > { %v11747_v1 = vpop.eup %11746  ;;  %10922 = vmatpush3.msra.mxu1 %v12452_v8  ;;  %10909 = vmatmul.mubr.msk.f32.vlgmr.msra.gmra.mrb[40].mxu0 %vm3041_vm3, %v3187_v56 }
 0x44a   : > { %v11749_v36 = vpop.eup %11748  ;;  %10917 = vmatpush3.msra.mxu0 %v12455_v13  ;;  %10923 = vmatprep.mubr.msk.f32.mxu1 %vm11957_vm1, %v11956_v24  ;;  %v3193_v30 = vmul.f32 %v11747_v1, %v12635_v12 }
 0x44b   : > { %10931 = vmatprep.subr.mxu1 %v11956_v24  ;;  %10918 = vmatprep.mubr.msk.f32.mxu0 %vm11957_vm1, %v11956_v24  ;;  %v3191_v34 = vmul.f32 %v11749_v36, %v12637_v42 }
 0x44c   : > { %10924 = vmatmul.mubr.msk.f32.vlgmr.msra.gmra.mrb[42].mxu1 %vm3041_vm3, %v3193_v30  ;;  %10926 = vmatprep.subr.mxu0 %v11956_v24 }
 0x44d   : > { %v11751_v8 = vpop.eup %11750  ;;  %10932 = vmatpush3.msra.mxu1 %v12458_v9  ;;  %10919 = vmatmul.mubr.msk.f32.vlgmr.msra.gmra.mrb[42].mxu0 %vm3041_vm3, %v3191_v34  ;;  %v12727_v9 = vld [vmem:[%s14129_s5 + $0x1] ss:$0 sm:$0xff] }
 0x44e   : > { %v11753_v13 = vpop.eup %11752  ;;  %10927 = vmatpush3.msra.mxu0 %v12461_v17  ;;  %10933 = vmatprep.mubr.msk.f32.mxu1 %vm11957_vm1, %v11956_v24  ;;  %v3197_v12 = vmul.f32 %v11751_v8, %v12643_v20  ;;  %v1759_v29 = vadd.f32 %v12472_v31, %v12727_v9  ;;  %v1754_v7 = vadd.f32 %v12727_v9, %v12477_v35 }
 0x44f   : > { %10941 = vmatprep.subr.mxu1 %v11956_v24  ;;  %10928 = vmatprep.mubr.msk.f32.mxu0 %vm11957_vm1, %v11956_v24  ;;  %v3195_v42 = vmul.f32 %v11753_v13, %v12645_v52  ;;  %v1769_v39 = vadd.f32 %v12480_v41, %v12727_v9  ;;  %v1764_v11 = vadd.f32 %v12727_v9, %v12484_v45 }
 0x450   : > { %10934 = vmatmul.mubr.msk.f32.vlgmr.msra.gmra.mrb[44].mxu1 %vm3041_vm3, %v3197_v12  ;;  %10936 = vmatprep.subr.mxu0 %v11956_v24  ;;  %v1789_v23 = vadd.f32 %v12504_v58, %v12727_v9  ;;  %v1784_v27 = vadd.f32 %v12727_v9, %v12509_v63 }
 0x451   : > { %v11755_v17 = vpop.eup %11754  ;;  %10942 = vmatpush3.msra.mxu1 %v12464_v22  ;;  %10929 = vmatmul.mubr.msk.f32.vlgmr.msra.gmra.mrb[44].mxu0 %vm3041_vm3, %v3195_v42 }
 0x452   : > { %v11757_v20 = vpop.eup %11756  ;;  %10937 = vmatpush3.msra.mxu0 %v12467_v26  ;;  %10943 = vmatprep.mubr.msk.f32.mxu1 %vm11957_vm1, %v11956_v24  ;;  %v3201_v52 = vmul.f32 %v11755_v17, %v12651_v55 }
 0x453   : > { %10951 = vmatprep.subr.mxu1 %v11956_v24  ;;  %10938 = vmatprep.mubr.msk.f32.mxu0 %vm11957_vm1, %v11956_v24  ;;  %v3199_v22 = vmul.f32 %v11757_v20, %v12653_v60 }
 0x454   : > { %10944 = vmatmul.mubr.msk.f32.vlgmr.msra.gmra.mrb[46].mxu1 %vm3041_vm3, %v3201_v52  ;;  %10946 = vmatprep.subr.mxu0 %v11956_v24 }
 0x455   : > { %10952 = vmatpush3.msra.mxu1 %v1759_v29  ;;  %10939 = vmatmul.mubr.msk.f32.vlgmr.msra.gmra.mrb[46].mxu0 %vm3041_vm3, %v3199_v22 }
 0x456   : > { %10947 = vmatpush3.msra.mxu0 %v1754_v7  ;;  %10953 = vmatprep.mubr.msk.f32.mxu1 %vm11957_vm1, %v11956_v24 }
 0x457   : > { %10961 = vmatprep.subr.mxu1 %v11956_v24  ;;  %10948 = vmatprep.mubr.msk.f32.mxu0 %vm11957_vm1, %v11956_v24 }
 0x458   : > { %10956 = vmatprep.subr.mxu0 %v11956_v24 }
 0x45a   : > { %v3167_v26 = vpop.xlane.xlu1 %3166 }
 0x45b   : > { %11758 = vrcp.f32 %v3167_v26  ;;  %v3164_v31 = vpop.xlane.xlu0 %3163 }
 0x45c   : > { %11760 = vrcp.f32 %v3164_v31 }
 0x45e   : > { %v3173_v35 = vpop.xlane.xlu1 %3172 }
 0x45f   : > { %11762 = vrcp.f32 %v3173_v35  ;;  %v3170_v55 = vpop.xlane.xlu0 %3169 }
 0x460   : > { %11764 = vrcp.f32 %v3170_v55 }
 0x462   : > { %v3179_v60 = vpop.xlane.xlu1 %3178 }
 0x463   : > { %11766 = vrcp.f32 %v3179_v60  ;;  %v3176_v18 = vpop.xlane.xlu0 %3175 }
 0x464   : > { %11768 = vrcp.f32 %v3176_v18 }
 0x465   : > { %v11759_v21 = vpop.eup %11758 }
 0x466   : > { %v11761_v25 = vpop.eup %11760  ;;  %v3185_v44 = vpop.xlane.xlu1 %3184  ;;  %v3205_v38 = vmul.f32 %v11759_v21, %v12667_v61  ;;  %v1779_v61 = vadd.f32 %v12490_v51, %v12727_v9  ;;  %v4388_v51 = vld [vmem:[%s14082_s12 + $0x8] sm:$0xff] }
 0x467   : > { %11770 = vrcp.f32 %v3185_v44  ;;  %v3182_v2 = vpop.xlane.xlu0 %3181  ;;  %v3203_v3 = vmul.f32 %v11761_v25, %v12669_v53  ;;  %v1774_v53 = vadd.f32 %v12727_v9, %v12495_v28 }
 0x468   : > { %11772 = vrcp.f32 %v3182_v2  ;;  %10954 = vmatmul.mubr.msk.f32.vlgmr.msra.gmra.mrb[48].mxu1 %vm3041_vm3, %v3205_v38 }
 0x469   : > { %v11763_v16 = vpop.eup %11762  ;;  %10962 = vmatpush3.msra.mxu1 %v1769_v39  ;;  %10949 = vmatmul.mubr.msk.f32.vlgmr.msra.gmra.mrb[48].mxu0 %vm3041_vm3, %v3203_v3 }
 0x46a   : > { %v11765_v19 = vpop.eup %11764  ;;  %10957 = vmatpush3.msra.mxu0 %v1764_v11  ;;  %10963 = vmatprep.mubr.msk.f32.mxu1 %vm11957_vm1, %v11956_v24  ;;  %v3209_v41 = vmul.f32 %v11763_v16, %v12675_v50  ;;  %v4387_v50 = vld [vmem:[%s14082_s12] sm:$0xff] }
 0x46b   : > { %10971 = vmatprep.subr.mxu1 %v11956_v24  ;;  %10958 = vmatprep.mubr.msk.f32.mxu0 %vm11957_vm1, %v11956_v24  ;;  %v3207_v45 = vmul.f32 %v11765_v19, %v12677_v54  ;;  %v11515_v40 = vpack.c.bf16 %v4388_v51, %v4387_v50  ;;  %v10085_v11 = vld [vmem:[%s14083_s13] ss:$0 sm:$0xff] }
 0x46c   : > { %10964 = vmatmul.mubr.msk.f32.vlgmr.msra.gmra.mrb[50].mxu1 %vm3041_vm3, %v3209_v41  ;;  %10966 = vmatprep.subr.mxu0 %v11956_v24 }
 0x46d   : > { %v11767_v15 = vpop.eup %11766  ;;  %10972 = vmatpush3.msra.mxu1 %v1779_v61  ;;  %10959 = vmatmul.mubr.msk.f32.vlgmr.msra.gmra.mrb[50].mxu0 %vm3041_vm3, %v3207_v45 }
 0x46e   : > { %v11769_v54 = vpop.eup %11768  ;;  %10967 = vmatpush3.msra.mxu0 %v1774_v53  ;;  %10973 = vmatprep.mubr.msk.f32.mxu1 %vm11957_vm1, %v11956_v24  ;;  %v3213_v28 = vmul.f32 %v11767_v15, %v12683_v62 }
 0x46f   : > { %10981 = vmatprep.subr.mxu1 %v11956_v24  ;;  %10968 = vmatprep.mubr.msk.f32.mxu0 %vm11957_vm1, %v11956_v24  ;;  %v3211_v33 = vmul.f32 %v11769_v54, %v12685_v6  ;;  %v10086_v6 = vld [vmem:[%s14082_s12 + $0x10] sm:$0xff] }
 0x470   : > { %10974 = vmatmul.mubr.msk.f32.vlgmr.msra.gmra.mrb[52].mxu1 %vm3041_vm3, %v3213_v28  ;;  %10976 = vmatprep.subr.mxu0 %v11956_v24 }
 0x471   : > { %v11771_v37 = vpop.eup %11770  ;;  %10982 = vmatpush3.msra.mxu1 %v1789_v23  ;;  %10969 = vmatmul.mubr.msk.f32.vlgmr.msra.gmra.mrb[52].mxu0 %vm3041_vm3, %v3211_v33 }
 0x472   : > { %v11773_v58 = vpop.eup %11772  ;;  %10977 = vmatpush3.msra.mxu0 %v1784_v27  ;;  %10983 = vmatprep.mubr.msk.f32.mxu1 %vm11957_vm1, %v11956_v24  ;;  %v3217_v62 = vmul.f32 %v11771_v37, %v12691_v4  ;;  %v11519_v4 = vpack.c.bf16 %v10087_v46, %v10086_v6 }
 0x473   : > { %10978 = vmatprep.mubr.msk.f32.mxu0 %vm11957_vm1, %v11956_v24  ;;  %v3215_v63 = vmul.f32 %v11773_v58, %v12693_v0  ;;  %11516 = vmatprep.subr.bf16.mxu0 %v11515_v40 }
 0x474   : > { %10984 = vmatmul.mubr.msk.f32.vlgmr.msra.gmra.mrb[54].mxu1 %vm3041_vm3, %v3217_v62 }
 0x475   : > { %10979 = vmatmul.mubr.msk.f32.vlgmr.msra.gmra.mrb[54].mxu0 %vm3041_vm3, %v3215_v63 }
 0x476   : > { %11518 = vmatpush3.bf16.msra.mxu0 %v11515_v40 }
 0x477   : > { %11520 = vmatprep.subr.bf16.mxu0 %v11519_v4 }
 0x51b   : > { %v3360_v43 = vpop.f32.mrb[40].mxu1 }
 0x51c   : > { %v3287_v32 = vpop.f32.mrb[40].mxu0  ;;  %v10915_v56 = vpop.f32.mrb[41].mxu1 }
 0x51d   : > { %v10910_v0 = vpop.f32.mrb[41].mxu0  ;;  %10990 = vmatprep.mubr.msk.f32.mxu0 %vm1792_vm2, %v3287_v32 }
 0x51e   : > { %10991 = vmatmul.mubr.msk.f32.vlgmr.msra.gmra.mrb[56].mxu0 %vm1792_vm2, %v3360_v43 }
 0x51f   : > { %v3506_v1 = vpop.f32.mrb[42].mxu1  ;;  %11522 = vmatpush3.bf16.msra.mxu0 %v11519_v4 }
 0x520   : > { %v3433_v36 = vpop.f32.mrb[42].mxu0  ;;  %v10925_v30 = vpop.f32.mrb[43].mxu1 }
 0x521   : > { %v10920_v34 = vpop.f32.mrb[43].mxu0  ;;  %10993 = vmatprep.mubr.msk.f32.mxu0 %vm1792_vm2, %v3433_v36 }
 0x522   : > { %10994 = vmatmul.mubr.msk.f32.gmra.mrb[58].mxu0 %vm1792_vm2, %v3506_v1 }
 0x523   : > { %v3652_v8 = vpop.f32.mrb[44].mxu1 }
 0x524   : > { %v3579_v13 = vpop.f32.mrb[44].mxu0  ;;  %v10935_v12 = vpop.f32.mrb[45].mxu1 }
 0x525   : > { %v10930_v42 = vpop.f32.mrb[45].mxu0  ;;  %10996 = vmatprep.mubr.msk.f32.mxu0 %vm1792_vm2, %v3579_v13 }
 0x526   : > { %10997 = vmatmul.mubr.msk.f32.gmra.mrb[60].mxu0 %vm1792_vm2, %v3652_v8 }
 0x527   : > { %v3798_v9 = vpop.f32.mrb[46].mxu1 }
 0x528   : > { %v3725_v17 = vpop.f32.mrb[46].mxu0  ;;  %v10945_v20 = vpop.f32.mrb[47].mxu1 }
 0x529   : > { %v10940_v52 = vpop.f32.mrb[47].mxu0  ;;  %10999 = vmatprep.mubr.msk.f32.mxu0 %vm1792_vm2, %v3725_v17 }
 0x52a   : > { %11000 = vmatmul.mubr.msk.f32.gmra.mrb[62].mxu0 %vm1792_vm2, %v3798_v9 }
 0x53b   : > { %v3944_v29 = vpop.f32.mrb[48].mxu1 }
 0x53c   : > { %v3871_v22 = vpop.f32.mrb[48].mxu0  ;;  %v10955_v7 = vpop.f32.mrb[49].mxu1 }
 0x53d   : > { %v10950_v26 = vpop.f32.mrb[49].mxu0  ;;  %11006 = vmatprep.mubr.msk.f32.mxu0 %vm1792_vm2, %v3871_v22 }
 0x53e   : > { %11007 = vmatmul.mubr.msk.f32.vlgmr.msra.gmra.mrb[56].mxu0 %vm1792_vm2, %v3944_v29 }
 0x53f   : > { %v4090_v31 = vpop.f32.mrb[50].mxu1 }
 0x540   : > { %v4017_v35 = vpop.f32.mrb[50].mxu0  ;;  %v10965_v55 = vpop.f32.mrb[51].mxu1 }
 0x541   : > { %v10960_v60 = vpop.f32.mrb[51].mxu0  ;;  %11009 = vmatprep.mubr.msk.f32.mxu0 %vm1792_vm2, %v4017_v35 }
 0x542   : > { %11010 = vmatmul.mubr.msk.f32.gmra.mrb[58].mxu0 %vm1792_vm2, %v4090_v31 }
 0x543   : > { %v4236_v18 = vpop.f32.mrb[52].mxu1 }
 0x544   : > { %v4163_v21 = vpop.f32.mrb[52].mxu0  ;;  %v10975_v25 = vpop.f32.mrb[53].mxu1 }
 0x545   : > { %v10970_v44 = vpop.f32.mrb[53].mxu0  ;;  %11012 = vmatprep.mubr.msk.f32.mxu0 %vm1792_vm2, %v4163_v21 }
 0x546   : > { %11013 = vmatmul.mubr.msk.f32.gmra.mrb[60].mxu0 %vm1792_vm2, %v4236_v18 }
 0x547   : > { %v4382_v38 = vpop.f32.mrb[54].mxu1 }
 0x548   : > { %v4309_v39 = vpop.f32.mrb[54].mxu0  ;;  %v10985_v2 = vpop.f32.mrb[55].mxu1 }
 0x549   : > { %v10980_v3 = vpop.f32.mrb[55].mxu0  ;;  %11015 = vmatprep.mubr.msk.f32.mxu0 %vm1792_vm2, %v4309_v39 }
 0x54a   : > { %11016 = vmatmul.mubr.msk.f32.gmra.mrb[62].mxu0 %vm1792_vm2, %v4382_v38 }
 0x611   : > { %v11008_v16 = vpop.f32.mrb[56].mxu0 }
 0x612   : > { %v11651_v19 = vadd.f32 %v11008_v16, %v10085_v11  ;;  %v4625_v41 = vpop.f32.mrb[57].mxu0 }
 0x613   : > { %v11652_v61 = vadd.f32 %v10085_v11, %v4625_v41 }
 0x614   : > { %v4673_v45 = vadd.f32 %v11651_v19, %v12242_v57 }
 0x615   : > { %v11011_v53 = vpop.f32.mrb[58].mxu0  ;;  %v4672_v50 = vadd.f32 %v11652_v61, %v12219_v47 }
 0x616   : > { %v11653_v51 = vadd.f32 %v11011_v53, %v10085_v11  ;;  %v4635_v15 = vpop.f32.mrb[59].mxu0  ;;  %v4685_v54 = vsel %vm876_vm0, %v4673_v45, 0.0 }
 0x617   : > { %v11654_v28 = vadd.f32 %v10085_v11, %v4635_v15  ;;  %4686 = vadd.xlane.f32.xlu1 %v4685_v54  ;;  %v4682_v23 = vsel %vm876_vm0, %v4672_v50, 0.0  ;;  %v4814_v54 = vld [vmem:[%s14086_s16] sm:$0xff] }
 0x618   : > { %4683 = vadd.xlane.f32.xlu0 %v4682_v23  ;;  %v4675_v33 = vadd.f32 %v11653_v51, %v12272_v5 }
 0x619   : > { %v11014_v40 = vpop.f32.mrb[60].mxu0  ;;  %v4674_v27 = vadd.f32 %v11654_v28, %v12246_v59  ;;  %v4815_v28 = vld [vmem:[%s14086_s16 + $0x8] sm:$0xff] }
 0x61a   : > { %v11655_v37 = vadd.f32 %v11014_v40, %v10085_v11  ;;  %v4645_v58 = vpop.f32.mrb[61].mxu0  ;;  %v4691_v57 = vsel %vm876_vm0, %v4675_v33, 0.0  ;;  %v11523_v23 = vpack.c.bf16 %v4815_v28, %v4814_v54  ;;  %v4817_v40 = vld [vmem:[%s14086_s16 + $0x18] sm:$0xff] }
 0x61b   : > { %v11656_v62 = vadd.f32 %v10085_v11, %v4645_v58  ;;  %4692 = vadd.xlane.f32.xlu1 %v4691_v57  ;;  %v4688_v47 = vsel %vm876_vm0, %v4674_v27, 0.0 }
 0x61c   : > { %4689 = vadd.xlane.f32.xlu0 %v4688_v47  ;;  %v4677_v63 = vadd.f32 %v11655_v37, %v12292_v48  ;;  %11524 = vmatprep.subr.bf16.mxu1 %v11523_v23 }
 0x61d   : > { %v11017_v6 = vpop.f32.mrb[62].mxu0  ;;  %v4676_v46 = vadd.f32 %v11656_v62, %v12278_v10  ;;  %11526 = vmatpush3.bf16.msra.mxu1 %v11523_v23 }
 0x61e   : > { %v11657_v4 = vadd.f32 %v11017_v6, %v10085_v11  ;;  %v4655_v43 = vpop.f32.mrb[63].mxu0  ;;  %v4697_v5 = vsel %vm876_vm0, %v4677_v63, 0.0 }
 0x61f   : > { %v11658_v32 = vadd.f32 %v10085_v11, %v4655_v43  ;;  %4698 = vadd.xlane.f32.xlu1 %v4697_v5  ;;  %v4694_v59 = vsel %vm876_vm0, %v4676_v46, 0.0 }
 0x620   : > { %4695 = vadd.xlane.f32.xlu0 %v4694_v59  ;;  %v4679_v56 = vadd.f32 %v11657_v4, %v12308_v49 }
 0x621   : > { %v4678_v0 = vadd.f32 %v11658_v32, %v12296_v14 }
 0x622   : > { %v4703_v1 = vsel %vm876_vm0, %v4679_v56, 0.0 }
 0x623   : > { %4704 = vadd.xlane.f32.xlu1 %v4703_v1  ;;  %v4700_v48 = vsel %vm876_vm0, %v4678_v0, 0.0 }
 0x624   : > { %4701 = vadd.xlane.f32.xlu0 %v4700_v48 }
 0x6a4   : > { %v4687_v10 = vpop.xlane.xlu1 %4686 }
 0x6a5   : > { %v4707_v36 = vmul.f32 0.03125, %v4687_v10  ;;  %v4684_v30 = vpop.xlane.xlu0 %4683 }
 0x6a6   : > { %v4706_v34 = vmul.f32 0.03125, %v4684_v30 }
 0x6a7   : > { %v12845_v8 = vsub.f32 %v4673_v45, %v4707_v36 }
 0x6a8   : > { %v12847_v13 = vsub.f32 %v4672_v50, %v4706_v34  ;;  %v4693_v12 = vpop.xlane.xlu1 %4692 }
 0x6a9   : > { %v4709_v42 = vmul.f32 0.03125, %v4693_v12  ;;  %v4690_v9 = vpop.xlane.xlu0 %4689  ;;  %v4723_v14 = vmul.f32 %v12845_v8, %v12845_v8 }
 0x6aa   : > { %v4708_v49 = vmul.f32 0.03125, %v4690_v9  ;;  %v4722_v17 = vmul.f32 %v12847_v13, %v12847_v13 }
 0x6ab   : > { %v12853_v20 = vsub.f32 %v4675_v33, %v4709_v42  ;;  %v4733_v52 = vsel %vm876_vm0, %v4723_v14, 0.0  ;;  %v4816_v33 = vld [vmem:[%s14086_s16 + $0x10] sm:$0xff]  ;;  %v10096_v14 = vld [vmem:[%s14084_s14] ss:$0 sm:$0xff] }
 0x6ac   : > { %v12856_v29 = vsub.f32 %v4674_v27, %v4708_v49  ;;  %v4699_v22 = vpop.xlane.xlu1 %4698  ;;  %4734 = vadd.xlane.f32.xlu1 %v4733_v52  ;;  %v4730_v7 = vsel %vm876_vm0, %v4722_v17, 0.0  ;;  %v11527_v27 = vpack.c.bf16 %v4817_v40, %v4816_v33  ;;  %v5028_v40 = vld [vmem:[%s14088_s18 + $0x10] sm:$0xff] }
 0x6ad   : > { %v4711_v26 = vmul.f32 0.03125, %v4699_v22  ;;  %v4696_v31 = vpop.xlane.xlu0 %4695  ;;  %4731 = vadd.xlane.f32.xlu0 %v4730_v7  ;;  %v4725_v35 = vmul.f32 %v12853_v20, %v12853_v20  ;;  %v10097_v7 = vld [vmem:[%s14085_s15] ss:$0 sm:$0xff] }
 0x6ae   : > { %v4710_v55 = vmul.f32 0.03125, %v4696_v31  ;;  %v4724_v60 = vmul.f32 %v12856_v29, %v12856_v29  ;;  %11528 = vmatprep.subr.bf16.mxu1 %v11527_v27 }
 0x6af   : > { %v12863_v18 = vsub.f32 %v4677_v63, %v4711_v26  ;;  %v4739_v21 = vsel %vm876_vm0, %v4725_v35, 0.0  ;;  %11530 = vmatpush3.bf16.msra.mxu1 %v11527_v27  ;;  %v5029_v27 = vld [vmem:[%s14088_s18 + $0x18] sm:$0xff] }
 0x6b0   : > { %v12866_v25 = vsub.f32 %v4676_v46, %v4710_v55  ;;  %4740 = vadd.xlane.f32.xlu1 %v4739_v21  ;;  %v4705_v44 = vpop.xlane.xlu1 %4704  ;;  %v4736_v38 = vsel %vm876_vm0, %v4724_v60, 0.0 }
 0x6b1   : > { %v4713_v39 = vmul.f32 0.03125, %v4705_v44  ;;  %4737 = vadd.xlane.f32.xlu0 %v4736_v38  ;;  %v4702_v2 = vpop.xlane.xlu0 %4701  ;;  %v4727_v3 = vmul.f32 %v12863_v18, %v12863_v18 }
 0x6b2   : > { %v4712_v11 = vmul.f32 0.03125, %v4702_v2  ;;  %v4726_v16 = vmul.f32 %v12866_v25, %v12866_v25 }
 0x6b3   : > { %v12873_v19 = vsub.f32 %v4679_v56, %v4713_v39  ;;  %v4745_v41 = vsel %vm876_vm0, %v4727_v3, 0.0 }
 0x6b4   : > { %v12876_v61 = vsub.f32 %v4678_v0, %v4712_v11  ;;  %4746 = vadd.xlane.f32.xlu1 %v4745_v41  ;;  %v4742_v45 = vsel %vm876_vm0, %v4726_v16, 0.0 }
 0x6b5   : > { %4743 = vadd.xlane.f32.xlu0 %v4742_v45  ;;  %v4729_v53 = vmul.f32 %v12873_v19, %v12873_v19 }
 0x6b6   : > { %v4728_v50 = vmul.f32 %v12876_v61, %v12876_v61 }
 0x6b7   : > { %v4751_v51 = vsel %vm876_vm0, %v4729_v53, 0.0 }
 0x6b8   : > { %4752 = vadd.xlane.f32.xlu1 %v4751_v51  ;;  %v4748_v15 = vsel %vm876_vm0, %v4728_v50, 0.0 }
 0x6b9   : > { %4749 = vadd.xlane.f32.xlu0 %v4748_v15 }
 0x739   : > { %v4735_v37 = vpop.xlane.xlu1 %4734 }
 0x73a   : > { %v4755_v58 = vmul.f32 0.03125, %v4735_v37  ;;  %v4732_v57 = vpop.xlane.xlu0 %4731  ;;  %v11535_v37 = vpack.c.bf16 %v5029_v27, %v5028_v40 }
 0x73b   : > { %v4754_v62 = vmul.f32 0.03125, %v4732_v57  ;;  %v5031_v57 = vld [vmem:[%s14088_s18 + $0x28] sm:$0xff] }
 0x73c   : > { %v4763_v47 = vadd.f32 1e-12, %v4755_v58  ;;  %v5030_v58 = vld [vmem:[%s14088_s18 + $0x20] sm:$0xff] }
 0x73d   : > { %v4762_v63 = vadd.f32 1e-12, %v4754_v62  ;;  %v4741_v6 = vpop.xlane.xlu1 %4740  ;;  %v11539_v62 = vpack.c.bf16 %v5031_v57, %v5030_v58 }
 0x73e   : > { %11774 = vrsqrt.f32 %v4763_v47  ;;  %v4757_v46 = vmul.f32 0.03125, %v4741_v6  ;;  %v4738_v4 = vpop.xlane.xlu0 %4737  ;;  %v5032_v47 = vld [vmem:[%s14088_s18 + $0x30] sm:$0xff] }
 0x73f   : > { %11776 = vrsqrt.f32 %v4762_v63  ;;  %v4756_v43 = vmul.f32 0.03125, %v4738_v4  ;;  %v5033_v63 = vld [vmem:[%s14088_s18 + $0x38] sm:$0xff] }
 0x740   : > { %v4765_v5 = vadd.f32 1e-12, %v4757_v46  ;;  %v11543_v6 = vpack.c.bf16 %v5033_v63, %v5032_v47  ;;  %v10098_v46 = vld [vmem:[%s14087_s17] ss:$0 sm:$0xff] }
 0x741   : > { %v4764_v32 = vadd.f32 1e-12, %v4756_v43  ;;  %v4747_v59 = vpop.xlane.xlu1 %4746 }
 0x742   : > { %11778 = vrsqrt.f32 %v4765_v5  ;;  %v4759_v56 = vmul.f32 0.03125, %v4747_v59  ;;  %v4744_v0 = vpop.xlane.xlu0 %4743 }
 0x743   : > { %11780 = vrsqrt.f32 %v4764_v32  ;;  %v4758_v1 = vmul.f32 0.03125, %v4744_v0 }
 0x744   : > { %v4767_v48 = vadd.f32 1e-12, %v4759_v56 }
 0x745   : > { %v4766_v10 = vadd.f32 1e-12, %v4758_v1  ;;  %v4753_v36 = vpop.xlane.xlu1 %4752 }
 0x746   : > { %11782 = vrsqrt.f32 %v4767_v48  ;;  %v4761_v30 = vmul.f32 0.03125, %v4753_v36  ;;  %v4750_v34 = vpop.xlane.xlu0 %4749 }
 0x747   : > { %11784 = vrsqrt.f32 %v4766_v10  ;;  %v4760_v12 = vmul.f32 0.03125, %v4750_v34 }
 0x748   : > { %v11775_v42 = vpop.eup %11774  ;;  %v4769_v9 = vadd.f32 1e-12, %v4761_v30 }
 0x749   : > { %v11777_v49 = vpop.eup %11776  ;;  %v4779_v17 = vmul.f32 %v11775_v42, %v12845_v8  ;;  %v4768_v52 = vadd.f32 1e-12, %v4760_v12 }
 0x74a   : > { %11786 = vrsqrt.f32 %v4769_v9  ;;  %v4778_v22 = vmul.f32 %v11777_v49, %v12847_v13 }
 0x74b   : > { %11788 = vrsqrt.f32 %v4768_v52  ;;  %v4793_v26 = vmul.f32 %v10096_v14, %v4779_v17 }
 0x74c   : > { %v11779_v31 = vpop.eup %11778  ;;  %v4792_v35 = vmul.f32 %v10096_v14, %v4778_v22 }
 0x74d   : > { %v11781_v55 = vpop.eup %11780  ;;  %v4781_v60 = vmul.f32 %v11779_v31, %v12853_v20  ;;  %v12909_v8 = vadd.f32 %v10097_v7, %v4793_v26 }
 0x74e   : > { %v12906_v21 = vadd.f32 %v10097_v7, %v4792_v35  ;;  %v4780_v44 = vmul.f32 %v11781_v55, %v12856_v29 }
 0x74f   : > { %v4795_v38 = vmul.f32 %v10096_v14, %v4781_v60 }
 0x750   : > { %v11783_v39 = vpop.eup %11782  ;;  %11026 = vmatprep.mubr.msk.f32.mxu1 %vm876_vm0, %v12906_v21  ;;  %v4794_v13 = vmul.f32 %v10096_v14, %v4780_v44 }
 0x751   : > { %v11785_v2 = vpop.eup %11784  ;;  %11027 = vmatmul.mubr.msk.f32.vlgmr.msra.gmra.mrb[56].mxu1 %vm876_vm0, %v12909_v8  ;;  %v4783_v3 = vmul.f32 %v11783_v39, %v12863_v18  ;;  %v12919_v16 = vadd.f32 %v10097_v7, %v4795_v38 }
 0x752   : > { %v12916_v11 = vadd.f32 %v10097_v7, %v4794_v13  ;;  %v4782_v20 = vmul.f32 %v11785_v2, %v12866_v25 }
 0x753   : > { %v4797_v29 = vmul.f32 %v10096_v14, %v4783_v3 }
 0x754   : > { %v11787_v41 = vpop.eup %11786  ;;  %11029 = vmatprep.mubr.msk.f32.mxu1 %vm876_vm0, %v12916_v11  ;;  %v4796_v45 = vmul.f32 %v10096_v14, %v4782_v20 }
 0x755   : > { %v11789_v53 = vpop.eup %11788  ;;  %11030 = vmatmul.mubr.msk.f32.gmra.mrb[58].mxu1 %vm876_vm0, %v12919_v16  ;;  %v4785_v50 = vmul.f32 %v11787_v41, %v12873_v19  ;;  %v12929_v15 = vadd.f32 %v10097_v7, %v4797_v29  ;;  %v5026_v19 = vld [vmem:[%s14088_s18] sm:$0xff] }
 0x756   : > { %v12926_v51 = vadd.f32 %v10097_v7, %v4796_v45  ;;  %v4784_v18 = vmul.f32 %v11789_v53, %v12876_v61  ;;  %v5027_v61 = vld [vmem:[%s14088_s18 + $0x8] sm:$0xff] }
 0x757   : > { %v4799_v25 = vmul.f32 %v10096_v14, %v4785_v50  ;;  %v11531_v33 = vpack.c.bf16 %v5027_v61, %v5026_v19 }
 0x758   : > { %11032 = vmatprep.mubr.msk.f32.mxu1 %vm876_vm0, %v12926_v51  ;;  %v4798_v54 = vmul.f32 %v10096_v14, %v4784_v18 }
 0x759   : > { %11033 = vmatmul.mubr.msk.f32.gmra.mrb[60].mxu1 %vm876_vm0, %v12929_v15  ;;  %v12937_v23 = vadd.f32 %v10097_v7, %v4799_v25  ;;  %11532 = vmatprep.subr.bf16.mxu1 %v11531_v33 }
 0x75a   : > { %v12935_v28 = vadd.f32 %v10097_v7, %v4798_v54  ;;  %11534 = vmatpush3.bf16.msra.mxu1 %v11531_v33 }
 0x75b   : > { %11536 = vmatprep.subr.bf16.mxu1 %v11535_v37 }
 0x75c   : > { %11035 = vmatprep.mubr.msk.f32.mxu1 %vm876_vm0, %v12935_v28 }
 0x75d   : > { %11036 = vmatmul.mubr.msk.f32.gmra.mrb[62].mxu1 %vm876_vm0, %v12937_v23 }
 0x75e   : > { %11538 = vmatpush3.bf16.msra.mxu1 %v11535_v37 }
 0x75f   : > { %11540 = vmatprep.subr.bf16.mxu1 %v11539_v62 }
 0x762   : > { %11542 = vmatpush3.bf16.msra.mxu1 %v11539_v62 }
 0x763   : > { %11544 = vmatprep.subr.bf16.mxu1 %v11543_v6 }
 0x766   : > { %11546 = vmatpush3.bf16.msra.mxu1 %v11543_v6 }
 0x824   : > { %v11028_v4 = vpop.f32.mrb[56].mxu1 }
 0x825   : > { %v12970_v43 = vadd.f32 %v11028_v4, %v10098_v46  ;;  %v4915_v5 = vpop.f32.mrb[57].mxu1 }
 0x826   : > { %v12972_v32 = vadd.f32 %v10098_v46, %v4915_v5 }
 0x827   : > { %v4955_v59 = vmul.f32 %v12970_v43, %v12970_v43 }
 0x828   : > { %v4954_v56 = vmul.f32 %v12972_v32, %v12972_v32  ;;  %v11031_v0 = vpop.f32.mrb[58].mxu1 }
 0x829   : > { %v4963_v1 = vmul.f32 %v4955_v59, %v12970_v43  ;;  %v12979_v48 = vadd.f32 %v11031_v0, %v10098_v46  ;;  %v4925_v10 = vpop.f32.mrb[59].mxu1 }
 0x82a   : > { %v4962_v36 = vmul.f32 %v4954_v56, %v12972_v32  ;;  %v12982_v30 = vadd.f32 %v10098_v46, %v4925_v10 }
 0x82b   : > { %v4971_v34 = vmul.f32 0.044715, %v4963_v1  ;;  %v4957_v12 = vmul.f32 %v12979_v48, %v12979_v48 }
 0x82c   : > { %v4970_v42 = vmul.f32 0.044715, %v4962_v36  ;;  %v4956_v9 = vmul.f32 %v12982_v30, %v12982_v30  ;;  %v11034_v14 = vpop.f32.mrb[60].mxu1 }
 0x82d   : > { %v4979_v49 = vadd.f32 %v4971_v34, %v12970_v43  ;;  %v4965_v17 = vmul.f32 %v4957_v12, %v12979_v48  ;;  %v12990_v52 = vadd.f32 %v11034_v14, %v10098_v46  ;;  %v4935_v22 = vpop.f32.mrb[61].mxu1 }
 0x82e   : > { %v4978_v7 = vadd.f32 %v4970_v42, %v12972_v32  ;;  %v4964_v26 = vmul.f32 %v4956_v9, %v12982_v30  ;;  %v12994_v31 = vadd.f32 %v10098_v46, %v4935_v22 }
 0x82f   : > { %v4987_v35 = vmul.f32 0.7978846, %v4979_v49  ;;  %v4973_v55 = vmul.f32 0.044715, %v4965_v17  ;;  %v4959_v60 = vmul.f32 %v12990_v52, %v12990_v52 }
 0x830   : > { %v4986_v44 = vmul.f32 0.7978846, %v4978_v7  ;;  %v4972_v38 = vmul.f32 0.044715, %v4964_v26  ;;  %v4958_v39 = vmul.f32 %v12994_v31, %v12994_v31  ;;  %v11037_v13 = vpop.f32.mrb[62].mxu1 }
 0x831   : > { %11790 = vtanh.f32 %v4987_v35  ;;  %v4981_v2 = vadd.f32 %v4973_v55, %v12979_v48  ;;  %v4967_v3 = vmul.f32 %v4959_v60, %v12990_v52  ;;  %v13002_v20 = vadd.f32 %v11037_v13, %v10098_v46  ;;  %v4945_v29 = vpop.f32.mrb[63].mxu1 }
 0x832   : > { %11792 = vtanh.f32 %v4986_v44  ;;  %v4980_v41 = vadd.f32 %v4972_v38, %v12982_v30  ;;  %v4966_v45 = vmul.f32 %v4958_v39, %v12994_v31  ;;  %v4946_v53 = vadd.f32 %v10098_v46, %v4945_v29 }
 0x833   : > { %v4989_v50 = vmul.f32 0.7978846, %v4981_v2  ;;  %v4975_v18 = vmul.f32 0.044715, %v4967_v3  ;;  %v4961_v25 = vmul.f32 %v13002_v20, %v13002_v20 }
 0x834   : > { %v4988_v54 = vmul.f32 0.7978846, %v4980_v41  ;;  %v4974_v19 = vmul.f32 0.044715, %v4966_v45  ;;  %v4960_v61 = vmul.f32 %v4946_v53, %v4946_v53 }
 0x835   : > { %11794 = vtanh.f32 %v4989_v50  ;;  %v4983_v33 = vadd.f32 %v4975_v18, %v12990_v52  ;;  %v4969_v40 = vmul.f32 %v4961_v25, %v13002_v20 }
 0x836   : > { %11796 = vtanh.f32 %v4988_v54  ;;  %v4982_v27 = vadd.f32 %v4974_v19, %v12994_v31  ;;  %v4968_v37 = vmul.f32 %v4960_v61, %v4946_v53 }
 0x837   : > { %v4991_v58 = vmul.f32 0.7978846, %v4983_v33  ;;  %v4977_v57 = vmul.f32 0.044715, %v4969_v40 }
 0x838   : > { %v4990_v62 = vmul.f32 0.7978846, %v4982_v27  ;;  %v4976_v47 = vmul.f32 0.044715, %v4968_v37 }
 0x839   : > { %11798 = vtanh.f32 %v4991_v58  ;;  %v4985_v63 = vadd.f32 %v4977_v57, %v13002_v20 }
 0x83a   : > { %11800 = vtanh.f32 %v4990_v62  ;;  %v4984_v6 = vadd.f32 %v4976_v47, %v4946_v53 }
 0x83b   : > { %v11791_v46 = vpop.eup %11790  ;;  %v4993_v4 = vmul.f32 0.7978846, %v4985_v63 }
 0x83c   : > { %v11793_v5 = vpop.eup %11792  ;;  %v5003_v59 = vadd.f32 1.0, %v11791_v46  ;;  %v4992_v56 = vmul.f32 0.7978846, %v4984_v6 }
 0x83d   : > { %11802 = vtanh.f32 %v4993_v4  ;;  %v5002_v0 = vadd.f32 1.0, %v11793_v5 }
 0x83e   : > { %v5011_v1 = vmul.f32 0.5, %v5003_v59  ;;  %11804 = vtanh.f32 %v4992_v56 }
 0x83f   : > { %v11795_v10 = vpop.eup %11794  ;;  %v5010_v36 = vmul.f32 0.5, %v5002_v0 }
 0x840   : > { %v11797_v34 = vpop.eup %11796  ;;  %v5005_v12 = vadd.f32 1.0, %v11795_v10  ;;  %v5019_v14 = vmul.f32 %v5011_v1, %v12970_v43 }
 0x841   : > { %v5018_v42 = vmul.f32 %v5010_v36, %v12972_v32  ;;  %v5004_v9 = vadd.f32 1.0, %v11797_v34 }
 0x842   : > { %v5013_v49 = vmul.f32 0.5, %v5005_v12 }
 0x843   : > { %v11799_v17 = vpop.eup %11798  ;;  %11054 = vmatprep.mubr.msk.f32.mxu1 %vm5041_vm4, %v5018_v42  ;;  %v5012_v22 = vmul.f32 0.5, %v5004_v9 }
 0x844   : > { %v11801_v7 = vpop.eup %11800  ;;  %11055 = vmatmul.mubr.msk.f32.vlgmr.msra.gmra.mrb[64].mxu1 %vm5041_vm4, %v5019_v14  ;;  %v5007_v26 = vadd.f32 1.0, %v11799_v17  ;;  %v5021_v60 = vmul.f32 %v5013_v49, %v12979_v48 }
 0x845   : > { %v5020_v35 = vmul.f32 %v5012_v22, %v12982_v30  ;;  %v5006_v55 = vadd.f32 1.0, %v11801_v7 }
 0x846   : > { %v5015_v44 = vmul.f32 0.5, %v5007_v26 }
 0x847   : > { %v11803_v38 = vpop.eup %11802  ;;  %11057 = vmatprep.mubr.msk.f32.mxu1 %vm5041_vm4, %v5020_v35  ;;  %v5014_v32 = vmul.f32 0.5, %v5006_v55 }
 0x848   : > { %v11805_v43 = vpop.eup %11804  ;;  %11058 = vmatmul.mubr.msk.f32.gmra.mrb[66].mxu1 %vm5041_vm4, %v5021_v60  ;;  %v5009_v39 = vadd.f32 1.0, %v11803_v38  ;;  %v5023_v3 = vmul.f32 %v5015_v44, %v12990_v52 }
 0x849   : > { %v5022_v13 = vmul.f32 %v5014_v32, %v12994_v31  ;;  %v5008_v2 = vadd.f32 1.0, %v11805_v43  ;;  %v10107_v31 = vld [vmem:[%s14089_s19] ss:$0 sm:$0xff] }
 0x84a   : > { %v5017_v29 = vmul.f32 0.5, %v5009_v39 }
 0x84b   : > { %11060 = vmatprep.mubr.msk.f32.mxu1 %vm5041_vm4, %v5022_v13  ;;  %v5016_v30 = vmul.f32 0.5, %v5008_v2 }
 0x84c   : > { %11061 = vmatmul.mubr.msk.f32.gmra.mrb[68].mxu1 %vm5041_vm4, %v5023_v3  ;;  %v5025_v41 = vmul.f32 %v5017_v29, %v13002_v20 }
 0x84d   : > { %v5024_v48 = vmul.f32 %v5016_v30, %v4946_v53 }
 0x84f   : > { %11063 = vmatprep.mubr.msk.f32.mxu1 %vm5041_vm4, %v5024_v48 }
 0x850   : > { %11064 = vmatmul.mubr.msk.f32.gmra.mrb[70].mxu1 %vm5041_vm4, %v5025_v41 }
 0x917   : > { %v11056_v45 = vpop.f32.mrb[64].mxu1 }
 0x918   : > { %v5138_v50 = vadd.f32 %v11056_v45, %v10107_v31  ;;  %v5132_v52 = vpop.f32.mrb[65].mxu1 }
 0x919   : > { %v5133_v18 = vadd.f32 %v10107_v31, %v5132_v52 }
 0x91a   : > { %v5172_v25 = vadd.f32 %v5138_v50, %v12909_v8 }
 0x91b   : > { %v11059_v54 = vpop.f32.mrb[66].mxu1  ;;  %v5171_v19 = vadd.f32 %v5133_v18, %v12906_v21 }
 0x91c   : > { %v5148_v53 = vadd.f32 %v11059_v54, %v10107_v31  ;;  %v5142_v61 = vpop.f32.mrb[67].mxu1  ;;  %v5184_v20 = vsel %vm876_vm0, %v5172_v25, 0.0 }
 0x91d   : > { %v5143_v33 = vadd.f32 %v10107_v31, %v5142_v61  ;;  %5185 = vadd.xlane.f32.xlu1 %v5184_v20  ;;  %v5181_v40 = vsel %vm876_vm0, %v5171_v19, 0.0  ;;  %v10118_v20 = vld [vmem:[%s14122_s1 + $0x40] sm:$0xff] }
 0x91e   : > { %5182 = vadd.xlane.f32.xlu0 %v5181_v40  ;;  %v5174_v27 = vadd.f32 %v5148_v53, %v12919_v16  ;;  %v10132_v40 = vld [vmem:[%s14123_s30 + $0x40] sm:$0xff] }
 0x91f   : > { %v11062_v37 = vpop.f32.mrb[68].mxu1  ;;  %v5173_v58 = vadd.f32 %v5143_v33, %v12916_v11  ;;  %v10119_v33 = vld [vmem:[%s14122_s1 + $0x48] sm:$0xff] }
 0x920   : > { %v5158_v57 = vadd.f32 %v11062_v37, %v10107_v31  ;;  %v5152_v62 = vpop.f32.mrb[69].mxu1  ;;  %v5190_v8 = vsel %vm876_vm0, %v5174_v27, 0.0  ;;  %v10133_v37 = vld [vmem:[%s14123_s30 + $0x48] sm:$0xff] }
 0x921   : > { %v5153_v47 = vadd.f32 %v10107_v31, %v5152_v62  ;;  %5191 = vadd.xlane.f32.xlu1 %v5190_v8  ;;  %v5187_v21 = vsel %vm876_vm0, %v5173_v58, 0.0  ;;  %v10121_v62 = vld [vmem:[%s14122_s1 + $0x58] sm:$0xff]  ;;  %v10134_v8 = vld [vmem:[%s14123_s30 + $0x50] sm:$0xff] }
 0x922   : > { %5188 = vadd.xlane.f32.xlu0 %v5187_v21  ;;  %v5176_v63 = vadd.f32 %v5158_v57, %v12929_v15  ;;  %v10120_v57 = vld [vmem:[%s14122_s1 + $0x50] sm:$0xff]  ;;  %v10135_v21 = vld [vmem:[%s14123_s30 + $0x58] sm:$0xff] }
 0x923   : > { %v11065_v6 = vpop.f32.mrb[70].mxu1  ;;  %v5175_v46 = vadd.f32 %v5153_v47, %v12926_v51  ;;  %v11551_v47 = vpack.c.bf16 %v10121_v62, %v10120_v57  ;;  %v10174_v57 = vld [vmem:[%s14123_s30 + $0x60] sm:$0xff]  ;;  %v10175_v62 = vld [vmem:[%s14123_s30 + $0x68] sm:$0xff] }
 0x924   : > { %v5168_v4 = vadd.f32 %v11065_v6, %v10107_v31  ;;  %v5162_v5 = vpop.f32.mrb[71].mxu1  ;;  %v5196_v16 = vsel %vm876_vm0, %v5176_v63, 0.0  ;;  %v10146_v6 = vld [vmem:[%s14124_s28 + $0x40] sm:$0xff] }
 0x925   : > { %v5163_v59 = vadd.f32 %v10107_v31, %v5162_v5  ;;  %5197 = vadd.xlane.f32.xlu1 %v5196_v16  ;;  %v5193_v11 = vsel %vm876_vm0, %v5175_v46, 0.0  ;;  %v10161_v16 = vld [vmem:[%s14122_s1 + $0x68] sm:$0xff] }
 0x926   : > { %5194 = vadd.xlane.f32.xlu0 %v5193_v11  ;;  %v5178_v56 = vadd.f32 %v5168_v4, %v12937_v23  ;;  %v10160_v4 = vld [vmem:[%s14122_s1 + $0x60] sm:$0xff] }
 0x927   : > { %v5177_v0 = vadd.f32 %v5163_v59, %v12935_v28  ;;  %v13124_v59 = vpack.c.bf16 %v10161_v16, %v10160_v4  ;;  %v11579_v4 = vpack.c.bf16 %v10175_v62, %v10174_v57 }
 0x928   : > { %v5202_v1 = vsel %vm876_vm0, %v5178_v56, 0.0 }
 0x929   : > { %5203 = vadd.xlane.f32.xlu1 %v5202_v1  ;;  %v5199_v15 = vsel %vm876_vm0, %v5177_v0, 0.0 }
 0x92a   : > { %5200 = vadd.xlane.f32.xlu0 %v5199_v15 }
 0x9aa   : > { %v5186_v51 = vpop.xlane.xlu1 %5185 }
 0x9ab   : > { %v5206_v10 = vmul.f32 0.03125, %v5186_v51  ;;  %v5183_v36 = vpop.xlane.xlu0 %5182 }
 0x9ac   : > { %v5205_v34 = vmul.f32 0.03125, %v5183_v36 }
 0x9ad   : > { %v13046_v12 = vsub.f32 %v5172_v25, %v5206_v10 }
 0x9ae   : > { %v13048_v42 = vsub.f32 %v5171_v19, %v5205_v34  ;;  %v5192_v9 = vpop.xlane.xlu1 %5191 }
 0x9af   : > { %v5208_v14 = vmul.f32 0.03125, %v5192_v9  ;;  %v5189_v49 = vpop.xlane.xlu0 %5188  ;;  %v5222_v28 = vmul.f32 %v13046_v12, %v13046_v12 }
 0x9b0   : > { %v5207_v23 = vmul.f32 0.03125, %v5189_v49  ;;  %v5221_v17 = vmul.f32 %v13048_v42, %v13048_v42 }
 0x9b1   : > { %v13054_v22 = vsub.f32 %v5174_v27, %v5208_v14  ;;  %v5232_v7 = vsel %vm876_vm0, %v5222_v28, 0.0  ;;  %v11547_v27 = vpack.c.bf16 %v10119_v33, %v10118_v20 }
 0x9b2   : > { %v13057_v26 = vsub.f32 %v5173_v58, %v5207_v23  ;;  %v5198_v35 = vpop.xlane.xlu1 %5197  ;;  %5233 = vadd.xlane.f32.xlu1 %v5232_v7  ;;  %v5229_v55 = vsel %vm876_vm0, %v5221_v17, 0.0  ;;  %v11555_v58 = vpack.c.bf16 %v10133_v37, %v10132_v40 }
 0x9b3   : > { %v5210_v60 = vmul.f32 0.03125, %v5198_v35  ;;  %v5195_v44 = vpop.xlane.xlu0 %5194  ;;  %5230 = vadd.xlane.f32.xlu0 %v5229_v55  ;;  %v5224_v38 = vmul.f32 %v13054_v22, %v13054_v22  ;;  %11548 = vmatprep.subr.bf16.mxu0 %v11547_v27 }
 0x9b4   : > { %v5209_v32 = vmul.f32 0.03125, %v5195_v44  ;;  %v5223_v43 = vmul.f32 %v13057_v26, %v13057_v26  ;;  %11550 = vmatpush3.bf16.msra.mxu0 %v11547_v27  ;;  %11556 = vmatprep.subr.bf16.mxu1 %v11555_v58 }
 0x9b5   : > { %v13064_v39 = vsub.f32 %v5176_v63, %v5210_v60  ;;  %v5238_v13 = vsel %vm876_vm0, %v5224_v38, 0.0  ;;  %11558 = vmatpush3.bf16.msra.mxu1 %v11555_v58  ;;  %v11559_v63 = vpack.c.bf16 %v10135_v21, %v10134_v8  ;;  %11552 = vmatprep.subr.bf16.mxu0 %v11551_v47 }
 0x9b6   : > { %v13067_v2 = vsub.f32 %v5175_v46, %v5209_v32  ;;  %5239 = vadd.xlane.f32.xlu1 %v5238_v13  ;;  %v5204_v3 = vpop.xlane.xlu1 %5203  ;;  %v5235_v29 = vsel %vm876_vm0, %v5223_v43, 0.0  ;;  %v10147_v46 = vld [vmem:[%s14124_s28 + $0x48] sm:$0xff]  ;;  %v10116_v13 = vld [vmem:[%s14090_s20] ss:$0 sm:$0xff] }
 0x9b7   : > { %v5212_v30 = vmul.f32 0.03125, %v5204_v3  ;;  %5236 = vadd.xlane.f32.xlu0 %v5235_v29  ;;  %v5201_v48 = vpop.xlane.xlu0 %5200  ;;  %v5226_v41 = vmul.f32 %v13064_v39, %v13064_v39  ;;  %11560 = vmatprep.subr.bf16.mxu1 %v11559_v63  ;;  %v13119_v5 = vpack.c.bf16 %v10147_v46, %v10146_v6 }
 0x9b8   : > { %v5211_v31 = vmul.f32 0.03125, %v5201_v48  ;;  %v5225_v45 = vmul.f32 %v13067_v2, %v13067_v2  ;;  %11554 = vmatpush3.bf16.msra.mxu0 %v11551_v47 }
 0x9b9   : > { %v13074_v50 = vsub.f32 %v5178_v56, %v5212_v30  ;;  %v5244_v52 = vsel %vm876_vm0, %v5226_v41, 0.0  ;;  %11562 = vmatpush3.bf16.msra.mxu1 %v11559_v63  ;;  %11564 = vmatprep.subr.bf16.mxu0 %v13119_v5 }
 0x9ba   : > { %v13077_v18 = vsub.f32 %v5177_v0, %v5211_v31  ;;  %5245 = vadd.xlane.f32.xlu1 %v5244_v52  ;;  %v5241_v25 = vsel %vm876_vm0, %v5225_v45, 0.0  ;;  %11572 = vmatprep.subr.bf16.mxu1 %v13124_v59  ;;  %v10117_v31 = vld [vmem:[%s14091_s21] ss:$0 sm:$0xff]  ;;  %v10148_v52 = vld [vmem:[%s14124_s28 + $0x50] sm:$0xff] }
 0x9bb   : > { %5242 = vadd.xlane.f32.xlu0 %v5241_v25  ;;  %v5228_v54 = vmul.f32 %v13074_v50, %v13074_v50 }
 0x9bc   : > { %v5227_v19 = vmul.f32 %v13077_v18, %v13077_v18 }
 0x9bd   : > { %v5250_v53 = vsel %vm876_vm0, %v5228_v54, 0.0 }
 0x9be   : > { %5251 = vadd.xlane.f32.xlu1 %v5250_v53  ;;  %v5247_v61 = vsel %vm876_vm0, %v5227_v19, 0.0  ;;  %v10163_v19 = vld [vmem:[%s14122_s1 + $0x78] sm:$0xff] }
 0x9bf   : > { %5248 = vadd.xlane.f32.xlu0 %v5247_v61 }
 0xa3f   : > { %v5234_v11 = vpop.xlane.xlu1 %5233 }
 0xa40   : > { %v5254_v56 = vmul.f32 0.03125, %v5234_v11  ;;  %v5231_v0 = vpop.xlane.xlu0 %5230 }
 0xa41   : > { %v5253_v1 = vmul.f32 0.03125, %v5231_v0 }
 0xa42   : > { %v5262_v15 = vadd.f32 1e-12, %v5254_v56 }
 0xa43   : > { %v5261_v51 = vadd.f32 1e-12, %v5253_v1  ;;  %v5240_v10 = vpop.xlane.xlu1 %5239 }
 0xa44   : > { %11806 = vrsqrt.f32 %v5262_v15  ;;  %v5256_v36 = vmul.f32 0.03125, %v5240_v10  ;;  %v5237_v34 = vpop.xlane.xlu0 %5236 }
 0xa45   : > { %11808 = vrsqrt.f32 %v5261_v51  ;;  %v5255_v9 = vmul.f32 0.03125, %v5237_v34  ;;  %v10177_v34 = vld [vmem:[%s14123_s30 + $0x78] sm:$0xff] }
 0xa46   : > { %v5264_v14 = vadd.f32 1e-12, %v5256_v36  ;;  %v10176_v36 = vld [vmem:[%s14123_s30 + $0x70] sm:$0xff] }
 0xa47   : > { %v5263_v49 = vadd.f32 1e-12, %v5255_v9  ;;  %v5246_v28 = vpop.xlane.xlu1 %5245  ;;  %v10190_v9 = vld [vmem:[%s14124_s28 + $0x70] sm:$0xff] }
 0xa48   : > { %11810 = vrsqrt.f32 %v5264_v14  ;;  %v5258_v23 = vmul.f32 0.03125, %v5246_v28  ;;  %v5243_v17 = vpop.xlane.xlu0 %5242  ;;  %v10191_v14 = vld [vmem:[%s14124_s28 + $0x78] sm:$0xff] }
 0xa49   : > { %11812 = vrsqrt.f32 %v5263_v49  ;;  %v5257_v7 = vmul.f32 0.03125, %v5243_v17  ;;  %v11583_v49 = vpack.c.bf16 %v10177_v34, %v10176_v36  ;;  %v11591_v28 = vpack.c.bf16 %v10191_v14, %v10190_v9 }
 0xa4a   : > { %v5266_v35 = vadd.f32 1e-12, %v5258_v23  ;;  %v10137_v23 = vld [vmem:[%s14127_s29 + $0x2] ss:$0 sm:$0xff] }
 0xa4b   : > { %v5265_v55 = vadd.f32 1e-12, %v5257_v7  ;;  %v5252_v60 = vpop.xlane.xlu1 %5251 }
 0xa4c   : > { %11814 = vrsqrt.f32 %v5266_v35  ;;  %v5260_v44 = vmul.f32 0.03125, %v5252_v60  ;;  %v5249_v38 = vpop.xlane.xlu0 %5248  ;;  %v13304_v60 = vld [vmem:[%s14128_s2 + $0x2] ss:$0 sm:$0xff] }
 0xa4d   : > { %11816 = vrsqrt.f32 %v5265_v55  ;;  %v5259_v32 = vmul.f32 0.03125, %v5249_v38 }
 0xa4e   : > { %v11807_v43 = vpop.eup %11806  ;;  %v5268_v3 = vadd.f32 1e-12, %v5260_v44 }
 0xa4f   : > { %v11809_v29 = vpop.eup %11808  ;;  %v5278_v30 = vmul.f32 %v11807_v43, %v13046_v12  ;;  %v5267_v48 = vadd.f32 1e-12, %v5259_v32  ;;  %v10149_v12 = vld [vmem:[%s14124_s28 + $0x58] sm:$0xff] }
 0xa50   : > { %v5277_v41 = vmul.f32 %v11809_v29, %v13048_v42  ;;  %11818 = vrsqrt.f32 %v5268_v3  ;;  %v10162_v42 = vld [vmem:[%s14122_s1 + $0x70] sm:$0xff]  ;;  %v11567_v37 = vpack.c.bf16 %v10149_v12, %v10148_v52 }
 0xa51   : > { %v5292_v45 = vmul.f32 %v10116_v13, %v5278_v30  ;;  %11820 = vrsqrt.f32 %v5267_v48  ;;  %v11575_v58 = vpack.c.bf16 %v10163_v19, %v10162_v42 }
 0xa52   : > { %v11811_v25 = vpop.eup %11810  ;;  %v5291_v54 = vmul.f32 %v10116_v13, %v5277_v41 }
 0xa53   : > { %v11813_v53 = vpop.eup %11812  ;;  %v5280_v61 = vmul.f32 %v11811_v25, %v13054_v22  ;;  %v13152_v40 = vadd.f32 %v10117_v31, %v5292_v45  ;;  %v10188_v22 = vld [vmem:[%s14124_s28 + $0x60] sm:$0xff] }
 0xa54   : > { %v13149_v20 = vadd.f32 %v10117_v31, %v5291_v54  ;;  %v5279_v33 = vmul.f32 %v11813_v53, %v13057_v26  ;;  %v10189_v26 = vld [vmem:[%s14124_s28 + $0x68] sm:$0xff] }
 0xa55   : > { %v5294_v27 = vmul.f32 %v10116_v13, %v5280_v61 }
 0xa56   : > { %v11815_v8 = vpop.eup %11814  ;;  %v5293_v47 = vmul.f32 %v10116_v13, %v5279_v33  ;;  %11074 = vmatprep.mubr.msk.f32.mxu0 %vm876_vm0, %v13149_v20  ;;  %11094 = vmatprep.mubr.msk.f32.mxu1 %vm876_vm0, %v13149_v20 }
 0xa57   : > { %v11817_v21 = vpop.eup %11816  ;;  %v5282_v63 = vmul.f32 %v11815_v8, %v13064_v39  ;;  %11075 = vmatmul.mubr.msk.f32.vlgmr.msra.gmra.mrb[64].mxu0 %vm876_vm0, %v13152_v40  ;;  %11095 = vmatmul.mubr.msk.f32.vlgmr.msra.gmra.mrb[72].mxu1 %vm876_vm0, %v13152_v40  ;;  %v13180_v16 = vadd.f32 %v10117_v31, %v5294_v27  ;;  %v11587_v39 = vpack.c.bf16 %v10189_v26, %v10188_v22 }
 0xa58   : > { %v13175_v6 = vadd.f32 %v10117_v31, %v5293_v47  ;;  %v5281_v46 = vmul.f32 %v11817_v21, %v13067_v2  ;;  %11566 = vmatpush3.bf16.msra.mxu0 %v13119_v5  ;;  %11574 = vmatpush3.bf16.msra.mxu1 %v13124_v59 }
 0xa59   : > { %v5296_v11 = vmul.f32 %v10116_v13, %v5282_v63  ;;  %11568 = vmatprep.subr.bf16.mxu0 %v11567_v37  ;;  %11576 = vmatprep.subr.bf16.mxu1 %v11575_v58  ;;  %v13351_v63 = vld [vmem:[%s14129_s5 + $0x2] ss:$0 sm:$0xff] }
 0xa5a   : > { %v11819_v56 = vpop.eup %11818  ;;  %v5295_v0 = vmul.f32 %v10116_v13, %v5281_v46  ;;  %11077 = vmatprep.mubr.msk.f32.mxu0 %vm876_vm0, %v13175_v6  ;;  %11097 = vmatprep.mubr.msk.f32.mxu1 %vm876_vm0, %v13175_v6 }
 0xa5b   : > { %v11821_v2 = vpop.eup %11820  ;;  %v5284_v5 = vmul.f32 %v11819_v56, %v13074_v50  ;;  %11078 = vmatmul.mubr.msk.f32.gmra.mrb[66].mxu0 %vm876_vm0, %v13180_v16  ;;  %11098 = vmatmul.mubr.msk.f32.gmra.mrb[74].mxu1 %vm876_vm0, %v13180_v16  ;;  %v13194_v15 = vadd.f32 %v10117_v31, %v5296_v11 }
 0xa5c   : > { %v13191_v59 = vadd.f32 %v10117_v31, %v5295_v0  ;;  %v5283_v1 = vmul.f32 %v11821_v2, %v13077_v18  ;;  %11570 = vmatpush3.bf16.msra.mxu0 %v11567_v37  ;;  %11578 = vmatpush3.bf16.msra.mxu1 %v11575_v58 }
 0xa5d   : > { %v5298_v51 = vmul.f32 %v10116_v13, %v5284_v5  ;;  %11580 = vmatprep.subr.bf16.mxu0 %v11579_v4  ;;  %11588 = vmatprep.subr.bf16.mxu1 %v11587_v39 }
 0xa5e   : > { %v5297_v10 = vmul.f32 %v10116_v13, %v5283_v1  ;;  %11080 = vmatprep.mubr.msk.f32.mxu0 %vm876_vm0, %v13191_v59  ;;  %11100 = vmatprep.mubr.msk.f32.mxu1 %vm876_vm0, %v13191_v59 }
 0xa5f   : > { %11081 = vmatmul.mubr.msk.f32.gmra.mrb[68].mxu0 %vm876_vm0, %v13194_v15  ;;  %11101 = vmatmul.mubr.msk.f32.gmra.mrb[76].mxu1 %vm876_vm0, %v13194_v15  ;;  %v13206_v18 = vadd.f32 %v10117_v31, %v5298_v51 }
 0xa60   : > { %v13204_v50 = vadd.f32 %v10117_v31, %v5297_v10 }
 0xa62   : > { %11083 = vmatprep.mubr.msk.f32.mxu0 %vm876_vm0, %v13204_v50  ;;  %11103 = vmatprep.mubr.msk.f32.mxu1 %vm876_vm0, %v13204_v50 }
 0xa63   : > { %11084 = vmatmul.mubr.msk.f32.gmra.mrb[70].mxu0 %vm876_vm0, %v13206_v18  ;;  %11104 = vmatmul.mubr.msk.f32.gmra.mrb[78].mxu1 %vm876_vm0, %v13206_v18 }
 0xa64   : > { %11114 = vmatprep.mubr.msk.f32.mxu0 %vm876_vm0, %v13149_v20  ;;  %11134 = vmatprep.mubr.msk.f32.mxu1 %vm876_vm0, %v13149_v20 }
 0xa67   : > { %11115 = vmatmul.mubr.msk.f32.vlgmr.msra.gmra.mrb[72].mxu0 %vm876_vm0, %v13152_v40  ;;  %11135 = vmatmul.mubr.msk.f32.vlgmr.msra.gmra.mrb[80].mxu1 %vm876_vm0, %v13152_v40 }
 0xa68   : > { %11117 = vmatprep.mubr.msk.f32.mxu0 %vm876_vm0, %v13175_v6  ;;  %11137 = vmatprep.mubr.msk.f32.mxu1 %vm876_vm0, %v13175_v6 }
 0xa69   : > { %11582 = vmatpush3.bf16.msra.mxu0 %v11579_v4  ;;  %11590 = vmatpush3.bf16.msra.mxu1 %v11587_v39 }
 0xa6a   : > { %11584 = vmatprep.subr.bf16.mxu0 %v11583_v49  ;;  %11592 = vmatprep.subr.bf16.mxu1 %v11591_v28 }
 0xa6b   : > { %11118 = vmatmul.mubr.msk.f32.gmra.mrb[74].mxu0 %vm876_vm0, %v13180_v16  ;;  %11138 = vmatmul.mubr.msk.f32.gmra.mrb[82].mxu1 %vm876_vm0, %v13180_v16 }
 0xa6c   : > { %11120 = vmatprep.mubr.msk.f32.mxu0 %vm876_vm0, %v13191_v59  ;;  %11140 = vmatprep.mubr.msk.f32.mxu1 %vm876_vm0, %v13191_v59 }
 0xa6d   : > { %11586 = vmatpush3.bf16.msra.mxu0 %v11583_v49  ;;  %11594 = vmatpush3.bf16.msra.mxu1 %v11591_v28 }
 0xa6e   : > { %11186 = vmatprep.subr.mxu0 %v11956_v24  ;;  %11196 = vmatprep.subr.mxu1 %v11956_v24 }
 0xa6f   : > { %11121 = vmatmul.mubr.msk.f32.gmra.mrb[76].mxu0 %vm876_vm0, %v13194_v15  ;;  %11141 = vmatmul.mubr.msk.f32.gmra.mrb[84].mxu1 %vm876_vm0, %v13194_v15 }
 0xa70   : > { %11123 = vmatprep.mubr.msk.f32.mxu0 %vm876_vm0, %v13204_v50  ;;  %11143 = vmatprep.mubr.msk.f32.mxu1 %vm876_vm0, %v13204_v50 }
 0xa73   : > { %11124 = vmatmul.mubr.msk.f32.gmra.mrb[78].mxu0 %vm876_vm0, %v13206_v18  ;;  %11144 = vmatmul.mubr.msk.f32.gmra.mrb[86].mxu1 %vm876_vm0, %v13206_v18 }
 0xa74   : > { %11154 = vmatprep.mubr.msk.f32.mxu0 %vm876_vm0, %v13149_v20  ;;  %11174 = vmatprep.mubr.msk.f32.mxu1 %vm876_vm0, %v13149_v20 }
 0xa77   : > { %11155 = vmatmul.mubr.msk.f32.vlgmr.msra.gmra.mrb[80].mxu0 %vm876_vm0, %v13152_v40  ;;  %11175 = vmatmul.mubr.msk.f32.vlgmr.msra.gmra.mrb[88].mxu1 %vm876_vm0, %v13152_v40 }
 0xa78   : > { %11157 = vmatprep.mubr.msk.f32.mxu0 %vm876_vm0, %v13175_v6  ;;  %11177 = vmatprep.mubr.msk.f32.mxu1 %vm876_vm0, %v13175_v6 }
 0xa7b   : > { %11158 = vmatmul.mubr.msk.f32.gmra.mrb[82].mxu0 %vm876_vm0, %v13180_v16  ;;  %11178 = vmatmul.mubr.msk.f32.gmra.mrb[90].mxu1 %vm876_vm0, %v13180_v16 }
 0xa7c   : > { %11160 = vmatprep.mubr.msk.f32.mxu0 %vm876_vm0, %v13191_v59  ;;  %11180 = vmatprep.mubr.msk.f32.mxu1 %vm876_vm0, %v13191_v59 }
 0xa7f   : > { %11161 = vmatmul.mubr.msk.f32.gmra.mrb[84].mxu0 %vm876_vm0, %v13194_v15  ;;  %11181 = vmatmul.mubr.msk.f32.gmra.mrb[92].mxu1 %vm876_vm0, %v13194_v15 }
 0xa80   : > { %11163 = vmatprep.mubr.msk.f32.mxu0 %vm876_vm0, %v13204_v50  ;;  %11183 = vmatprep.mubr.msk.f32.mxu1 %vm876_vm0, %v13204_v50 }
 0xa83   : > { %11164 = vmatmul.mubr.msk.f32.gmra.mrb[86].mxu0 %vm876_vm0, %v13206_v18  ;;  %11184 = vmatmul.mubr.msk.f32.gmra.mrb[94].mxu1 %vm876_vm0, %v13206_v18 }
 0xa84   : > { %11188 = vmatprep.mubr.msk.f32.mxu0 %vm11957_vm1, %v11956_v24  ;;  %11198 = vmatprep.mubr.msk.f32.mxu1 %vm11957_vm1, %v11956_v24 }
 0xb2a   : > { %v11076_v17 = vpop.f32.mrb[64].mxu0  ;;  %v11096_v7 = vpop.f32.mrb[72].mxu1 }
 0xb2b   : > { %v5416_v35 = vpop.f32.mrb[65].mxu0  ;;  %v5534_v55 = vpop.f32.mrb[73].mxu1  ;;  %v5540_v29 = vadd.f32 %v11096_v7, %v10137_v23  ;;  %v5422_v31 = vadd.f32 %v11076_v17, %v13304_v60  ;;  %v10179_v7 = vld [vmem:[%s14127_s29 + $0x3] ss:$0 sm:$0xff] }
 0xb2c   : > { %v5535_v44 = vadd.f32 %v10137_v23, %v5534_v55  ;;  %v5417_v43 = vadd.f32 %v13304_v60, %v5416_v35 }
 0xb2e   : > { %v11079_v38 = vpop.f32.mrb[66].mxu0  ;;  %v11099_v32 = vpop.f32.mrb[74].mxu1  ;;  %11187 = vmatpush3.xpose.msk.msra.mxu0 %vm1792_vm2, %v5535_v44 }
 0xb2f   : > { %v5426_v13 = vpop.f32.mrb[67].mxu0  ;;  %v5544_v3 = vpop.f32.mrb[75].mxu1  ;;  %11191 = vmatprep.subr.mxu0 %v11956_v24  ;;  %v5550_v54 = vadd.f32 %v11099_v32, %v10137_v23  ;;  %v5432_v53 = vadd.f32 %v11079_v38, %v13304_v60 }
 0xb30   : > { %v5545_v30 = vadd.f32 %v10137_v23, %v5544_v3  ;;  %v5427_v45 = vadd.f32 %v13304_v60, %v5426_v13 }
 0xb31   : > { %11189 = vmatmul.mubr.msk.f32.vlgmr.msra.gmra.mrb[88].mxu0 %vm1792_vm2, %v5417_v43 }
 0xb32   : > { %v11082_v48 = vpop.f32.mrb[68].mxu0  ;;  %v11102_v41 = vpop.f32.mrb[76].mxu1  ;;  %11192 = vmatpush3.xpose.msk.msra.mxu0 %vm1792_vm2, %v5540_v29  ;;  %11197 = vmatpush3.xpose.msk.msra.mxu1 %vm1792_vm2, %v5545_v30 }
 0xb33   : > { %v5436_v52 = vpop.f32.mrb[69].mxu0  ;;  %v5554_v25 = vpop.f32.mrb[77].mxu1  ;;  %11193 = vmatprep.mubr.msk.f32.mxu0 %vm11957_vm1, %v11956_v24  ;;  %11201 = vmatprep.subr.mxu0 %v11956_v24  ;;  %v5560_v37 = vadd.f32 %v11102_v41, %v10137_v23  ;;  %v5442_v8 = vadd.f32 %v11082_v48, %v13304_v60 }
 0xb34   : > { %v5555_v12 = vadd.f32 %v10137_v23, %v5554_v25  ;;  %11206 = vmatprep.subr.mxu1 %v11956_v24  ;;  %v5437_v61 = vadd.f32 %v13304_v60, %v5436_v52 }
 0xb35   : > { %11194 = vmatmul.mubr.msk.f32.vlgmr.msra.gmra.mrb[90].mxu0 %vm1792_vm2, %v5422_v31  ;;  %11199 = vmatmul.mubr.msk.f32.vlgmr.msra.gmra.mrb[96].mxu1 %vm1792_vm2, %v5427_v45 }
 0xb36   : > { %v11085_v42 = vpop.f32.mrb[70].mxu0  ;;  %v11105_v19 = vpop.f32.mrb[78].mxu1  ;;  %11202 = vmatpush3.xpose.msk.msra.mxu0 %vm1792_vm2, %v5550_v54  ;;  %11207 = vmatpush3.xpose.msk.msra.mxu1 %vm1792_vm2, %v5555_v12 }
 0xb37   : > { %v5446_v33 = vpop.f32.mrb[71].mxu0  ;;  %v5564_v27 = vpop.f32.mrb[79].mxu1  ;;  %11203 = vmatprep.mubr.msk.f32.mxu0 %vm11957_vm1, %v11956_v24  ;;  %11208 = vmatprep.mubr.msk.f32.mxu1 %vm11957_vm1, %v11956_v24  ;;  %v5570_v21 = vadd.f32 %v11105_v19, %v10137_v23  ;;  %v5452_v11 = vadd.f32 %v11085_v42, %v13304_v60 }
 0xb38   : > { %v5565_v58 = vadd.f32 %v10137_v23, %v5564_v27  ;;  %11211 = vmatprep.subr.mxu0 %v11956_v24  ;;  %11216 = vmatprep.subr.mxu1 %v11956_v24  ;;  %v5447_v47 = vadd.f32 %v13304_v60, %v5446_v33  ;;  %v10165_v60 = vld [vmem:[%s14128_s2 + $0x3] ss:$0 sm:$0xff] }
 0xb39   : > { %11204 = vmatmul.mubr.msk.f32.vlgmr.msra.gmra.mrb[92].mxu0 %vm1792_vm2, %v5432_v53  ;;  %11209 = vmatmul.mubr.msk.f32.vlgmr.msra.gmra.mrb[98].mxu1 %vm1792_vm2, %v5437_v61 }
 0xb3a   : > { %v13332_v57 = vpop.f32.mrb[72].mxu0  ;;  %v11136_v62 = vpop.f32.mrb[80].mxu1  ;;  %11212 = vmatpush3.xpose.msk.msra.mxu0 %vm1792_vm2, %v5560_v37  ;;  %11217 = vmatpush3.xpose.msk.msra.mxu1 %vm1792_vm2, %v5565_v58 }
 0xb3b   : > { %v13338_v22 = vpop.f32.mrb[73].mxu0  ;;  %v5770_v26 = vpop.f32.mrb[81].mxu1  ;;  %11213 = vmatprep.mubr.msk.f32.mxu0 %vm11957_vm1, %v11956_v24  ;;  %11218 = vmatprep.mubr.msk.f32.mxu1 %vm11957_vm1, %v11956_v24  ;;  %v5776_v13 = vadd.f32 %v11136_v62, %v10165_v60 }
 0xb3c   : > { %11221 = vmatprep.subr.mxu0 %v11956_v24  ;;  %11226 = vmatprep.subr.mxu1 %v11956_v24  ;;  %v5771_v30 = vadd.f32 %v10165_v60, %v5770_v26 }
 0xb3d   : > { %11214 = vmatmul.mubr.msk.f32.vlgmr.msra.gmra.mrb[94].mxu0 %vm1792_vm2, %v5442_v8  ;;  %11219 = vmatmul.mubr.msk.f32.vlgmr.msra.gmra.mrb[100].mxu1 %vm1792_vm2, %v5447_v47 }
 0xb3e   : > { %v11119_v46 = vpop.f32.mrb[74].mxu0  ;;  %v11139_v4 = vpop.f32.mrb[82].mxu1  ;;  %11222 = vmatpush3.xpose.msk.msra.mxu0 %vm1792_vm2, %v5570_v21  ;;  %11223 = vmatprep.mubr.msk.f32.mxu0 %vm11957_vm1, %v11956_v24 }
 0xb3f   : > { %v13358_v39 = vadd.f32 %v11119_v46, %v13351_v63  ;;  %v5662_v56 = vpop.f32.mrb[75].mxu0  ;;  %v5780_v0 = vpop.f32.mrb[83].mxu1  ;;  %11231 = vmatprep.subr.mxu0 %v11956_v24  ;;  %11228 = vmatprep.mubr.msk.f32.mxu1 %vm11957_vm1, %v11956_v24  ;;  %v5786_v52 = vadd.f32 %v11139_v4, %v10165_v60  ;;  %v5658_v46 = vadd.f32 %v13332_v57, %v13351_v63 }
 0xb40   : > { %v13364_v2 = vadd.f32 %v13351_v63, %v5662_v56  ;;  %v5781_v12 = vadd.f32 %v10165_v60, %v5780_v0  ;;  %v11940_v56 = vld [vmem:[%s12541_s10] ss:$0 sm:$0xff] }
 0xb41   : > { %11224 = vmatmul.mubr.msk.f32.vlgmr.msra.gmra.mrb[96].mxu0 %vm1792_vm2, %v5452_v11  ;;  %v5653_v11 = vadd.f32 %v13351_v63, %v13338_v22 }
 0xb42   : > { %v11122_v5 = vpop.f32.mrb[76].mxu0  ;;  %v11142_v1 = vpop.f32.mrb[84].mxu1  ;;  %11233 = vmatprep.mubr.msk.f32.mxu0 %vm11957_vm1, %v11956_v24 }
 0xb43   : > { %v13370_v51 = vadd.f32 %v11122_v5, %v13351_v63  ;;  %v5672_v10 = vpop.f32.mrb[77].mxu0  ;;  %v5790_v36 = vpop.f32.mrb[85].mxu1  ;;  %v5796_v33 = vadd.f32 %v11142_v1, %v10165_v60 }
 0xb44   : > { %v13373_v34 = vadd.f32 %v13351_v63, %v5672_v10  ;;  %v5791_v58 = vadd.f32 %v10165_v60, %v5790_v36 }
 0xb46   : > { %v11125_v9 = vpop.f32.mrb[78].mxu0  ;;  %v11145_v14 = vpop.f32.mrb[86].mxu1 }
 0xb47   : > { %v13376_v49 = vadd.f32 %v11125_v9, %v13351_v63  ;;  %v5682_v28 = vpop.f32.mrb[79].mxu0  ;;  %v5800_v23 = vpop.f32.mrb[87].mxu1  ;;  %v5806_v21 = vadd.f32 %v11145_v14, %v10165_v60 }
 0xb48   : > { %v13379_v17 = vadd.f32 %v13351_v63, %v5682_v28  ;;  %v5801_v4 = vadd.f32 %v10165_v60, %v5800_v23  ;;  %v13455_v23 = vld [vmem:[%s12541_s10 + $0x2] ss:$0 sm:$0xff] }
 0xb4a   : > { %v11156_v35 = vpop.f32.mrb[80].mxu0  ;;  %v13384_v55 = vpop.f32.mrb[88].mxu1 }
 0xb4b   : > { %v5894_v44 = vadd.f32 %v11156_v35, %v10179_v7  ;;  %v5888_v38 = vpop.f32.mrb[81].mxu0  ;;  %v13389_v32 = vpop.f32.mrb[89].mxu1  ;;  %v11942_v35 = vld [vmem:[%s12541_s10 + $0x1] ss:$0 sm:$0xff] }
 0xb4c   : > { %v5889_v43 = vadd.f32 %v10179_v7, %v5888_v38 }
 0xb4d   : > { %11232 = vmatpush3.xpose.msk.msra.mxu0 %vm1792_vm2, %v5894_v44 }
 0xb4e   : > { %v11159_v3 = vpop.f32.mrb[82].mxu0  ;;  %v13392_v29 = vpop.f32.mrb[90].mxu1  ;;  %11227 = vmatpush3.xpose.msk.msra.mxu1 %vm1792_vm2, %v5889_v43  ;;  %11241 = vmatprep.subr.mxu0 %v11956_v24 }
 0xb4f   : > { %v5904_v48 = vadd.f32 %v11159_v3, %v10179_v7  ;;  %v5898_v41 = vpop.f32.mrb[83].mxu0  ;;  %v13396_v31 = vpop.f32.mrb[91].mxu1  ;;  %11236 = vmatprep.subr.mxu1 %v11956_v24 }
 0xb50   : > { %v5899_v45 = vadd.f32 %v10179_v7, %v5898_v41  ;;  %11234 = vmatmul.mubr.msk.f32.vlgmr.msra.gmra.mrb[98].mxu0 %vm1792_vm2, %v5776_v13 }
 0xb51   : > { %11229 = vmatmul.mubr.msk.f32.vlgmr.msra.gmra.mrb[102].mxu1 %vm1792_vm2, %v5771_v30  ;;  %11242 = vmatpush3.xpose.msk.msra.mxu0 %vm1792_vm2, %v5904_v48 }
 0xb52   : > { %v11162_v25 = vpop.f32.mrb[84].mxu0  ;;  %v13402_v54 = vpop.f32.mrb[92].mxu1  ;;  %11237 = vmatpush3.xpose.msk.msra.mxu1 %vm1792_vm2, %v5899_v45  ;;  %11243 = vmatprep.mubr.msk.f32.mxu0 %vm11957_vm1, %v11956_v24  ;;  %v11943_v45 = vld [vmem:[%s12541_s10 + $0x4] ss:$0 sm:$0xff] }
 0xb53   : > { %v5914_v42 = vadd.f32 %v11162_v25, %v10179_v7  ;;  %v5908_v19 = vpop.f32.mrb[85].mxu0  ;;  %v13407_v53 = vpop.f32.mrb[93].mxu1  ;;  %11238 = vmatprep.mubr.msk.f32.mxu1 %vm11957_vm1, %v11956_v24  ;;  %11251 = vmatprep.subr.mxu0 %v11956_v24  ;;  %v11944_v25 = vld [vmem:[%s12541_s10 + $0x3] ss:$0 sm:$0xff] }
 0xb54   : > { %v5909_v61 = vadd.f32 %v10179_v7, %v5908_v19  ;;  %11244 = vmatmul.mubr.msk.f32.vlgmr.msra.gmra.mrb[100].mxu0 %vm1792_vm2, %v5786_v52  ;;  %11246 = vmatprep.subr.mxu1 %v11956_v24 }
 0xb55   : > { %11239 = vmatmul.mubr.msk.f32.vlgmr.msra.gmra.mrb[104].mxu1 %vm1792_vm2, %v5781_v12  ;;  %11252 = vmatpush3.xpose.msk.msra.mxu0 %vm1792_vm2, %v5914_v42 }
 0xb56   : > { %v11165_v27 = vpop.f32.mrb[86].mxu0  ;;  %v13416_v37 = vpop.f32.mrb[94].mxu1  ;;  %11247 = vmatpush3.xpose.msk.msra.mxu1 %vm1792_vm2, %v5909_v61  ;;  %11253 = vmatprep.mubr.msk.f32.mxu0 %vm11957_vm1, %v11956_v24 }
 0xb57   : > { %v5924_v62 = vadd.f32 %v11165_v27, %v10179_v7  ;;  %v5918_v8 = vpop.f32.mrb[87].mxu0  ;;  %v13421_v47 = vpop.f32.mrb[95].mxu1  ;;  %11248 = vmatprep.mubr.msk.f32.mxu1 %vm11957_vm1, %v11956_v24  ;;  %11261 = vmatprep.subr.mxu0 %v11956_v24 }
 0xb58   : > { %v5919_v26 = vadd.f32 %v10179_v7, %v5918_v8  ;;  %11254 = vmatmul.mubr.msk.f32.vlgmr.msra.gmra.mrb[102].mxu0 %vm1792_vm2, %v5796_v33  ;;  %11256 = vmatprep.subr.mxu1 %v11956_v24 }
 0xb59   : > { %11249 = vmatmul.mubr.msk.f32.vlgmr.msra.gmra.mrb[106].mxu1 %vm1792_vm2, %v5791_v58  ;;  %11262 = vmatpush3.xpose.msk.msra.mxu0 %vm1792_vm2, %v5924_v62 }
 0xb5a   : > { %11257 = vmatpush3.xpose.msk.msra.mxu1 %vm1792_vm2, %v5919_v26  ;;  %11263 = vmatprep.mubr.msk.f32.mxu0 %vm11957_vm1, %v11956_v24  ;;  %v11945_v26 = vld [vmem:[%s12541_s10 + $0x5] ss:$0 sm:$0xff] }
 0xb5b   : > { %11258 = vmatprep.mubr.msk.f32.mxu1 %vm11957_vm1, %v11956_v24  ;;  %11271 = vmatprep.subr.mxu0 %v11956_v24 }
 0xb5c   : > { %11264 = vmatmul.mubr.msk.f32.vlgmr.msra.gmra.mrb[104].mxu0 %vm1792_vm2, %v5806_v21  ;;  %11266 = vmatprep.subr.mxu1 %v11956_v24 }
 0xb5d   : > { %11259 = vmatmul.mubr.msk.f32.vlgmr.msra.gmra.mrb[108].mxu1 %vm1792_vm2, %v5801_v4  ;;  %11272 = vmatpush3.msra.mxu0 %v5658_v46  ;;  %v11946_v46 = vld [vmem:[%s12541_s10 + $0x6] ss:$0 sm:$0xff] }
 0xb5e   : > { %11267 = vmatpush3.msra.mxu1 %v5653_v11  ;;  %11268 = vmatprep.mubr.msk.f32.mxu1 %vm11957_vm1, %v11956_v24 }
 0xb5f   : > { %11276 = vmatprep.subr.mxu1 %v11956_v24  ;;  %11273 = vmatprep.mubr.msk.f32.mxu0 %vm11957_vm1, %v11956_v24 }
 0xb60   : > { %11281 = vmatprep.subr.mxu0 %v11956_v24 }
 0xc04   : > { %v6117_v57 = vpop.f32.mrb[88].mxu0 }
 0xc05   : > { %v7261_v22 = vmul.f32 0.25, %v6117_v57  ;;  %v11190_v63 = vpop.f32.mrb[89].mxu0 }
 0xc07   : > { %v13450_v0 = vadd.f32 %v11940_v56, %v7261_v22 }
 0xc08   : > { %v6193_v5 = vpop.f32.mrb[90].mxu0  ;;  %v6269_v1 = vpop.f32.mrb[96].mxu1 }
 0xc09   : > { %v7262_v10 = vmul.f32 0.25, %v6193_v5  ;;  %v7263_v36 = vmul.f32 0.25, %v6269_v1  ;;  %v11195_v9 = vpop.f32.mrb[91].mxu0  ;;  %v11200_v14 = vpop.f32.mrb[97].mxu1  ;;  %v7293_v28 = vsel %vm3041_vm3, %v13450_v0, -inf }
 0xc0a   : > { %7294 = vmax.xlane.f32.xlu0 %v7293_v28  ;;  %v11947_v1 = vld [vmem:[%s12541_s10 + $0x7] ss:$0 sm:$0xff] }
 0xc0b   : > { %v13458_v7 = vadd.f32 %v13455_v23, %v7263_v36  ;;  %v13461_v60 = vadd.f32 %v11942_v35, %v7262_v10 }
 0xc0c   : > { %v6345_v44 = vpop.f32.mrb[92].mxu0  ;;  %v6421_v38 = vpop.f32.mrb[98].mxu1 }
 0xc0d   : > { %v7264_v43 = vmul.f32 0.25, %v6345_v44  ;;  %v7265_v13 = vmul.f32 0.25, %v6421_v38  ;;  %v11205_v3 = vpop.f32.mrb[93].mxu0  ;;  %v11210_v30 = vpop.f32.mrb[99].mxu1  ;;  %v7299_v48 = vsel %vm3041_vm3, %v13458_v7, -inf  ;;  %v7296_v41 = vsel %vm3041_vm3, %v13461_v60, -inf }
 0xc0e   : > { %7300 = vmax.xlane.f32.xlu0 %v7299_v48  ;;  %7297 = vmax.xlane.f32.xlu1 %v7296_v41 }
 0xc0f   : > { %v13468_v52 = vadd.f32 %v11943_v45, %v7265_v13  ;;  %v13471_v12 = vadd.f32 %v11944_v25, %v7264_v43 }
 0xc10   : > { %v6497_v42 = vpop.f32.mrb[94].mxu0  ;;  %v6573_v19 = vpop.f32.mrb[100].mxu1 }
 0xc11   : > { %v7266_v61 = vmul.f32 0.25, %v6497_v42  ;;  %v7267_v33 = vmul.f32 0.25, %v6573_v19  ;;  %v11215_v27 = vpop.f32.mrb[95].mxu0  ;;  %v11220_v58 = vpop.f32.mrb[101].mxu1  ;;  %v7305_v62 = vsel %vm3041_vm3, %v13468_v52, -inf  ;;  %v7302_v8 = vsel %vm3041_vm3, %v13471_v12, -inf }
 0xc12   : > { %7306 = vmax.xlane.f32.xlu0 %v7305_v62  ;;  %7303 = vmax.xlane.f32.xlu1 %v7302_v8 }
 0xc13   : > { %v13478_v21 = vadd.f32 %v11945_v26, %v7266_v61  ;;  %v13481_v4 = vadd.f32 %v11946_v46, %v7267_v33 }
 0xc14   : > { %v6649_v11 = vpop.f32.mrb[96].mxu0 }
 0xc15   : > { %v7268_v57 = vmul.f32 0.25, %v6649_v11  ;;  %v11225_v22 = vpop.f32.mrb[97].mxu0  ;;  %v7308_v63 = vsel %vm3041_vm3, %v13478_v21, -inf  ;;  %v7311_v5 = vsel %vm3041_vm3, %v13481_v4, -inf }
 0xc16   : > { %7309 = vmax.xlane.f32.xlu1 %v7308_v63  ;;  %7312 = vmax.xlane.f32.xlu0 %v7311_v5 }
 0xc17   : > { %v13488_v10 = vadd.f32 %v11947_v1, %v7268_v57 }
 0xc19   : > { %v7314_v36 = vsel %vm3041_vm3, %v13488_v10, -inf }
 0xc1a   : > { %7315 = vmax.xlane.f32.xlu1 %v7314_v36 }
 0xc23   : > { %v6801_v9 = vpop.f32.mrb[98].mxu0 }
 0xc24   : > { %v7270_v14 = vmul.f32 0.25, %v6801_v9  ;;  %v6725_v28 = vpop.f32.mrb[102].mxu1  ;;  %v11235_v44 = vpop.f32.mrb[99].mxu0 }
 0xc25   : > { %v7269_v38 = vmul.f32 0.25, %v6725_v28  ;;  %v11230_v43 = vpop.f32.mrb[103].mxu1 }
 0xc26   : > { %v13492_v13 = vadd.f32 %v11942_v35, %v7270_v14 }
 0xc27   : > { %v6953_v3 = vpop.f32.mrb[100].mxu0  ;;  %v13494_v30 = vadd.f32 %v11940_v56, %v7269_v38 }
 0xc28   : > { %v7272_v48 = vmul.f32 0.25, %v6953_v3  ;;  %v6877_v41 = vpop.f32.mrb[104].mxu1  ;;  %v11245_v42 = vpop.f32.mrb[101].mxu0  ;;  %v7320_v19 = vsel %vm3041_vm3, %v13492_v13, -inf }
 0xc29   : > { %v7271_v61 = vmul.f32 0.25, %v6877_v41  ;;  %7321 = vmax.xlane.f32.xlu1 %v7320_v19  ;;  %v11240_v33 = vpop.f32.mrb[105].mxu1  ;;  %v7317_v27 = vsel %vm3041_vm3, %v13494_v30, -inf }
 0xc2a   : > { %7318 = vmax.xlane.f32.xlu0 %v7317_v27  ;;  %v13500_v58 = vadd.f32 %v11944_v25, %v7272_v48 }
 0xc2b   : > { %v7105_v35 = vpop.f32.mrb[102].mxu0  ;;  %v13503_v62 = vadd.f32 %v13455_v23, %v7271_v61 }
 0xc2c   : > { %v7274_v56 = vmul.f32 0.25, %v7105_v35  ;;  %v7029_v8 = vpop.f32.mrb[106].mxu1  ;;  %v11255_v11 = vpop.f32.mrb[103].mxu0  ;;  %v7326_v57 = vsel %vm3041_vm3, %v13500_v58, -inf }
 0xc2d   : > { %v7273_v22 = vmul.f32 0.25, %v7029_v8  ;;  %7327 = vmax.xlane.f32.xlu1 %v7326_v57  ;;  %v11250_v63 = vpop.f32.mrb[107].mxu1  ;;  %v7323_v5 = vsel %vm3041_vm3, %v13503_v62, -inf }
 0xc2e   : > { %7324 = vmax.xlane.f32.xlu0 %v7323_v5  ;;  %v13509_v36 = vadd.f32 %v11945_v26, %v7274_v56 }
 0xc2f   : > { %v7257_v25 = vpop.f32.mrb[104].mxu0  ;;  %v13511_v9 = vadd.f32 %v11943_v45, %v7273_v22 }
 0xc30   : > { %v7276_v23 = vmul.f32 0.25, %v7257_v25  ;;  %v7181_v14 = vpop.f32.mrb[108].mxu1  ;;  %v11265_v28 = vpop.f32.mrb[105].mxu0  ;;  %v7332_v44 = vsel %vm3041_vm3, %v13509_v36, -inf }
 0xc31   : > { %v7275_v38 = vmul.f32 0.25, %v7181_v14  ;;  %7333 = vmax.xlane.f32.xlu1 %v7332_v44  ;;  %v11260_v43 = vpop.f32.mrb[109].mxu1  ;;  %v7329_v3 = vsel %vm3041_vm3, %v13511_v9, -inf }
 0xc32   : > { %7330 = vmax.xlane.f32.xlu0 %v7329_v3  ;;  %v13517_v48 = vadd.f32 %v11947_v1, %v7276_v23 }
 0xc33   : > { %v13519_v26 = vadd.f32 %v11946_v46, %v7275_v38 }
 0xc34   : > { %v7338_v45 = vsel %vm3041_vm3, %v13517_v48, -inf }
 0xc35   : > { %7339 = vmax.xlane.f32.xlu1 %v7338_v45  ;;  %v7335_v41 = vsel %vm3041_vm3, %v13519_v26, -inf }
 0xc36   : > { %7336 = vmax.xlane.f32.xlu0 %v7335_v41 }
 0xc97   : > { %v7295_v42 = vpop.xlane.xlu0 %7294 }
 0xc98   : > { %v7341_v19 = vsub.f32 %v13450_v0, %v7295_v42 }
 0xc9a   : > { %v7357_v61 = vmul.f32 1.442695, %v7341_v19 }
 0xc9b   : > { %v7301_v33 = vpop.xlane.xlu0 %7300  ;;  %v7298_v27 = vpop.xlane.xlu1 %7297 }
 0xc9c   : > { %11822 = vpow2.f32 %v7357_v61  ;;  %v7343_v1 = vsub.f32 %v13458_v7, %v7301_v33  ;;  %v7342_v46 = vsub.f32 %v13461_v60, %v7298_v27 }
 0xc9e   : > { %v7361_v35 = vmul.f32 1.442695, %v7343_v1  ;;  %v7359_v56 = vmul.f32 1.442695, %v7342_v46 }
 0xc9f   : > { %v7307_v8 = vpop.xlane.xlu0 %7306  ;;  %v7304_v11 = vpop.xlane.xlu1 %7303 }
 0xca0   : > { %11824 = vpow2.f32 %v7361_v35  ;;  %v7345_v57 = vsub.f32 %v13468_v52, %v7307_v8  ;;  %v7344_v22 = vsub.f32 %v13471_v12, %v7304_v11 }
 0xca1   : > { %11826 = vpow2.f32 %v7359_v56 }
 0xca2   : > { %v7365_v63 = vmul.f32 1.442695, %v7345_v57  ;;  %v7363_v0 = vmul.f32 1.442695, %v7344_v22 }
 0xca3   : > { %v7310_v5 = vpop.xlane.xlu1 %7309  ;;  %v7313_v25 = vpop.xlane.xlu0 %7312 }
 0xca4   : > { %11828 = vpow2.f32 %v7365_v63  ;;  %v7346_v23 = vsub.f32 %v13478_v21, %v7310_v5  ;;  %v7347_v7 = vsub.f32 %v13481_v4, %v7313_v25 }
 0xca5   : > { %11830 = vpow2.f32 %v7363_v0 }
 0xca6   : > { %v13532_v60 = vpop.eup %11822  ;;  %v7367_v14 = vmul.f32 1.442695, %v7346_v23  ;;  %v7369_v28 = vmul.f32 1.442695, %v7347_v7 }
 0xca7   : > { %v7316_v44 = vpop.xlane.xlu1 %7315  ;;  %v7389_v52 = vsel %vm3041_vm3, %v13532_v60, 0.0 }
 0xca8   : > { %11832 = vpow2.f32 %v7367_v14  ;;  %v7348_v12 = vsub.f32 %v13488_v10, %v7316_v44  ;;  %7390 = vadd.xlane.f32.xlu0 %v7389_v52 }
 0xca9   : > { %11834 = vpow2.f32 %v7369_v28 }
 0xcaa   : > { %v13537_v38 = vpop.eup %11824  ;;  %v7371_v43 = vmul.f32 1.442695, %v7348_v12 }
 0xcab   : > { %v13539_v21 = vpop.eup %11826  ;;  %v7395_v4 = vsel %vm3041_vm3, %v13537_v38, 0.0 }
 0xcac   : > { %11836 = vpow2.f32 %v7371_v43  ;;  %v7392_v3 = vsel %vm3041_vm3, %v13539_v21, 0.0  ;;  %7396 = vadd.xlane.f32.xlu0 %v7395_v4 }
 0xcad   : > { %7393 = vadd.xlane.f32.xlu1 %v7392_v3 }
 0xcae   : > { %v13545_v45 = vpop.eup %11828 }
 0xcaf   : > { %v13547_v41 = vpop.eup %11830  ;;  %v7401_v10 = vsel %vm3041_vm3, %v13545_v45, 0.0 }
 0xcb0   : > { %v7398_v42 = vsel %vm3041_vm3, %v13547_v41, 0.0  ;;  %7402 = vadd.xlane.f32.xlu0 %v7401_v10 }
 0xcb1   : > { %7399 = vadd.xlane.f32.xlu1 %v7398_v42 }
 0xcb2   : > { %v13553_v19 = vpop.eup %11832 }
 0xcb3   : > { %v13555_v61 = vpop.eup %11834  ;;  %v7404_v33 = vsel %vm3041_vm3, %v13553_v19, 0.0 }
 0xcb4   : > { %v7407_v27 = vsel %vm3041_vm3, %v13555_v61, 0.0 }
 0xcb5   : > { %7405 = vadd.xlane.f32.xlu1 %v7404_v33  ;;  %7408 = vadd.xlane.f32.xlu0 %v7407_v27 }
 0xcb6   : > { %v13561_v1 = vpop.eup %11836  ;;  %v7322_v46 = vpop.xlane.xlu1 %7321 }
 0xcb7   : > { %v7350_v35 = vsub.f32 %v13492_v13, %v7322_v46  ;;  %v7319_v56 = vpop.xlane.xlu0 %7318  ;;  %v7410_v8 = vsel %vm3041_vm3, %v13561_v1, 0.0 }
 0xcb8   : > { %v7349_v11 = vsub.f32 %v13494_v30, %v7319_v56 }
 0xcb9   : > { %v7375_v57 = vmul.f32 1.442695, %v7350_v35  ;;  %7411 = vadd.xlane.f32.xlu1 %v7410_v8 }
 0xcba   : > { %v7373_v22 = vmul.f32 1.442695, %v7349_v11  ;;  %v7328_v63 = vpop.xlane.xlu1 %7327 }
 0xcbb   : > { %11838 = vpow2.f32 %v7375_v57  ;;  %v7352_v0 = vsub.f32 %v13500_v58, %v7328_v63  ;;  %v7325_v5 = vpop.xlane.xlu0 %7324 }
 0xcbc   : > { %11840 = vpow2.f32 %v7373_v22  ;;  %v7351_v25 = vsub.f32 %v13503_v62, %v7325_v5 }
 0xcbd   : > { %v7379_v23 = vmul.f32 1.442695, %v7352_v0 }
 0xcbe   : > { %v7377_v7 = vmul.f32 1.442695, %v7351_v25  ;;  %v7334_v13 = vpop.xlane.xlu1 %7333 }
 0xcbf   : > { %11842 = vpow2.f32 %v7379_v23  ;;  %v7354_v14 = vsub.f32 %v13509_v36, %v7334_v13  ;;  %v7331_v28 = vpop.xlane.xlu0 %7330 }
 0xcc0   : > { %11844 = vpow2.f32 %v7377_v7  ;;  %v7353_v30 = vsub.f32 %v13511_v9, %v7331_v28 }
 0xcc1   : > { %v7383_v44 = vmul.f32 1.442695, %v7354_v14 }
 0xcc2   : > { %v7381_v52 = vmul.f32 1.442695, %v7353_v30  ;;  %v7340_v12 = vpop.xlane.xlu1 %7339 }
 0xcc3   : > { %11846 = vpow2.f32 %v7383_v44  ;;  %v7356_v58 = vsub.f32 %v13517_v48, %v7340_v12  ;;  %v7337_v43 = vpop.xlane.xlu0 %7336 }
 0xcc4   : > { %11848 = vpow2.f32 %v7381_v52  ;;  %v7355_v62 = vsub.f32 %v13519_v26, %v7337_v43 }
 0xcc5   : > { %v13573_v4 = vpop.eup %11838  ;;  %v7387_v3 = vmul.f32 1.442695, %v7356_v58 }
 0xcc6   : > { %v13575_v10 = vpop.eup %11840  ;;  %v7385_v36 = vmul.f32 1.442695, %v7355_v62  ;;  %v7416_v42 = vsel %vm3041_vm3, %v13573_v4, 0.0 }
 0xcc7   : > { %11850 = vpow2.f32 %v7387_v3  ;;  %7417 = vadd.xlane.f32.xlu1 %v7416_v42  ;;  %v7413_v9 = vsel %vm3041_vm3, %v13575_v10, 0.0 }
 0xcc8   : > { %11852 = vpow2.f32 %v7385_v36  ;;  %7414 = vadd.xlane.f32.xlu0 %v7413_v9 }
 0xcc9   : > { %v13581_v48 = vpop.eup %11842 }
 0xcca   : > { %v13583_v33 = vpop.eup %11844  ;;  %v7422_v26 = vsel %vm3041_vm3, %v13581_v48, 0.0 }
 0xccb   : > { %7423 = vadd.xlane.f32.xlu1 %v7422_v26  ;;  %v7419_v27 = vsel %vm3041_vm3, %v13583_v33, 0.0 }
 0xccc   : > { %7420 = vadd.xlane.f32.xlu0 %v7419_v27 }
 0xccd   : > { %v13589_v46 = vpop.eup %11846 }
 0xcce   : > { %v13591_v35 = vpop.eup %11848  ;;  %v7428_v56 = vsel %vm3041_vm3, %v13589_v46, 0.0 }
 0xccf   : > { %7429 = vadd.xlane.f32.xlu1 %v7428_v56  ;;  %v7425_v8 = vsel %vm3041_vm3, %v13591_v35, 0.0 }
 0xcd0   : > { %7426 = vadd.xlane.f32.xlu0 %v7425_v8 }
 0xcd1   : > { %v13597_v11 = vpop.eup %11850 }
 0xcd2   : > { %v13599_v57 = vpop.eup %11852  ;;  %v7434_v22 = vsel %vm3041_vm3, %v13597_v11, 0.0 }
 0xcd3   : > { %7435 = vadd.xlane.f32.xlu1 %v7434_v22  ;;  %v7431_v63 = vsel %vm3041_vm3, %v13599_v57, 0.0 }
 0xcd4   : > { %7432 = vadd.xlane.f32.xlu0 %v7431_v63 }
 0xd35   : > { %v7391_v0 = vpop.xlane.xlu0 %7390 }
 0xd36   : > { %11854 = vrcp.f32 %v7391_v0 }
 0xd39   : > { %v7397_v5 = vpop.xlane.xlu0 %7396 }
 0xd3a   : > { %v7394_v25 = vpop.xlane.xlu1 %7393  ;;  %11856 = vrcp.f32 %v7397_v5 }
 0xd3b   : > { %11858 = vrcp.f32 %v7394_v25 }
 0xd3d   : > { %v7403_v23 = vpop.xlane.xlu0 %7402 }
 0xd3e   : > { %v7400_v7 = vpop.xlane.xlu1 %7399  ;;  %11860 = vrcp.f32 %v7403_v23 }
 0xd3f   : > { %11862 = vrcp.f32 %v7400_v7 }
 0xd40   : > { %v11855_v13 = vpop.eup %11854 }
 0xd41   : > { %v7438_v14 = vmul.f32 %v11855_v13, %v13532_v60 }
 0xd42   : > { %v7406_v28 = vpop.xlane.xlu1 %7405  ;;  %v7409_v30 = vpop.xlane.xlu0 %7408 }
 0xd43   : > { %11864 = vrcp.f32 %v7406_v28  ;;  %11269 = vmatmul.mubr.msk.f32.vlgmr.msra.gmra.mrb[110].mxu1 %vm3041_vm3, %v7438_v14  ;;  %v10263_v14 = vld [vmem:[%s14082_s12 + $0x38] sm:$0xff] }
 0xd44   : > { %v11857_v44 = vpop.eup %11856  ;;  %11866 = vrcp.f32 %v7409_v30  ;;  %11277 = vmatpush3.msra.mxu1 %v13364_v2  ;;  %11278 = vmatprep.mubr.msk.f32.mxu1 %vm11957_vm1, %v11956_v24 }
 0xd45   : > { %v11859_v52 = vpop.eup %11858  ;;  %v7442_v12 = vmul.f32 %v11857_v44, %v13537_v38  ;;  %11286 = vmatprep.subr.mxu1 %v11956_v24 }
 0xd46   : > { %v7440_v58 = vmul.f32 %v11859_v52, %v13539_v21  ;;  %v7412_v60 = vpop.xlane.xlu1 %7411 }
 0xd47   : > { %11868 = vrcp.f32 %v7412_v60  ;;  %11279 = vmatmul.mubr.msk.f32.vlgmr.msra.gmra.mrb[112].mxu1 %vm3041_vm3, %v7442_v12 }
 0xd48   : > { %v11861_v43 = vpop.eup %11860  ;;  %11274 = vmatmul.mubr.msk.f32.vlgmr.msra.gmra.mrb[106].mxu0 %vm3041_vm3, %v7440_v58  ;;  %11287 = vmatpush3.msra.mxu1 %v13373_v34 }
 0xd49   : > { %v11863_v2 = vpop.eup %11862  ;;  %v7446_v62 = vmul.f32 %v11861_v43, %v13545_v45  ;;  %11282 = vmatpush3.msra.mxu0 %v13358_v39  ;;  %11283 = vmatprep.mubr.msk.f32.mxu0 %vm11957_vm1, %v11956_v24  ;;  %v13631_v39 = vld [vmem:[%s14129_s5 + $0x3] ss:$0 sm:$0xff] }
 0xd4a   : > { %v7444_v38 = vmul.f32 %v11863_v2, %v13547_v41  ;;  %11288 = vmatprep.mubr.msk.f32.mxu1 %vm11957_vm1, %v11956_v24  ;;  %11291 = vmatprep.subr.mxu0 %v11956_v24  ;;  %v6007_v41 = vadd.f32 %v13631_v39, %v13389_v32  ;;  %v6022_v56 = vadd.f32 %v13392_v29, %v13631_v39 }
 0xd4b   : > { %11296 = vmatprep.subr.mxu1 %v11956_v24  ;;  %11289 = vmatmul.mubr.msk.f32.vlgmr.msra.gmra.mrb[114].mxu1 %vm3041_vm3, %v7446_v62  ;;  %v6017_v63 = vadd.f32 %v13631_v39, %v13396_v31  ;;  %v6032_v29 = vadd.f32 %v13402_v54, %v13631_v39  ;;  %v6027_v31 = vadd.f32 %v13631_v39, %v13407_v53 }
 0xd4c   : > { %11284 = vmatmul.mubr.msk.f32.vlgmr.msra.gmra.mrb[108].mxu0 %vm3041_vm3, %v7444_v38  ;;  %11297 = vmatpush3.msra.mxu1 %v13379_v17  ;;  %v6037_v23 = vadd.f32 %v13631_v39, %v13421_v47  ;;  %v10251_v47 = vld [vmem:[%s14082_s12 + $0x20] sm:$0xff] }
 0xd4d   : > { %v11865_v34 = vpop.eup %11864  ;;  %11292 = vmatpush3.msra.mxu0 %v13370_v51  ;;  %11293 = vmatprep.mubr.msk.f32.mxu0 %vm11957_vm1, %v11956_v24 }
 0xd4e   : > { %v11867_v21 = vpop.eup %11866  ;;  %v7448_v45 = vmul.f32 %v11865_v34, %v13553_v19  ;;  %11298 = vmatprep.mubr.msk.f32.mxu1 %vm11957_vm1, %v11956_v24  ;;  %11301 = vmatprep.subr.mxu0 %v11956_v24 }
 0xd4f   : > { %v7450_v17 = vmul.f32 %v11867_v21, %v13555_v61  ;;  %11306 = vmatprep.subr.mxu1 %v11956_v24  ;;  %v6012_v61 = vadd.f32 %v13384_v55, %v13631_v39 }
 0xd50   : > { %11294 = vmatmul.mubr.msk.f32.vlgmr.msra.gmra.mrb[110].mxu0 %vm3041_vm3, %v7448_v45 }
 0xd51   : > { %v11869_v51 = vpop.eup %11868  ;;  %11299 = vmatmul.mubr.msk.f32.vlgmr.msra.gmra.mrb[116].mxu1 %vm3041_vm3, %v7450_v17  ;;  %11302 = vmatpush3.msra.mxu0 %v13376_v49 }
 0xd52   : > { %v7452_v19 = vmul.f32 %v11869_v51, %v13561_v1  ;;  %11307 = vmatpush3.msra.mxu1 %v6007_v41  ;;  %11303 = vmatprep.mubr.msk.f32.mxu0 %vm11957_vm1, %v11956_v24 }
 0xd53   : > { %11311 = vmatprep.subr.mxu0 %v11956_v24  ;;  %11308 = vmatprep.mubr.msk.f32.mxu1 %vm11957_vm1, %v11956_v24 }
 0xd54   : > { %11304 = vmatmul.mubr.msk.f32.vlgmr.msra.gmra.mrb[112].mxu0 %vm3041_vm3, %v7452_v19  ;;  %v7418_v32 = vpop.xlane.xlu1 %7417  ;;  %11316 = vmatprep.subr.mxu1 %v11956_v24 }
 0xd55   : > { %11312 = vmatpush3.msra.mxu0 %v6012_v61  ;;  %11870 = vrcp.f32 %v7418_v32  ;;  %v7415_v49 = vpop.xlane.xlu0 %7414  ;;  %11313 = vmatprep.mubr.msk.f32.mxu0 %vm11957_vm1, %v11956_v24 }
 0xd56   : > { %11872 = vrcp.f32 %v7415_v49  ;;  %11321 = vmatprep.subr.mxu0 %v11956_v24 }
 0xd58   : > { %v7424_v55 = vpop.xlane.xlu1 %7423 }
 0xd59   : > { %11874 = vrcp.f32 %v7424_v55  ;;  %v7421_v1 = vpop.xlane.xlu0 %7420 }
 0xd5a   : > { %11876 = vrcp.f32 %v7421_v1 }
 0xd5c   : > { %v7430_v3 = vpop.xlane.xlu1 %7429 }
 0xd5d   : > { %11878 = vrcp.f32 %v7430_v3  ;;  %v7427_v36 = vpop.xlane.xlu0 %7426 }
 0xd5e   : > { %11880 = vrcp.f32 %v7427_v36 }
 0xd5f   : > { %v11871_v42 = vpop.eup %11870 }
 0xd60   : > { %v11873_v9 = vpop.eup %11872  ;;  %v7456_v26 = vmul.f32 %v11871_v42, %v13573_v4  ;;  %v7436_v27 = vpop.xlane.xlu1 %7435 }
 0xd61   : > { %v7454_v8 = vmul.f32 %v11873_v9, %v13575_v10  ;;  %11882 = vrcp.f32 %v7436_v27  ;;  %v7433_v22 = vpop.xlane.xlu0 %7432 }
 0xd62   : > { %11884 = vrcp.f32 %v7433_v22  ;;  %11314 = vmatmul.mubr.msk.f32.vlgmr.msra.gmra.mrb[114].mxu0 %vm3041_vm3, %v7456_v26 }
 0xd63   : > { %v11875_v0 = vpop.eup %11874  ;;  %11322 = vmatpush3.msra.mxu0 %v6022_v56  ;;  %11309 = vmatmul.mubr.msk.f32.vlgmr.msra.gmra.mrb[118].mxu1 %vm3041_vm3, %v7454_v8 }
 0xd64   : > { %v11877_v5 = vpop.eup %11876  ;;  %v7460_v4 = vmul.f32 %v11875_v0, %v13581_v48  ;;  %11317 = vmatpush3.msra.mxu1 %v6017_v63  ;;  %11323 = vmatprep.mubr.msk.f32.mxu0 %vm11957_vm1, %v11956_v24  ;;  %v10261_v63 = vld [vmem:[%s14083_s13 + $0x1] ss:$0 sm:$0xff] }
 0xd65   : > { %v7458_v10 = vmul.f32 %v11877_v5, %v13583_v33  ;;  %11331 = vmatprep.subr.mxu0 %v11956_v24  ;;  %11318 = vmatprep.mubr.msk.f32.mxu1 %vm11957_vm1, %v11956_v24  ;;  %v6042_v33 = vadd.f32 %v13416_v37, %v13631_v39 }
 0xd66   : > { %11324 = vmatmul.mubr.msk.f32.vlgmr.msra.gmra.mrb[116].mxu0 %vm3041_vm3, %v7460_v4  ;;  %11326 = vmatprep.subr.mxu1 %v11956_v24 }
 0xd67   : > { %v11879_v48 = vpop.eup %11878  ;;  %11332 = vmatpush3.msra.mxu0 %v6032_v29  ;;  %11319 = vmatmul.mubr.msk.f32.vlgmr.msra.gmra.mrb[120].mxu1 %vm3041_vm3, %v7458_v10 }
 0xd68   : > { %v11881_v25 = vpop.eup %11880  ;;  %v7464_v54 = vmul.f32 %v11879_v48, %v13589_v46  ;;  %11327 = vmatpush3.msra.mxu1 %v6027_v31  ;;  %11333 = vmatprep.mubr.msk.f32.mxu0 %vm11957_vm1, %v11956_v24 }
 0xd69   : > { %v7462_v53 = vmul.f32 %v11881_v25, %v13591_v35  ;;  %11341 = vmatprep.subr.mxu0 %v11956_v24  ;;  %11328 = vmatprep.mubr.msk.f32.mxu1 %vm11957_vm1, %v11956_v24 }
 0xd6a   : > { %11334 = vmatmul.mubr.msk.f32.vlgmr.msra.gmra.mrb[118].mxu0 %vm3041_vm3, %v7464_v54  ;;  %11336 = vmatprep.subr.mxu1 %v11956_v24 }
 0xd6b   : > { %v11883_v46 = vpop.eup %11882  ;;  %11342 = vmatpush3.msra.mxu0 %v6042_v33  ;;  %11329 = vmatmul.mubr.msk.f32.vlgmr.msra.gmra.mrb[122].mxu1 %vm3041_vm3, %v7462_v53 }
 0xd6c   : > { %v11885_v7 = vpop.eup %11884  ;;  %v7468_v37 = vmul.f32 %v11883_v46, %v13597_v11  ;;  %11337 = vmatpush3.msra.mxu1 %v6037_v23  ;;  %11343 = vmatprep.mubr.msk.f32.mxu0 %vm11957_vm1, %v11956_v24  ;;  %v10252_v11 = vld [vmem:[%s14082_s12 + $0x28] sm:$0xff] }
 0xd6d   : > { %v7466_v35 = vmul.f32 %v11885_v7, %v13599_v57  ;;  %11338 = vmatprep.mubr.msk.f32.mxu1 %vm11957_vm1, %v11956_v24  ;;  %v11595_v13 = vpack.c.bf16 %v10252_v11, %v10251_v47  ;;  %v10262_v57 = vld [vmem:[%s14082_s12 + $0x30] sm:$0xff] }
 0xd6e   : > { %11344 = vmatmul.mubr.msk.f32.vlgmr.msra.gmra.mrb[120].mxu0 %vm3041_vm3, %v7468_v37  ;;  %v11599_v28 = vpack.c.bf16 %v10263_v14, %v10262_v57 }
 0xd6f   : > { %11339 = vmatmul.mubr.msk.f32.vlgmr.msra.gmra.mrb[124].mxu1 %vm3041_vm3, %v7466_v35  ;;  %11596 = vmatprep.subr.bf16.mxu1 %v11595_v13 }
 0xd70   : > { %11598 = vmatpush3.bf16.msra.mxu1 %v11595_v13 }
 0xd71   : > { %11600 = vmatprep.subr.bf16.mxu1 %v11599_v28 }
 0xe16   : > { %v7538_v30 = vpop.f32.mrb[110].mxu1 }
 0xe17   : > { %v11270_v44 = vpop.f32.mrb[111].mxu1  ;;  %11350 = vmatprep.mubr.msk.f32.mxu1 %vm1792_vm2, %v7538_v30 }
 0xe1a   : > { %v7684_v52 = vpop.f32.mrb[112].mxu1 }
 0xe1b   : > { %v7611_v12 = vpop.f32.mrb[106].mxu0  ;;  %v11280_v58 = vpop.f32.mrb[113].mxu1 }
 0xe1c   : > { %v11275_v60 = vpop.f32.mrb[107].mxu0  ;;  %11351 = vmatmul.mubr.msk.f32.vlgmr.msra.gmra.mrb[126].mxu1 %vm1792_vm2, %v7611_v12 }
 0xe1d   : > { %11353 = vmatprep.mubr.msk.f32.mxu1 %vm1792_vm2, %v7684_v52  ;;  %11602 = vmatpush3.bf16.msra.mxu1 %v11599_v28 }
 0xe1e   : > { %v7830_v43 = vpop.f32.mrb[114].mxu1 }
 0xe1f   : > { %v7757_v2 = vpop.f32.mrb[108].mxu0  ;;  %v11290_v62 = vpop.f32.mrb[115].mxu1 }
 0xe20   : > { %v11285_v38 = vpop.f32.mrb[109].mxu0  ;;  %11354 = vmatmul.mubr.msk.f32.gmra.mrb[128].mxu1 %vm1792_vm2, %v7757_v2 }
 0xe21   : > { %11356 = vmatprep.mubr.msk.f32.mxu1 %vm1792_vm2, %v7830_v43 }
 0xe23   : > { %v7903_v34 = vpop.f32.mrb[110].mxu0 }
 0xe24   : > { %v7976_v39 = vpop.f32.mrb[116].mxu1  ;;  %v11295_v21 = vpop.f32.mrb[111].mxu0  ;;  %11357 = vmatmul.mubr.msk.f32.gmra.mrb[130].mxu1 %vm1792_vm2, %v7903_v34 }
 0xe25   : > { %v11300_v45 = vpop.f32.mrb[117].mxu1  ;;  %11359 = vmatprep.mubr.msk.f32.mxu1 %vm1792_vm2, %v7976_v39 }
 0xe27   : > { %v8049_v17 = vpop.f32.mrb[112].mxu0 }
 0xe28   : > { %v11305_v41 = vpop.f32.mrb[113].mxu0  ;;  %11360 = vmatmul.mubr.msk.f32.gmra.mrb[132].mxu1 %vm1792_vm2, %v8049_v17 }
 0xe35   : > { %v8195_v51 = vpop.f32.mrb[114].mxu0 }
 0xe36   : > { %v8122_v19 = vpop.f32.mrb[118].mxu1  ;;  %v11315_v61 = vpop.f32.mrb[115].mxu0 }
 0xe37   : > { %v11310_v32 = vpop.f32.mrb[119].mxu1  ;;  %11366 = vmatprep.mubr.msk.f32.mxu1 %vm1792_vm2, %v8122_v19 }
 0xe38   : > { %11367 = vmatmul.mubr.msk.f32.vlgmr.msra.gmra.mrb[126].mxu1 %vm1792_vm2, %v8195_v51 }
 0xe39   : > { %v8341_v49 = vpop.f32.mrb[116].mxu0 }
 0xe3a   : > { %v8268_v55 = vpop.f32.mrb[120].mxu1  ;;  %v11325_v1 = vpop.f32.mrb[117].mxu0 }
 0xe3b   : > { %v11320_v3 = vpop.f32.mrb[121].mxu1  ;;  %11369 = vmatprep.mubr.msk.f32.mxu1 %vm1792_vm2, %v8268_v55 }
 0xe3c   : > { %11370 = vmatmul.mubr.msk.f32.gmra.mrb[128].mxu1 %vm1792_vm2, %v8341_v49 }
 0xe3d   : > { %v8487_v36 = vpop.f32.mrb[118].mxu0 }
 0xe3e   : > { %v8414_v42 = vpop.f32.mrb[122].mxu1  ;;  %v11335_v9 = vpop.f32.mrb[119].mxu0 }
 0xe3f   : > { %v11330_v26 = vpop.f32.mrb[123].mxu1  ;;  %11372 = vmatprep.mubr.msk.f32.mxu1 %vm1792_vm2, %v8414_v42 }
 0xe40   : > { %11373 = vmatmul.mubr.msk.f32.gmra.mrb[130].mxu1 %vm1792_vm2, %v8487_v36 }
 0xe41   : > { %v8633_v27 = vpop.f32.mrb[120].mxu0 }
 0xe42   : > { %v8560_v56 = vpop.f32.mrb[124].mxu1  ;;  %v11345_v8 = vpop.f32.mrb[121].mxu0 }
 0xe43   : > { %v11340_v22 = vpop.f32.mrb[125].mxu1  ;;  %11375 = vmatprep.mubr.msk.f32.mxu1 %vm1792_vm2, %v8560_v56 }
 0xe44   : > { %11376 = vmatmul.mubr.msk.f32.gmra.mrb[132].mxu1 %vm1792_vm2, %v8633_v27 }
 0xe45   : > { %11442 = vmatprep.mubr.msk.f32.mxu1 %vm11957_vm1, %v11956_v24 }
 0xf0b   : > { %v11368_v0 = vpop.f32.mrb[126].mxu1 }
 0xf0c   : > { %v11659_v5 = vadd.f32 %v11368_v0, %v10261_v63  ;;  %v8878_v4 = vpop.f32.mrb[127].mxu1 }
 0xf0d   : > { %v11660_v29 = vadd.f32 %v10261_v63, %v8878_v4 }
 0xf0e   : > { %v8926_v10 = vadd.f32 %v11659_v5, %v13152_v40 }
 0xf0f   : > { %v8925_v31 = vadd.f32 %v11660_v29, %v13149_v20  ;;  %v11371_v48 = vpop.f32.mrb[128].mxu1 }
 0xf10   : > { %v11661_v25 = vadd.f32 %v11371_v48, %v10261_v63  ;;  %v8888_v54 = vpop.f32.mrb[129].mxu1  ;;  %v8940_v33 = vsel %vm876_vm0, %v8926_v10, 0.0 }
 0xf11   : > { %v11662_v53 = vadd.f32 %v10261_v63, %v8888_v54  ;;  %8941 = vadd.xlane.f32.xlu1 %v8940_v33  ;;  %v8937_v23 = vsel %vm876_vm0, %v8925_v31, 0.0  ;;  %v10276_v33 = vld [vmem:[%s14086_s16 + $0x20] sm:$0xff] }
 0xf12   : > { %v8928_v46 = vadd.f32 %v11661_v25, %v13180_v16  ;;  %8938 = vadd.xlane.f32.xlu0 %v8937_v23 }
 0xf13   : > { %v8927_v7 = vadd.f32 %v11662_v53, %v13175_v6  ;;  %v11374_v37 = vpop.f32.mrb[130].mxu1  ;;  %v10277_v53 = vld [vmem:[%s14086_s16 + $0x28] sm:$0xff] }
 0xf14   : > { %v11663_v35 = vadd.f32 %v11374_v37, %v10261_v63  ;;  %v8898_v47 = vpop.f32.mrb[131].mxu1  ;;  %v8946_v40 = vsel %vm876_vm0, %v8928_v46, 0.0  ;;  %v11603_v23 = vpack.c.bf16 %v10277_v53, %v10276_v33 }
 0xf15   : > { %v11664_v20 = vadd.f32 %v10261_v63, %v8898_v47  ;;  %8947 = vadd.xlane.f32.xlu1 %v8946_v40  ;;  %v8943_v11 = vsel %vm876_vm0, %v8927_v7, 0.0 }
 0xf16   : > { %v8930_v13 = vadd.f32 %v11663_v35, %v13194_v15  ;;  %8944 = vadd.xlane.f32.xlu0 %v8943_v11  ;;  %11604 = vmatprep.subr.bf16.mxu0 %v11603_v23 }
 0xf17   : > { %v8929_v57 = vadd.f32 %v11664_v20, %v13191_v59  ;;  %v11377_v14 = vpop.f32.mrb[132].mxu1  ;;  %11606 = vmatpush3.bf16.msra.mxu0 %v11603_v23 }
 0xf18   : > { %v11665_v28 = vadd.f32 %v11377_v14, %v10261_v63  ;;  %v8908_v16 = vpop.f32.mrb[133].mxu1  ;;  %v8952_v30 = vsel %vm876_vm0, %v8930_v13, 0.0 }
 0xf19   : > { %v11666_v6 = vadd.f32 %v10261_v63, %v8908_v16  ;;  %8953 = vadd.xlane.f32.xlu1 %v8952_v30  ;;  %v8949_v44 = vsel %vm876_vm0, %v8929_v57, 0.0 }
 0xf1a   : > { %v8932_v52 = vadd.f32 %v11665_v28, %v13206_v18  ;;  %8950 = vadd.xlane.f32.xlu0 %v8949_v44 }
 0xf1b   : > { %v8931_v12 = vadd.f32 %v11666_v6, %v13204_v50 }
 0xf1c   : > { %v8958_v58 = vsel %vm876_vm0, %v8932_v52, 0.0 }
 0xf1d   : > { %8959 = vadd.xlane.f32.xlu1 %v8958_v58  ;;  %v8955_v15 = vsel %vm876_vm0, %v8931_v12, 0.0 }
 0xf1e   : > { %8956 = vadd.xlane.f32.xlu0 %v8955_v15 }
 0xf9e   : > { %v8942_v59 = vpop.xlane.xlu1 %8941 }
 0xf9f   : > { %v8962_v60 = vmul.f32 0.03125, %v8942_v59  ;;  %v8939_v43 = vpop.xlane.xlu0 %8938 }
 0xfa0   : > { %v8961_v2 = vmul.f32 0.03125, %v8939_v43 }
 0xfa1   : > { %v13753_v62 = vsub.f32 %v8926_v10, %v8962_v60 }
 0xfa2   : > { %v13755_v38 = vsub.f32 %v8925_v31, %v8961_v2  ;;  %v8948_v34 = vpop.xlane.xlu1 %8947 }
 0xfa3   : > { %v8964_v39 = vmul.f32 0.03125, %v8948_v34  ;;  %v8945_v18 = vpop.xlane.xlu0 %8944  ;;  %v8978_v50 = vmul.f32 %v13753_v62, %v13753_v62 }
 0xfa4   : > { %v8963_v21 = vmul.f32 0.03125, %v8945_v18  ;;  %v8977_v45 = vmul.f32 %v13755_v38, %v13755_v38 }
 0xfa5   : > { %v13761_v17 = vsub.f32 %v8928_v46, %v8964_v39  ;;  %v8988_v41 = vsel %vm876_vm0, %v8978_v50, 0.0  ;;  %v10278_v46 = vld [vmem:[%s14086_s16 + $0x30] sm:$0xff]  ;;  %v10274_v50 = vld [vmem:[%s14084_s14 + $0x1] ss:$0 sm:$0xff] }
 0xfa6   : > { %v13764_v51 = vsub.f32 %v8927_v7, %v8963_v21  ;;  %v8954_v19 = vpop.xlane.xlu1 %8953  ;;  %8989 = vadd.xlane.f32.xlu1 %v8988_v41  ;;  %v8985_v61 = vsel %vm876_vm0, %v8977_v45, 0.0  ;;  %v10279_v7 = vld [vmem:[%s14086_s16 + $0x38] sm:$0xff] }
 0xfa7   : > { %v8966_v32 = vmul.f32 0.03125, %v8954_v19  ;;  %v8951_v49 = vpop.xlane.xlu0 %8950  ;;  %8986 = vadd.xlane.f32.xlu0 %v8985_v61  ;;  %v8980_v55 = vmul.f32 %v13761_v17, %v13761_v17  ;;  %v11607_v37 = vpack.c.bf16 %v10279_v7, %v10278_v46  ;;  %v10275_v61 = vld [vmem:[%s14085_s15 + $0x1] ss:$0 sm:$0xff]  ;;  %v10292_v7 = vld [vmem:[%s14088_s18 + $0x50] sm:$0xff] }
 0xfa8   : > { %v8965_v1 = vmul.f32 0.03125, %v8951_v49  ;;  %v8979_v3 = vmul.f32 %v13764_v51, %v13764_v51 }
 0xfa9   : > { %v13771_v36 = vsub.f32 %v8930_v13, %v8966_v32  ;;  %v8994_v42 = vsel %vm876_vm0, %v8980_v55, 0.0  ;;  %11608 = vmatprep.subr.bf16.mxu0 %v11607_v37 }
 0xfaa   : > { %v13774_v9 = vsub.f32 %v8929_v57, %v8965_v1  ;;  %8995 = vadd.xlane.f32.xlu1 %v8994_v42  ;;  %v8960_v26 = vpop.xlane.xlu1 %8959  ;;  %v8991_v27 = vsel %vm876_vm0, %v8979_v3, 0.0  ;;  %11610 = vmatpush3.bf16.msra.mxu0 %v11607_v37  ;;  %v10293_v37 = vld [vmem:[%s14088_s18 + $0x58] sm:$0xff] }
 0xfab   : > { %v8968_v56 = vmul.f32 0.03125, %v8960_v26  ;;  %8992 = vadd.xlane.f32.xlu0 %v8991_v27  ;;  %v8957_v8 = vpop.xlane.xlu0 %8956  ;;  %v8982_v22 = vmul.f32 %v13771_v36, %v13771_v36 }
 0xfac   : > { %v8967_v63 = vmul.f32 0.03125, %v8957_v8  ;;  %v8981_v0 = vmul.f32 %v13774_v9, %v13774_v9 }
 0xfad   : > { %v13781_v5 = vsub.f32 %v8932_v52, %v8968_v56  ;;  %v9000_v4 = vsel %vm876_vm0, %v8982_v22, 0.0 }
 0xfae   : > { %v13784_v29 = vsub.f32 %v8931_v12, %v8967_v63  ;;  %9001 = vadd.xlane.f32.xlu1 %v9000_v4  ;;  %v8997_v10 = vsel %vm876_vm0, %v8981_v0, 0.0 }
 0xfaf   : > { %8998 = vadd.xlane.f32.xlu0 %v8997_v10  ;;  %v8984_v31 = vmul.f32 %v13781_v5, %v13781_v5 }
 0xfb0   : > { %v8983_v48 = vmul.f32 %v13784_v29, %v13784_v29 }
 0xfb1   : > { %v9006_v25 = vsel %vm876_vm0, %v8984_v31, 0.0 }
 0xfb2   : > { %9007 = vadd.xlane.f32.xlu1 %v9006_v25  ;;  %v9003_v54 = vsel %vm876_vm0, %v8983_v48, 0.0 }
 0xfb3   : > { %9004 = vadd.xlane.f32.xlu0 %v9003_v54 }
0x1033   : > { %v8990_v35 = vpop.xlane.xlu1 %8989 }
0x1034   : > { %v9010_v47 = vmul.f32 0.03125, %v8990_v35  ;;  %v8987_v40 = vpop.xlane.xlu0 %8986  ;;  %v11615_v35 = vpack.c.bf16 %v10293_v37, %v10292_v7 }
0x1035   : > { %v9009_v20 = vmul.f32 0.03125, %v8987_v40  ;;  %v10295_v40 = vld [vmem:[%s14088_s18 + $0x68] sm:$0xff] }
0x1036   : > { %v9018_v11 = vadd.f32 1e-12, %v9010_v47  ;;  %v10294_v47 = vld [vmem:[%s14088_s18 + $0x60] sm:$0xff] }
0x1037   : > { %v9017_v13 = vadd.f32 1e-12, %v9009_v20  ;;  %v8996_v57 = vpop.xlane.xlu1 %8995  ;;  %v11619_v20 = vpack.c.bf16 %v10295_v40, %v10294_v47 }
0x1038   : > { %11886 = vrsqrt.f32 %v9018_v11  ;;  %v9012_v14 = vmul.f32 0.03125, %v8996_v57  ;;  %v8993_v28 = vpop.xlane.xlu0 %8992  ;;  %v10296_v11 = vld [vmem:[%s14088_s18 + $0x70] sm:$0xff] }
0x1039   : > { %11888 = vrsqrt.f32 %v9017_v13  ;;  %v9011_v16 = vmul.f32 0.03125, %v8993_v28  ;;  %v10297_v13 = vld [vmem:[%s14088_s18 + $0x78] sm:$0xff] }
0x103a   : > { %v9020_v30 = vadd.f32 1e-12, %v9012_v14  ;;  %v11623_v57 = vpack.c.bf16 %v10297_v13, %v10296_v11  ;;  %v10281_v14 = vld [vmem:[%s14087_s17 + $0x1] ss:$0 sm:$0xff] }
0x103b   : > { %v9019_v6 = vadd.f32 1e-12, %v9011_v16  ;;  %v9002_v44 = vpop.xlane.xlu1 %9001 }
0x103c   : > { %11890 = vrsqrt.f32 %v9020_v30  ;;  %v9014_v52 = vmul.f32 0.03125, %v9002_v44  ;;  %v8999_v12 = vpop.xlane.xlu0 %8998 }
0x103d   : > { %11892 = vrsqrt.f32 %v9019_v6  ;;  %v9013_v58 = vmul.f32 0.03125, %v8999_v12 }
0x103e   : > { %v9022_v15 = vadd.f32 1e-12, %v9014_v52 }
0x103f   : > { %v9021_v59 = vadd.f32 1e-12, %v9013_v58  ;;  %v9008_v60 = vpop.xlane.xlu1 %9007 }
0x1040   : > { %11894 = vrsqrt.f32 %v9022_v15  ;;  %v9016_v43 = vmul.f32 0.03125, %v9008_v60  ;;  %v9005_v2 = vpop.xlane.xlu0 %9004 }
0x1041   : > { %11896 = vrsqrt.f32 %v9021_v59  ;;  %v9015_v34 = vmul.f32 0.03125, %v9005_v2 }
0x1042   : > { %v11887_v39 = vpop.eup %11886  ;;  %v9024_v18 = vadd.f32 1e-12, %v9016_v43 }
0x1043   : > { %v11889_v21 = vpop.eup %11888  ;;  %v9034_v45 = vmul.f32 %v11887_v39, %v13753_v62  ;;  %v9023_v41 = vadd.f32 1e-12, %v9015_v34 }
0x1044   : > { %11898 = vrsqrt.f32 %v9024_v18  ;;  %v9033_v19 = vmul.f32 %v11889_v21, %v13755_v38 }
0x1045   : > { %11900 = vrsqrt.f32 %v9023_v41  ;;  %v9048_v32 = vmul.f32 %v10274_v50, %v9034_v45 }
0x1046   : > { %v11891_v49 = vpop.eup %11890  ;;  %v9047_v55 = vmul.f32 %v10274_v50, %v9033_v19 }
0x1047   : > { %v11893_v1 = vpop.eup %11892  ;;  %v9036_v3 = vmul.f32 %v11891_v49, %v13761_v17  ;;  %v13817_v62 = vadd.f32 %v10275_v61, %v9048_v32 }
0x1048   : > { %v13814_v42 = vadd.f32 %v10275_v61, %v9047_v55  ;;  %v9035_v26 = vmul.f32 %v11893_v1, %v13764_v51 }
0x1049   : > { %v9050_v27 = vmul.f32 %v10274_v50, %v9036_v3 }
0x104a   : > { %v11895_v56 = vpop.eup %11894  ;;  %11386 = vmatprep.mubr.msk.f32.mxu0 %vm876_vm0, %v13814_v42  ;;  %v9049_v38 = vmul.f32 %v10274_v50, %v9035_v26 }
0x104b   : > { %v11897_v8 = vpop.eup %11896  ;;  %11387 = vmatmul.mubr.msk.f32.vlgmr.msra.gmra.mrb[122].mxu0 %vm876_vm0, %v13817_v62  ;;  %v9038_v22 = vmul.f32 %v11895_v56, %v13771_v36  ;;  %v13827_v0 = vadd.f32 %v10275_v61, %v9050_v27 }
0x104c   : > { %v13824_v63 = vadd.f32 %v10275_v61, %v9049_v38  ;;  %v9037_v17 = vmul.f32 %v11897_v8, %v13774_v9 }
0x104d   : > { %v9052_v51 = vmul.f32 %v10274_v50, %v9038_v22 }
0x104e   : > { %v11899_v4 = vpop.eup %11898  ;;  %11389 = vmatprep.mubr.msk.f32.mxu0 %vm876_vm0, %v13824_v63  ;;  %v9051_v10 = vmul.f32 %v10274_v50, %v9037_v17 }
0x104f   : > { %v11901_v31 = vpop.eup %11900  ;;  %11390 = vmatmul.mubr.msk.f32.gmra.mrb[124].mxu0 %vm876_vm0, %v13827_v0  ;;  %v9040_v48 = vmul.f32 %v11899_v4, %v13781_v5  ;;  %v13837_v54 = vadd.f32 %v10275_v61, %v9052_v51  ;;  %v10290_v5 = vld [vmem:[%s14088_s18 + $0x40] sm:$0xff] }
0x1050   : > { %v13834_v25 = vadd.f32 %v10275_v61, %v9051_v10  ;;  %v9039_v36 = vmul.f32 %v11901_v31, %v13784_v29  ;;  %v10291_v29 = vld [vmem:[%s14088_s18 + $0x48] sm:$0xff] }
0x1051   : > { %v9054_v9 = vmul.f32 %v10274_v50, %v9040_v48  ;;  %v11611_v46 = vpack.c.bf16 %v10291_v29, %v10290_v5 }
0x1052   : > { %11392 = vmatprep.mubr.msk.f32.mxu0 %vm876_vm0, %v13834_v25  ;;  %v9053_v33 = vmul.f32 %v10274_v50, %v9039_v36 }
0x1053   : > { %11393 = vmatmul.mubr.msk.f32.gmra.mrb[126].mxu0 %vm876_vm0, %v13837_v54  ;;  %v13845_v23 = vadd.f32 %v10275_v61, %v9054_v9  ;;  %11612 = vmatprep.subr.bf16.mxu0 %v11611_v46 }
0x1054   : > { %v13843_v53 = vadd.f32 %v10275_v61, %v9053_v33  ;;  %11614 = vmatpush3.bf16.msra.mxu0 %v11611_v46 }
0x1055   : > { %11616 = vmatprep.subr.bf16.mxu0 %v11615_v35 }
0x1056   : > { %11395 = vmatprep.mubr.msk.f32.mxu0 %vm876_vm0, %v13843_v53 }
0x1057   : > { %11396 = vmatmul.mubr.msk.f32.gmra.mrb[128].mxu0 %vm876_vm0, %v13845_v23 }
0x1058   : > { %11618 = vmatpush3.bf16.msra.mxu0 %v11615_v35 }
0x1059   : > { %11620 = vmatprep.subr.bf16.mxu0 %v11619_v20 }
0x105c   : > { %11622 = vmatpush3.bf16.msra.mxu0 %v11619_v20 }
0x105d   : > { %11624 = vmatprep.subr.bf16.mxu0 %v11623_v57 }
0x1060   : > { %11626 = vmatpush3.bf16.msra.mxu0 %v11623_v57 }
0x111e   : > { %v11388_v28 = vpop.f32.mrb[122].mxu0 }
0x111f   : > { %v13878_v16 = vadd.f32 %v11388_v28, %v10281_v14  ;;  %v9172_v30 = vpop.f32.mrb[123].mxu0 }
0x1120   : > { %v13880_v6 = vadd.f32 %v10281_v14, %v9172_v30 }
0x1121   : > { %v9212_v44 = vmul.f32 %v13878_v16, %v13878_v16 }
0x1122   : > { %v9211_v52 = vmul.f32 %v13880_v6, %v13880_v6  ;;  %v11391_v12 = vpop.f32.mrb[124].mxu0 }
0x1123   : > { %v9220_v58 = vmul.f32 %v9212_v44, %v13878_v16  ;;  %v13887_v15 = vadd.f32 %v11391_v12, %v10281_v14  ;;  %v9182_v59 = vpop.f32.mrb[125].mxu0 }
0x1124   : > { %v9219_v60 = vmul.f32 %v9211_v52, %v13880_v6  ;;  %v13890_v43 = vadd.f32 %v10281_v14, %v9182_v59 }
0x1125   : > { %v9228_v2 = vmul.f32 0.044715, %v9220_v58  ;;  %v9214_v34 = vmul.f32 %v13887_v15, %v13887_v15 }
0x1126   : > { %v9227_v39 = vmul.f32 0.044715, %v9219_v60  ;;  %v9213_v18 = vmul.f32 %v13890_v43, %v13890_v43  ;;  %v11394_v50 = vpop.f32.mrb[126].mxu0 }
0x1127   : > { %v9236_v21 = vadd.f32 %v9228_v2, %v13878_v16  ;;  %v9222_v45 = vmul.f32 %v9214_v34, %v13887_v15  ;;  %v13898_v41 = vadd.f32 %v11394_v50, %v10281_v14  ;;  %v9192_v19 = vpop.f32.mrb[127].mxu0 }
0x1128   : > { %v9235_v61 = vadd.f32 %v9227_v39, %v13880_v6  ;;  %v9221_v32 = vmul.f32 %v9213_v18, %v13890_v43  ;;  %v13902_v49 = vadd.f32 %v10281_v14, %v9192_v19 }
0x1129   : > { %v9244_v55 = vmul.f32 0.7978846, %v9236_v21  ;;  %v9230_v1 = vmul.f32 0.044715, %v9222_v45  ;;  %v9216_v3 = vmul.f32 %v13898_v41, %v13898_v41 }
0x112a   : > { %v9243_v26 = vmul.f32 0.7978846, %v9235_v61  ;;  %v9229_v27 = vmul.f32 0.044715, %v9221_v32  ;;  %v9215_v56 = vmul.f32 %v13902_v49, %v13902_v49  ;;  %v11397_v38 = vpop.f32.mrb[128].mxu0 }
0x112b   : > { %11902 = vtanh.f32 %v9244_v55  ;;  %v9238_v8 = vadd.f32 %v9230_v1, %v13887_v15  ;;  %v9224_v22 = vmul.f32 %v9216_v3, %v13898_v41  ;;  %v13910_v17 = vadd.f32 %v11397_v38, %v10281_v14  ;;  %v9202_v51 = vpop.f32.mrb[129].mxu0 }
0x112c   : > { %11904 = vtanh.f32 %v9243_v26  ;;  %v9237_v4 = vadd.f32 %v9229_v27, %v13890_v43  ;;  %v9223_v10 = vmul.f32 %v9215_v56, %v13902_v49  ;;  %v9203_v31 = vadd.f32 %v10281_v14, %v9202_v51 }
0x112d   : > { %v9246_v48 = vmul.f32 0.7978846, %v9238_v8  ;;  %v9232_v36 = vmul.f32 0.044715, %v9224_v22  ;;  %v9218_v9 = vmul.f32 %v13910_v17, %v13910_v17 }
0x112e   : > { %v9245_v33 = vmul.f32 0.7978846, %v9237_v4  ;;  %v9231_v5 = vmul.f32 0.044715, %v9223_v10  ;;  %v9217_v29 = vmul.f32 %v9203_v31, %v9203_v31 }
0x112f   : > { %11906 = vtanh.f32 %v9246_v48  ;;  %v9240_v46 = vadd.f32 %v9232_v36, %v13898_v41  ;;  %v9226_v7 = vmul.f32 %v9218_v9, %v13910_v17 }
0x1130   : > { %11908 = vtanh.f32 %v9245_v33  ;;  %v9239_v37 = vadd.f32 %v9231_v5, %v13902_v49  ;;  %v9225_v35 = vmul.f32 %v9217_v29, %v9203_v31 }
0x1131   : > { %v9248_v47 = vmul.f32 0.7978846, %v9240_v46  ;;  %v9234_v40 = vmul.f32 0.044715, %v9226_v7 }
0x1132   : > { %v9247_v20 = vmul.f32 0.7978846, %v9239_v37  ;;  %v9233_v11 = vmul.f32 0.044715, %v9225_v35 }
0x1133   : > { %11910 = vtanh.f32 %v9248_v47  ;;  %v9242_v13 = vadd.f32 %v9234_v40, %v13910_v17 }
0x1134   : > { %11912 = vtanh.f32 %v9247_v20  ;;  %v9241_v57 = vadd.f32 %v9233_v11, %v9203_v31 }
0x1135   : > { %v11903_v14 = vpop.eup %11902  ;;  %v9250_v28 = vmul.f32 0.7978846, %v9242_v13 }
0x1136   : > { %v11905_v30 = vpop.eup %11904  ;;  %v9260_v44 = vadd.f32 1.0, %v11903_v14  ;;  %v9249_v52 = vmul.f32 0.7978846, %v9241_v57 }
0x1137   : > { %11914 = vtanh.f32 %v9250_v28  ;;  %v9259_v12 = vadd.f32 1.0, %v11905_v30 }
0x1138   : > { %v9268_v58 = vmul.f32 0.5, %v9260_v44  ;;  %11916 = vtanh.f32 %v9249_v52 }
0x1139   : > { %v11907_v59 = vpop.eup %11906  ;;  %v9267_v60 = vmul.f32 0.5, %v9259_v12 }
0x113a   : > { %v11909_v2 = vpop.eup %11908  ;;  %v9262_v34 = vadd.f32 1.0, %v11907_v59  ;;  %v9276_v50 = vmul.f32 %v9268_v58, %v13878_v16 }
0x113b   : > { %v9275_v39 = vmul.f32 %v9267_v60, %v13880_v6  ;;  %v9261_v18 = vadd.f32 1.0, %v11909_v2 }
0x113c   : > { %v9270_v21 = vmul.f32 0.5, %v9262_v34 }
0x113d   : > { %v11911_v45 = vpop.eup %11910  ;;  %11414 = vmatprep.mubr.msk.f32.mxu0 %vm5041_vm4, %v9275_v39  ;;  %v9269_v19 = vmul.f32 0.5, %v9261_v18 }
0x113e   : > { %v11913_v61 = vpop.eup %11912  ;;  %11415 = vmatmul.mubr.msk.f32.vlgmr.msra.gmra.mrb[130].mxu0 %vm5041_vm4, %v9276_v50  ;;  %v9264_v32 = vadd.f32 1.0, %v11911_v45  ;;  %v9278_v3 = vmul.f32 %v9270_v21, %v13887_v15 }
0x113f   : > { %v9277_v55 = vmul.f32 %v9269_v19, %v13890_v43  ;;  %v9263_v1 = vadd.f32 1.0, %v11913_v61 }
0x1140   : > { %v9272_v26 = vmul.f32 0.5, %v9264_v32 }
0x1141   : > { %v11915_v27 = vpop.eup %11914  ;;  %11417 = vmatprep.mubr.msk.f32.mxu0 %vm5041_vm4, %v9277_v55  ;;  %v9271_v6 = vmul.f32 0.5, %v9263_v1 }
0x1142   : > { %v11917_v16 = vpop.eup %11916  ;;  %11418 = vmatmul.mubr.msk.f32.gmra.mrb[132].mxu0 %vm5041_vm4, %v9278_v3  ;;  %v9266_v56 = vadd.f32 1.0, %v11915_v27  ;;  %v9280_v22 = vmul.f32 %v9272_v26, %v13898_v41  ;;  %v10299_v41 = vld [vmem:[%s14089_s19 + $0x1] ss:$0 sm:$0xff] }
0x1143   : > { %v9279_v38 = vmul.f32 %v9271_v6, %v13902_v49  ;;  %v9265_v8 = vadd.f32 1.0, %v11917_v16 }
0x1144   : > { %v9274_v51 = vmul.f32 0.5, %v9266_v56 }
0x1145   : > { %11420 = vmatprep.mubr.msk.f32.mxu0 %vm5041_vm4, %v9279_v38  ;;  %v9273_v43 = vmul.f32 0.5, %v9265_v8 }
0x1146   : > { %11421 = vmatmul.mubr.msk.f32.gmra.mrb[134].mxu0 %vm5041_vm4, %v9280_v22  ;;  %v9282_v4 = vmul.f32 %v9274_v51, %v13910_v17 }
0x1147   : > { %v9281_v15 = vmul.f32 %v9273_v43, %v9203_v31 }
0x1149   : > { %11423 = vmatprep.mubr.msk.f32.mxu0 %vm5041_vm4, %v9281_v15 }
0x114a   : > { %11424 = vmatmul.mubr.msk.f32.gmra.mrb[136].mxu0 %vm5041_vm4, %v9282_v4 }
0x114b   : > { %11453 = vmatprep.mubr.msk.f32.mxu0 %vm11957_vm1, %v11956_v24 }
0x1211   : > { %v11416_v49 = vpop.f32.mrb[130].mxu0 }
0x1212   : > { %v9396_v10 = vadd.f32 %v11416_v49, %v10299_v41  ;;  %v9390_v48 = vpop.f32.mrb[131].mxu0 }
0x1213   : > { %v9391_v36 = vadd.f32 %v10299_v41, %v9390_v48 }
0x1214   : > { %v9430_v9 = vadd.f32 %v9396_v10, %v13817_v62 }
0x1215   : > { %v9429_v31 = vadd.f32 %v9391_v36, %v13814_v42  ;;  %v11419_v17 = vpop.f32.mrb[132].mxu0 }
0x1216   : > { %v9406_v33 = vadd.f32 %v11419_v17, %v10299_v41  ;;  %v9400_v5 = vpop.f32.mrb[133].mxu0  ;;  %v9444_v29 = vsel %vm876_vm0, %v9430_v9, 0.0 }
0x1217   : > { %v9401_v46 = vadd.f32 %v10299_v41, %v9400_v5  ;;  %9445 = vadd.xlane.f32.xlu1 %v9444_v29  ;;  %v9441_v7 = vsel %vm876_vm0, %v9429_v31, 0.0  ;;  %v11958_v29 = vmov 0.0|0.0  }
0x1218   : > { %v9432_v37 = vadd.f32 %v9406_v33, %v13827_v0  ;;  %9442 = vadd.xlane.f32.xlu0 %v9441_v7  ;;  %11627 = vmatprep.subr.bf16.mxu1 %v11958_v29  ;;  %v9648_v7 = vld [vmem:[%s14092_s22 + $0x8] sm:$0xff] }
0x1219   : > { %v9431_v35 = vadd.f32 %v9401_v46, %v13824_v63  ;;  %v11422_v47 = vpop.f32.mrb[134].mxu0  ;;  %11639 = vmatprep.subr.bf16.mxu0 %v11958_v29  ;;  %v9647_v46 = vld [vmem:[%s14092_s22] sm:$0xff] }
0x121a   : > { %v9416_v40 = vadd.f32 %v11422_v47, %v10299_v41  ;;  %v9410_v20 = vpop.f32.mrb[135].mxu0  ;;  %v9450_v62 = vsel %vm876_vm0, %v9432_v37, 0.0  ;;  %v9650_v47 = vld [vmem:[%s14092_s22 + $0x18] sm:$0xff] }
0x121b   : > { %v9411_v42 = vadd.f32 %v10299_v41, %v9410_v20  ;;  %9451 = vadd.xlane.f32.xlu1 %v9450_v62  ;;  %v9447_v11 = vsel %vm876_vm0, %v9431_v35, 0.0 }
0x121c   : > { %v9434_v13 = vadd.f32 %v9416_v40, %v13837_v54  ;;  %9448 = vadd.xlane.f32.xlu0 %v9447_v11 }
0x121d   : > { %v9433_v57 = vadd.f32 %v9411_v42, %v13834_v25  ;;  %v11425_v14 = vpop.f32.mrb[136].mxu0 }
0x121e   : > { %v9426_v28 = vadd.f32 %v11425_v14, %v10299_v41  ;;  %v9420_v0 = vpop.f32.mrb[137].mxu0  ;;  %v9456_v30 = vsel %vm876_vm0, %v9434_v13, 0.0 }
0x121f   : > { %v9421_v63 = vadd.f32 %v10299_v41, %v9420_v0  ;;  %9457 = vadd.xlane.f32.xlu1 %v9456_v30  ;;  %v9453_v44 = vsel %vm876_vm0, %v9433_v57, 0.0 }
0x1220   : > { %v9436_v52 = vadd.f32 %v9426_v28, %v13845_v23  ;;  %9454 = vadd.xlane.f32.xlu0 %v9453_v44 }
0x1221   : > { %v9435_v12 = vadd.f32 %v9421_v63, %v13843_v53 }
0x1222   : > { %v9462_v58 = vsel %vm876_vm0, %v9436_v52, 0.0 }
0x1223   : > { %9463 = vadd.xlane.f32.xlu1 %v9462_v58  ;;  %v9459_v54 = vsel %vm876_vm0, %v9435_v12, 0.0 }
0x1224   : > { %9460 = vadd.xlane.f32.xlu0 %v9459_v54 }
0x12a4   : > { %v9446_v25 = vpop.xlane.xlu1 %9445 }
0x12a5   : > { %v9466_v59 = vmul.f32 0.03125, %v9446_v25  ;;  %v9443_v60 = vpop.xlane.xlu0 %9442 }
0x12a6   : > { %v9465_v2 = vmul.f32 0.03125, %v9443_v60 }
0x12a7   : > { %v13956_v34 = vsub.f32 %v9430_v9, %v9466_v59 }
0x12a8   : > { %v13958_v39 = vsub.f32 %v9429_v31, %v9465_v2  ;;  %v9452_v18 = vpop.xlane.xlu1 %9451 }
0x12a9   : > { %v9468_v50 = vmul.f32 0.03125, %v9452_v18  ;;  %v9449_v23 = vpop.xlane.xlu0 %9448  ;;  %v9482_v53 = vmul.f32 %v13956_v34, %v13956_v34 }
0x12aa   : > { %v9467_v21 = vmul.f32 0.03125, %v9449_v23  ;;  %v9481_v45 = vmul.f32 %v13958_v39, %v13958_v39 }
0x12ab   : > { %v13964_v19 = vsub.f32 %v9432_v37, %v9468_v50  ;;  %v9492_v61 = vsel %vm876_vm0, %v9482_v53, 0.0  ;;  %v9649_v37 = vld [vmem:[%s14092_s22 + $0x10] sm:$0xff] }
0x12ac   : > { %v13967_v32 = vsub.f32 %v9431_v35, %v9467_v21  ;;  %v9458_v55 = vpop.xlane.xlu1 %9457  ;;  %9493 = vadd.xlane.f32.xlu1 %v9492_v61  ;;  %v9489_v1 = vsel %vm876_vm0, %v9481_v45, 0.0  ;;  %v11640_v35 = vpack.c.bf16 %v9648_v7, %v9647_v46  ;;  %v11643_v40 = vpack.c.bf16 %v9650_v47, %v9649_v37  ;;  %v10310_v21 = vld [vmem:[%s14090_s20 + $0x1] ss:$0 sm:$0xff] }
0x12ad   : > { %v9470_v3 = vmul.f32 0.03125, %v9458_v55  ;;  %v9455_v26 = vpop.xlane.xlu0 %9454  ;;  %9490 = vadd.xlane.f32.xlu0 %v9489_v1  ;;  %v9484_v27 = vmul.f32 %v13964_v19, %v13964_v19 }
0x12ae   : > { %v9469_v6 = vmul.f32 0.03125, %v9455_v26  ;;  %v9483_v16 = vmul.f32 %v13967_v32, %v13967_v32  ;;  %11641 = vmatpush3.bf16.msra.mxu0 %v11640_v35 }
0x12af   : > { %v13974_v56 = vsub.f32 %v9434_v13, %v9470_v3  ;;  %v9498_v38 = vsel %vm876_vm0, %v9484_v27, 0.0  ;;  %11642 = vmatprep.subr.bf16.mxu0 %v11958_v29  ;;  %v10311_v3 = vld [vmem:[%s14091_s21 + $0x1] ss:$0 sm:$0xff] }
0x12b0   : > { %v13977_v8 = vsub.f32 %v9433_v57, %v9469_v6  ;;  %9499 = vadd.xlane.f32.xlu1 %v9498_v38  ;;  %v9464_v22 = vpop.xlane.xlu1 %9463  ;;  %v9495_v51 = vsel %vm876_vm0, %v9483_v16, 0.0 }
0x12b1   : > { %v9472_v43 = vmul.f32 0.03125, %v9464_v22  ;;  %9496 = vadd.xlane.f32.xlu0 %v9495_v51  ;;  %v9461_v15 = vpop.xlane.xlu0 %9460  ;;  %v9486_v4 = vmul.f32 %v13974_v56, %v13974_v56 }
0x12b2   : > { %v9471_v41 = vmul.f32 0.03125, %v9461_v15  ;;  %v9485_v49 = vmul.f32 %v13977_v8, %v13977_v8  ;;  %11644 = vmatpush3.bf16.msra.mxu0 %v11643_v40 }
0x12b3   : > { %v13984_v10 = vsub.f32 %v9436_v52, %v9472_v43  ;;  %v9504_v48 = vsel %vm876_vm0, %v9486_v4, 0.0 }
0x12b4   : > { %v13987_v36 = vsub.f32 %v9435_v12, %v9471_v41  ;;  %9505 = vadd.xlane.f32.xlu1 %v9504_v48  ;;  %v9501_v9 = vsel %vm876_vm0, %v9485_v49, 0.0 }
0x12b5   : > { %9502 = vadd.xlane.f32.xlu0 %v9501_v9  ;;  %v9488_v31 = vmul.f32 %v13984_v10, %v13984_v10 }
0x12b6   : > { %v9487_v17 = vmul.f32 %v13987_v36, %v13987_v36 }
0x12b7   : > { %v9510_v33 = vsel %vm876_vm0, %v9488_v31, 0.0 }
0x12b8   : > { %9511 = vadd.xlane.f32.xlu1 %v9510_v33  ;;  %v9507_v5 = vsel %vm876_vm0, %v9487_v17, 0.0 }
0x12b9   : > { %9508 = vadd.xlane.f32.xlu0 %v9507_v5 }
0x1339   : > { %v9494_v20 = vpop.xlane.xlu1 %9493 }
0x133a   : > { %v9514_v62 = vmul.f32 0.03125, %v9494_v20  ;;  %v9491_v42 = vpop.xlane.xlu0 %9490 }
0x133b   : > { %v9513_v11 = vmul.f32 0.03125, %v9491_v42 }
0x133c   : > { %v9522_v13 = vadd.f32 1e-12, %v9514_v62 }
0x133d   : > { %v9521_v57 = vadd.f32 1e-12, %v9513_v11  ;;  %v9500_v14 = vpop.xlane.xlu1 %9499  ;;  %v9732_v11 = vld [vmem:[%s14094_s24] sm:$0xff] }
0x133e   : > { %11918 = vrsqrt.f32 %v9522_v13  ;;  %v9516_v28 = vmul.f32 0.03125, %v9500_v14  ;;  %v9497_v0 = vpop.xlane.xlu0 %9496  ;;  %v9733_v13 = vld [vmem:[%s14094_s24 + $0x8] sm:$0xff] }
0x133f   : > { %11920 = vrsqrt.f32 %v9521_v57  ;;  %v9515_v30 = vmul.f32 0.03125, %v9497_v0  ;;  %v9734_v57 = vld [vmem:[%s14094_s24 + $0x10] sm:$0xff]  ;;  %v11646_v14 = vpack.c.bf16 %v9733_v13, %v9732_v11  ;;  %v10313_v0 = vld [vmem:[%s14093_s23] ss:$0 sm:$0xff] }
0x1340   : > { %v9524_v63 = vadd.f32 1e-12, %v9516_v28 }
0x1341   : > { %v9523_v44 = vadd.f32 1e-12, %v9515_v30  ;;  %v9506_v52 = vpop.xlane.xlu1 %9505 }
0x1342   : > { %11922 = vrsqrt.f32 %v9524_v63  ;;  %v9518_v12 = vmul.f32 0.03125, %v9506_v52  ;;  %v9503_v58 = vpop.xlane.xlu0 %9502 }
0x1343   : > { %11924 = vrsqrt.f32 %v9523_v44  ;;  %v9517_v54 = vmul.f32 0.03125, %v9503_v58 }
0x1344   : > { %v9526_v25 = vadd.f32 1e-12, %v9518_v12  ;;  %v10315_v12 = vld [vmem:[%s14132_s26] ss:$0 sm:$0xff]  ;;  %s14135_s26 = sld [smem:[#allocation17_spill]] }
0x1345   : > { %v9525_v59 = vadd.f32 1e-12, %v9517_v54  ;;  %v9512_v60 = vpop.xlane.xlu1 %9511 }
0x1346   : > { %11926 = vrsqrt.f32 %v9526_v25  ;;  %v9520_v2 = vmul.f32 0.03125, %v9512_v60  ;;  %v9509_v18 = vpop.xlane.xlu0 %9508 }
0x1347   : > { %11928 = vrsqrt.f32 %v9525_v59  ;;  %v9519_v50 = vmul.f32 0.03125, %v9509_v18 }
0x1348   : > { %v11919_v23 = vpop.eup %11918  ;;  %v9528_v53 = vadd.f32 1e-12, %v9520_v2 }
0x1349   : > { %v11921_v45 = vpop.eup %11920  ;;  %v9538_v61 = vmul.f32 %v11919_v23, %v13956_v34  ;;  %v9527_v55 = vadd.f32 1e-12, %v9519_v50 }
0x134a   : > { %v9537_v1 = vmul.f32 %v11921_v45, %v13958_v39  ;;  %11930 = vrsqrt.f32 %v9528_v53 }
0x134b   : > { %11932 = vrsqrt.f32 %v9527_v55  ;;  %v9552_v26 = vmul.f32 %v10310_v21, %v9538_v61 }
0x134c   : > { %v11923_v27 = vpop.eup %11922  ;;  %v9551_v6 = vmul.f32 %v10310_v21, %v9537_v1 }
0x134d   : > { %v11925_v16 = vpop.eup %11924  ;;  %v9540_v38 = vmul.f32 %v11923_v27, %v13964_v19  ;;  %v9566_v22 = vadd.f32 %v10311_v3, %v9552_v26 }
0x134e   : > { %v9539_v51 = vmul.f32 %v11925_v16, %v13967_v32  ;;  %v9565_v43 = vadd.f32 %v10311_v3, %v9551_v6 }
0x134f   : > { %v9554_v34 = vmul.f32 %v10310_v21, %v9540_v38 }
0x1350   : > { %v11927_v15 = vpop.eup %11926  ;;  %v11628_v4 = vpack.c.bf16 %v9566_v22, %v9565_v43  ;;  %v9553_v39 = vmul.f32 %v10310_v21, %v9539_v51 }
0x1351   : > { %v11929_v41 = vpop.eup %11928  ;;  %v9542_v49 = vmul.f32 %v11927_v15, %v13974_v56  ;;  %v9568_v48 = vadd.f32 %v10311_v3, %v9554_v34 }
0x1352   : > { %v9541_v9 = vmul.f32 %v11929_v41, %v13977_v8  ;;  %11629 = vmatpush3.bf16.msra.mxu1 %v11628_v4  ;;  %v9567_v31 = vadd.f32 %v10311_v3, %v9553_v39 }
0x1353   : > { %11630 = vmatprep.subr.bf16.mxu1 %v11958_v29  ;;  %v9556_v17 = vmul.f32 %v10310_v21, %v9542_v49 }
0x1354   : > { %v11931_v19 = vpop.eup %11930  ;;  %v11631_v33 = vpack.c.bf16 %v9568_v48, %v9567_v31  ;;  %v9555_v5 = vmul.f32 %v10310_v21, %v9541_v9 }
0x1355   : > { %v11933_v32 = vpop.eup %11932  ;;  %v9544_v46 = vmul.f32 %v11931_v19, %v13984_v10  ;;  %v9570_v7 = vadd.f32 %v10311_v3, %v9556_v17  ;;  %v9573_v10 = vld [vmem:[%s14131_s11] sm:$0xff]  ;;  %s9947_s11 = sshll.u32 %s14140_s4, 3 }
0x1356   : > { %v9543_v37 = vmul.f32 %v11933_v32, %v13987_v36  ;;  %11632 = vmatpush3.bf16.msra.mxu1 %v11631_v33  ;;  %v9569_v35 = vadd.f32 %v10311_v3, %v9555_v5  ;;  %s861_s7 = scalar_lea.vmem %s14133_s27, %s9947_s11  ;;  %s857_s6 = scalar_lea.vmem %s14134_s8, %s9947_s11 }
0x1357   : > { %11633 = vmatprep.subr.bf16.mxu1 %v11958_v29  ;;  %v9558_v56 = vmul.f32 %v10310_v21, %v9544_v46  ;;  %v9827_v53 = vld [vmem:[%s857_s6] sm:$0xff]  ;;  %s865_s9 = scalar_lea.vmem %s14135_s26, %s9947_s11 }
0x1358   : > { %v11634_v8 = vpack.c.bf16 %v9570_v7, %v9569_v35  ;;  %v9557_v47 = vmul.f32 %v10310_v21, %v9543_v37 }
0x1359   : > { %v9572_v40 = vadd.f32 %v10311_v3, %v9558_v56 }
0x135a   : > { %11635 = vmatpush3.bf16.msra.mxu1 %v11634_v8  ;;  %v9571_v20 = vadd.f32 %v10311_v3, %v9557_v47 }
0x135b   : > { %11636 = vmatprep.subr.bf16.mxu1 %v11958_v29 }
0x135c   : > { %v11637_v62 = vpack.c.bf16 %v9572_v40, %v9571_v20 }
0x135e   : > { %11638 = vmatpush3.bf16.msra.mxu1 %v11637_v62 }
0x135f   : > { %11645 = vmatprep.subr.bf16.mxu1 %v11958_v29 }
0x1361   : > { %11443 = vmatmul.mubr.msk.f32.vlgmr.msra.gmra.mrb[134].mxu1 %vm5041_vm4, %v9573_v10 }
0x1362   : > { %11464 = vmatprep.mubr.msk.f32.mxu1 %vm11957_vm1, %v11956_v24  ;;  %v9735_v24 = vld [vmem:[%s14094_s24 + $0x18] sm:$0xff]  ;;  %11647 = vmatpush3.bf16.msra.mxu1 %v11646_v14 }
0x1363   : > { %v11649_v28 = vpack.c.bf16 %v9735_v24, %v9734_v57  ;;  %11648 = vmatprep.subr.bf16.mxu1 %v11958_v29 }
0x1366   : > { %11650 = vmatpush3.bf16.msra.mxu1 %v11649_v28 }
0x1434   : > { %v9643_v36 = vpop.f32.mrb[134].mxu1 }
0x1435   : > { %v11444_v42 = vpop.f32.mrb[135].mxu1  ;;  %11454 = vmatmul.mubr.msk.f32.vlgmr.msra.gmra.mrb[138].mxu0 %vm876_vm0, %v9643_v36 }
0x1508   : > { %v9727_v30 = vpop.f32.mrb[138].mxu0 }
0x1509   : > { %v9728_v63 = vadd.f32 %v10313_v0, %v9727_v30  ;;  %v11455_v44 = vpop.f32.mrb[139].mxu0 }
0x150b   : > { %11934 = vtanh.f32 %v9728_v63 }
0x1515   : > { %v11935_v52 = vpop.eup %11934 }
0x1516   : > { %11465 = vmatmul.mubr.msk.f32.vlgmr.msra.gmra.mrb[136].mxu1 %vm876_vm0, %v11935_v52 }
0x15e9   : > { %v9812_v29 = vpop.f32.mrb[136].mxu1 }
0x15ea   : > { %v9813_v58 = vadd.f32 %v10315_v12, %v9812_v29  ;;  %v11466_v54 = vpop.f32.mrb[137].mxu1 }
0x15ec   : > { %9816 = vst [vmem:[%s861_s7] sm:$0xff] %v9813_v58  ;;  %9817 = vmax.xlane.f32.xlu0 %v9813_v58 }
0x1679   : > { %v9818_v25 = vpop.xlane.xlu0 %9817 }
0x167a   : > { %v9819_v59 = vsub.f32 %v9813_v58, %v9818_v25 }
0x167c   : > { %v9820_v60 = vmul.f32 1.442695, %v9819_v59 }
0x167e   : > { %11936 = vpow2.f32 %v9820_v60 }
0x1688   : > { %v11937_v2 = vpop.eup %11936 }
0x1689   : > { %9822 = vadd.xlane.f32.xlu1 %v11937_v2 }
0x1716   : > { %v9823_v18 = vpop.xlane.xlu1 %9822 }
0x1717   : > { %11938 = vlog2.f32 %v9823_v18 }
0x1721   : > { %v11939_v50 = vpop.eup %11938 }
0x1722   : > { %v9825_v23 = vmul.f32 0.6931472, %v11939_v50 }
0x1724   : > { %v9826_v21 = vsub.f32 %v9819_v59, %v9825_v23 }
0x1726   : > { %v9828_v45 = vmul.f32 %v9827_v53, %v9826_v21 }
0x1728   : > { %9829 = vadd.xlane.f32.xlu0 %v9828_v45 }
0x17b5   : > { %v9830_v61 = vpop.xlane.xlu0 %9829 }
0x17b6   : > { %v9831_v55 = vsub.f32 0.0, %v9830_v61 }
0x17b8   : > { %9833 = vst.msk [vmem:[%s865_s9] sm:$0xff] %vm9832_vm5, %v9831_v55 }
0x17b9 PF: > { %s14136_s0 = sld [smem:[#allocation2_spill]] }
0x17bf   : > { %s38_s7 = sadd.s32 1, %s14136_s0  }
0x17c0   : > { %p35_p5 = scmp.ge.s32.totalorder %s38_s7, 4  }
0x17c2   :  { %37 = sbr.rel (!%p35_p5) target bundleno = 16 (0x10), region = 202 }

</bundles_post_ra>
